<compile_context>
chip_gen: v5e
topology: v5e:2x2
jax: 0.10.0
libtpu: 0.0.40
codegen_flags: <defaults>
</compile_context>

<pallas_src>
import jax
import jax.numpy as jnp
from jax.experimental import pallas as pl
from jax.experimental.pallas import tpu as pltpu

# ---- model hyper-params (module defaults: num_head=8, d_k=d_v=20) ----------
D_MODEL    = 32
D_INNER    = 64
NUM_HEAD   = 8
D_K        = 20
D_V        = 20
D_PAD      = 32                       # d_k / d_v zero-padded to a lane-friendly 32
NUM_LAYERS = 2
LN_EPS     = 1e-5                     # torch.nn.LayerNorm default
VEC_W      = 3 * NUM_HEAD * D_PAD     # 768 = lane width of the packed bias blob


# ----------------------------- Pallas kernel --------------------------------
def _layer_norm(v, w, b):
    mu = jnp.mean(v, axis=-1, keepdims=True)
    var = jnp.mean(jnp.square(v - mu), axis=-1, keepdims=True)
    return (v - mu) * jax.lax.rsqrt(var + LN_EPS) * w + b


def encoder_kernel(x_ref, wqkv_ref, wo_ref, w1_ref, w2_ref, vec_ref, out_ref):
    B, S, D = x_ref.shape
    H, DP = NUM_HEAD, D_PAD

    x = x_ref[...].reshape(B * S, D)                 # flattened (B*S, D) slab

    for l in range(NUM_LAYERS):                      # fused layer stack
        vl = vec_ref[l]                              # (8, VEC_W) packed vectors
        # rows: 0=bo 1=ln1w 2=ln1b 3=b1 4=b2 5=ln2w 6=ln2b 7=bqkv

        # ---- fused QKV projection (1/sqrt(d_k) folded into Wq/bq) ----------
        qkv = jnp.dot(x, wqkv_ref[l],
                      preferred_element_type=jnp.float32) + vl[7:8, :]
        qkv = qkv.reshape(B, S, 3 * H * DP)

        # ---- per-head attention, batched over B ----------------------------
        ctx_parts = []
        for h in range(H):
            qh = qkv[:, :, h * DP:(h + 1) * DP]
            kh = qkv[:, :, (H + h) * DP:(H + h + 1) * DP]
            vh = qkv[:, :, (2 * H + h) * DP:(2 * H + h + 1) * DP]
            s = jnp.einsum('bqd,bkd->bqk', qh, kh,
                           preferred_element_type=jnp.float32)
            s = s - jnp.max(s, axis=-1, keepdims=True)
            p = jnp.exp(s)
            p = p * pl.reciprocal(jnp.sum(p, axis=-1, keepdims=True))
            ctx_parts.append(jnp.einsum('bqk,bkd->bqd', p, vh,
                                        preferred_element_type=jnp.float32))
        ctx = jnp.concatenate(ctx_parts, axis=-1).reshape(B * S, H * DP)

        # ---- fused output projection + residual + LayerNorm 1 --------------
        attn = jnp.dot(ctx, wo_ref[l],
                       preferred_element_type=jnp.float32) + vl[0:1, :D]
        y = _layer_norm(x + attn, vl[1:2, :D], vl[2:3, :D])

        # ---- position-wise feed-forward + residual + LayerNorm 2 -----------
        h1 = jnp.maximum(
            jnp.dot(y, w1_ref[l],
                    preferred_element_type=jnp.float32) + vl[3:4, :D_INNER],
            0.0)
        f = jnp.dot(h1, w2_ref[l],
                    preferred_element_type=jnp.float32) + vl[4:5, :D]
        x = _layer_norm(y + f, vl[5:6, :D], vl[6:7, :D])

    out_ref[...] = x.reshape(B, S, D)


def transformer_encoder(x, packed):
    """Matches TransformerEncoder.forward(output, mask=None) default path."""
    wqkv, wo, w1, w2, vecs = packed
    B, S, D = x.shape
    vmem = lambda: pl.BlockSpec(memory_space=pltpu.MemorySpace.VMEM)
    return pl.pallas_call(
        encoder_kernel,
        out_shape=jax.ShapeDtypeStruct((B, S, D), jnp.float32),
        in_specs=[vmem() for _ in range(6)],
        out_specs=vmem(),
    )(x, wqkv, wo, w1, w2, vecs)


# --------------------------- parameter packing -------------------------------
def pack_layer(p):
    inv_temp = 1.0 / (D_K ** 0.5)

    def pad_last(a, to):
        return jnp.pad(a, [(0, 0)] * (a.ndim - 1) + [(0, to - a.shape[-1])])

    def heads_to_lanes(w):                       # (H, D, DP) -> (D, H*DP)
        return jnp.transpose(w, (1, 0, 2)).reshape(D_MODEL, NUM_HEAD * D_PAD)

    wq = pad_last(p["wq"] * inv_temp, D_PAD)     # fold score scale into Wq
    wk = pad_last(p["wk"], D_PAD)
    wv = pad_last(p["wv"], D_PAD)
    wqkv = jnp.concatenate(
        [heads_to_lanes(wq), heads_to_lanes(wk), heads_to_lanes(wv)], axis=-1)

    bq = pad_last(p["bq"].reshape(NUM_HEAD, D_K) * inv_temp, D_PAD).reshape(-1)
    bk = pad_last(p["bk"].reshape(NUM_HEAD, D_K), D_PAD).reshape(-1)
    bv = pad_last(p["bv"].reshape(NUM_HEAD, D_V), D_PAD).reshape(-1)
    bqkv = jnp.concatenate([bq, bk, bv])         # (3*H*DP,)

    wo = jnp.pad(p["wo"], ((0, 0), (0, D_PAD - D_V), (0, 0))
                 ).reshape(NUM_HEAD * D_PAD, D_MODEL)

    def row(v):
        v = v.reshape(-1)
        return jnp.pad(v, (0, VEC_W - v.shape[0]))

    vecs = jnp.stack([row(p["bo"]), row(p["ln1w"]), row(p["ln1b"]),
                      row(p["b1"]), row(p["b2"]), row(p["ln2w"]), row(p["ln2b"]),
                      bqkv])                     # (8, VEC_W)
    return wqkv, wo, p["w1"], p["w2"], vecs


def pack_params(layer_params):
    per_layer = [pack_layer(p) for p in layer_params]
    return tuple(jnp.stack([pk[i] for pk in per_layer]) for i in range(5))


# --------------------------- parameter init ---------------------------------
def init_layer_params(key):
    # init_weights: Linear weight ~ N(0, 0.02), bias = 0; LayerNorm w=1, b=0.
    ks = jax.random.split(key, 6)
    std = 0.02
    return dict(
        wq=std * jax.random.normal(ks[0], (NUM_HEAD, D_MODEL, D_K), jnp.float32),
        bq=jnp.zeros((NUM_HEAD, 1, D_K), jnp.float32),
        wk=std * jax.random.normal(ks[1], (NUM_HEAD, D_MODEL, D_K), jnp.float32),
        bk=jnp.zeros((NUM_HEAD, 1, D_K), jnp.float32),
        wv=std * jax.random.normal(ks[2], (NUM_HEAD, D_MODEL, D_V), jnp.float32),
        bv=jnp.zeros((NUM_HEAD, 1, D_V), jnp.float32),
        wo=std * jax.random.normal(ks[3], (NUM_HEAD, D_V, D_MODEL), jnp.float32),
        bo=jnp.zeros((1, D_MODEL), jnp.float32),
        ln1w=jnp.ones((1, D_MODEL), jnp.float32),
        ln1b=jnp.zeros((1, D_MODEL), jnp.float32),
        w1=std * jax.random.normal(ks[4], (D_MODEL, D_INNER), jnp.float32),
        b1=jnp.zeros((1, D_INNER), jnp.float32),
        w2=std * jax.random.normal(ks[5], (D_INNER, D_MODEL), jnp.float32),
        b2=jnp.zeros((1, D_MODEL), jnp.float32),
        ln2w=jnp.ones((1, D_MODEL), jnp.float32),
        ln2b=jnp.zeros((1, D_MODEL), jnp.float32),
    )


# --------------------------- pure-JAX reference ------------------------------
def _layer_norm_ref(x, w, b):
    mu = jnp.mean(x, axis=-1, keepdims=True)
    var = jnp.mean(jnp.square(x - mu), axis=-1, keepdims=True)
    return (x - mu) / jnp.sqrt(var + LN_EPS) * w + b


def encoder_layer_ref(x, p):
    q = jnp.einsum("bsd,hdk->bhsk", x, p["wq"]) + p["bq"][None]
    k = jnp.einsum("bsd,hdk->bhsk", x, p["wk"]) + p["bk"][None]
    v = jnp.einsum("bsd,hdk->bhsk", x, p["wv"]) + p["bv"][None]
    scores = jnp.einsum("bhqk,bhsk->bhqs", q, k) / (D_K ** 0.5)
    attn = jax.nn.softmax(scores, axis=-1)
    ctx = jnp.einsum("bhqs,bhsk->bhqk", attn, v)
    attn_out = jnp.einsum("bhqk,hkd->bqd", ctx, p["wo"]) + p["bo"]
    y = _layer_norm_ref(x + attn_out, p["ln1w"], p["ln1b"])
    h = jax.nn.relu(y @ p["w1"] + p["b1"])
    f = h @ p["w2"] + p["b2"]
    return _layer_norm_ref(y + f, p["ln2w"], p["ln2b"])


def transformer_encoder_ref(x, layer_params):
    out = x
    for p in layer_params:
        out = encoder_layer_ref(out, p)
    return out


# --------------------------------- main --------------------------------------
if __name__ == "__main__":
    B, S = 2, 8
    key = jax.random.PRNGKey(0)
    k_x, k_p = jax.random.split(key)
    x = jax.random.normal(k_x, (B, S, D_MODEL), jnp.float32)
    layer_params = [init_layer_params(jax.random.fold_in(k_p, i))
                    for i in range(NUM_LAYERS)]
    packed = pack_params(layer_params)

    out = jax.block_until_ready(transformer_encoder(x, packed))
    ref = jax.block_until_ready(transformer_encoder_ref(x, layer_params))

    assert out.shape == (B, S, D_MODEL)
    assert jnp.allclose(out, ref, rtol=1e-4, atol=1e-4), \
        f"max abs diff {jnp.max(jnp.abs(out - ref))}"

    print("KERNEL_OK")
</pallas_src>

<mosaic_0001>
module attributes {stable_mosaic.version = 11 : i64} {
  func.func @encoder_kernel(%arg0: memref<2x8x32xf32, #tpu.memory_space<vmem>>, %arg1: memref<2x32x768xf32, #tpu.memory_space<vmem>>, %arg2: memref<2x256x32xf32, #tpu.memory_space<vmem>>, %arg3: memref<2x32x64xf32, #tpu.memory_space<vmem>>, %arg4: memref<2x64x32xf32, #tpu.memory_space<vmem>>, %arg5: memref<2x8x768xf32, #tpu.memory_space<vmem>>, %arg6: memref<2x8x32xf32, #tpu.memory_space<vmem>>) attributes {dimension_semantics = [], scalar_prefetch = 0 : i64, scratch_operands = 0 : i64, tpu.core_type = #tpu.core_type<tc>} {
    %c0 = arith.constant 0 : index
    %c0_0 = arith.constant 0 : index
    %c0_1 = arith.constant 0 : index
    %0 = vector.load %arg0[%c0, %c0_0, %c0_1] : memref<2x8x32xf32, #tpu.memory_space<vmem>>, vector<2x8x32xf32>
    %1 = vector.shape_cast %0 : vector<2x8x32xf32> to vector<16x32xf32>
    %c0_2 = arith.constant 0 : index
    %c0_3 = arith.constant 0 : index
    %c0_4 = arith.constant 0 : index
    %2 = vector.load %arg5[%c0_2, %c0_3, %c0_4] : memref<2x8x768xf32, #tpu.memory_space<vmem>>, vector<1x8x768xf32>
    %3 = vector.shape_cast %2 : vector<1x8x768xf32> to vector<8x768xf32>
    %c0_5 = arith.constant 0 : index
    %c0_6 = arith.constant 0 : index
    %c0_7 = arith.constant 0 : index
    %4 = vector.load %arg1[%c0_5, %c0_6, %c0_7] : memref<2x32x768xf32, #tpu.memory_space<vmem>>, vector<1x32x768xf32>
    %5 = vector.shape_cast %4 : vector<1x32x768xf32> to vector<32x768xf32>
    %cst = arith.constant dense<0.000000e+00> : vector<16x768xf32>
    %6 = tpu.matmul %1, %5, %cst {dimension_numbers = #tpu.dot_dimension_numbers<[1], [0], [0], [1], [0, 0, 1, 1], [], []>} : vector<16x32xf32>, vector<32x768xf32>, vector<16x768xf32> -> vector<16x768xf32>
    %7 = vector.extract_strided_slice %3 {offsets = [7, 0], sizes = [1, 768], strides = [1, 1]} : vector<8x768xf32> to vector<1x768xf32>
    %8 = vector.broadcast %7 : vector<1x768xf32> to vector<16x768xf32>
    %9 = arith.addf %6, %8 : vector<16x768xf32>
    %10 = vector.shape_cast %9 : vector<16x768xf32> to vector<2x8x768xf32>
    %11 = vector.extract_strided_slice %10 {offsets = [0, 0, 0], sizes = [2, 8, 32], strides = [1, 1, 1]} : vector<2x8x768xf32> to vector<2x8x32xf32>
    %12 = vector.extract_strided_slice %10 {offsets = [0, 0, 256], sizes = [2, 8, 32], strides = [1, 1, 1]} : vector<2x8x768xf32> to vector<2x8x32xf32>
    %13 = vector.extract_strided_slice %10 {offsets = [0, 0, 512], sizes = [2, 8, 32], strides = [1, 1, 1]} : vector<2x8x768xf32> to vector<2x8x32xf32>
    "tpu.trace_start"() <{level = 10 : i32, message = "bqd,bkd->bqk"}> : () -> ()
    %cst_8 = arith.constant dense<0.000000e+00> : vector<2x8x8xf32>
    %14 = tpu.matmul %11, %12, %cst_8 {dimension_numbers = #tpu.dot_dimension_numbers<[2], [2], [1], [1], [0, 0, 0, 1, 1, 1], [0], [0]>} : vector<2x8x32xf32>, vector<2x8x32xf32>, vector<2x8x8xf32> -> vector<2x8x8xf32>
    "tpu.trace_stop"() : () -> ()
    %cst_9 = arith.constant dense<0xFF800000> : vector<2x8xf32>
    %15 = vector.multi_reduction <maximumf>, %14, %cst_9 [2] : vector<2x8x8xf32> to vector<2x8xf32>
    %16 = vector.shape_cast %15 : vector<2x8xf32> to vector<2x8x1xf32>
    %17 = vector.broadcast %16 : vector<2x8x1xf32> to vector<2x8x8xf32>
    %18 = arith.subf %14, %17 : vector<2x8x8xf32>
    %19 = math.exp %18 : vector<2x8x8xf32>
    %cst_10 = arith.constant dense<0.000000e+00> : vector<2x8xf32>
    %20 = vector.multi_reduction <add>, %19, %cst_10 [2] : vector<2x8x8xf32> to vector<2x8xf32>
    %21 = vector.shape_cast %20 : vector<2x8xf32> to vector<2x8x1xf32>
    %22 = tpu.reciprocal %21 : vector<2x8x1xf32> -> vector<2x8x1xf32>
    %23 = vector.broadcast %22 : vector<2x8x1xf32> to vector<2x8x8xf32>
    %24 = arith.mulf %19, %23 : vector<2x8x8xf32>
    "tpu.trace_start"() <{level = 10 : i32, message = "bqk,bkd->bqd"}> : () -> ()
    %cst_11 = arith.constant dense<0.000000e+00> : vector<2x8x32xf32>
    %25 = tpu.matmul %24, %13, %cst_11 {dimension_numbers = #tpu.dot_dimension_numbers<[2], [1], [1], [2], [0, 0, 0, 1, 1, 2], [0], [0]>} : vector<2x8x8xf32>, vector<2x8x32xf32>, vector<2x8x32xf32> -> vector<2x8x32xf32>
    "tpu.trace_stop"() : () -> ()
    %26 = vector.extract_strided_slice %10 {offsets = [0, 0, 32], sizes = [2, 8, 32], strides = [1, 1, 1]} : vector<2x8x768xf32> to vector<2x8x32xf32>
    %27 = vector.extract_strided_slice %10 {offsets = [0, 0, 288], sizes = [2, 8, 32], strides = [1, 1, 1]} : vector<2x8x768xf32> to vector<2x8x32xf32>
    %28 = vector.extract_strided_slice %10 {offsets = [0, 0, 544], sizes = [2, 8, 32], strides = [1, 1, 1]} : vector<2x8x768xf32> to vector<2x8x32xf32>
    "tpu.trace_start"() <{level = 10 : i32, message = "bqd,bkd->bqk"}> : () -> ()
    %cst_12 = arith.constant dense<0.000000e+00> : vector<2x8x8xf32>
    %29 = tpu.matmul %26, %27, %cst_12 {dimension_numbers = #tpu.dot_dimension_numbers<[2], [2], [1], [1], [0, 0, 0, 1, 1, 1], [0], [0]>} : vector<2x8x32xf32>, vector<2x8x32xf32>, vector<2x8x8xf32> -> vector<2x8x8xf32>
    "tpu.trace_stop"() : () -> ()
    %cst_13 = arith.constant dense<0xFF800000> : vector<2x8xf32>
    %30 = vector.multi_reduction <maximumf>, %29, %cst_13 [2] : vector<2x8x8xf32> to vector<2x8xf32>
    %31 = vector.shape_cast %30 : vector<2x8xf32> to vector<2x8x1xf32>
    %32 = vector.broadcast %31 : vector<2x8x1xf32> to vector<2x8x8xf32>
    %33 = arith.subf %29, %32 : vector<2x8x8xf32>
    %34 = math.exp %33 : vector<2x8x8xf32>
    %cst_14 = arith.constant dense<0.000000e+00> : vector<2x8xf32>
    %35 = vector.multi_reduction <add>, %34, %cst_14 [2] : vector<2x8x8xf32> to vector<2x8xf32>
    %36 = vector.shape_cast %35 : vector<2x8xf32> to vector<2x8x1xf32>
    %37 = tpu.reciprocal %36 : vector<2x8x1xf32> -> vector<2x8x1xf32>
    %38 = vector.broadcast %37 : vector<2x8x1xf32> to vector<2x8x8xf32>
    %39 = arith.mulf %34, %38 : vector<2x8x8xf32>
    "tpu.trace_start"() <{level = 10 : i32, message = "bqk,bkd->bqd"}> : () -> ()
    %cst_15 = arith.constant dense<0.000000e+00> : vector<2x8x32xf32>
    %40 = tpu.matmul %39, %28, %cst_15 {dimension_numbers = #tpu.dot_dimension_numbers<[2], [1], [1], [2], [0, 0, 0, 1, 1, 2], [0], [0]>} : vector<2x8x8xf32>, vector<2x8x32xf32>, vector<2x8x32xf32> -> vector<2x8x32xf32>
    "tpu.trace_stop"() : () -> ()
    %41 = vector.extract_strided_slice %10 {offsets = [0, 0, 64], sizes = [2, 8, 32], strides = [1, 1, 1]} : vector<2x8x768xf32> to vector<2x8x32xf32>
    %42 = vector.extract_strided_slice %10 {offsets = [0, 0, 320], sizes = [2, 8, 32], strides = [1, 1, 1]} : vector<2x8x768xf32> to vector<2x8x32xf32>
    %43 = vector.extract_strided_slice %10 {offsets = [0, 0, 576], sizes = [2, 8, 32], strides = [1, 1, 1]} : vector<2x8x768xf32> to vector<2x8x32xf32>
    "tpu.trace_start"() <{level = 10 : i32, message = "bqd,bkd->bqk"}> : () -> ()
    %cst_16 = arith.constant dense<0.000000e+00> : vector<2x8x8xf32>
    %44 = tpu.matmul %41, %42, %cst_16 {dimension_numbers = #tpu.dot_dimension_numbers<[2], [2], [1], [1], [0, 0, 0, 1, 1, 1], [0], [0]>} : vector<2x8x32xf32>, vector<2x8x32xf32>, vector<2x8x8xf32> -> vector<2x8x8xf32>
    "tpu.trace_stop"() : () -> ()
    %cst_17 = arith.constant dense<0xFF800000> : vector<2x8xf32>
    %45 = vector.multi_reduction <maximumf>, %44, %cst_17 [2] : vector<2x8x8xf32> to vector<2x8xf32>
    %46 = vector.shape_cast %45 : vector<2x8xf32> to vector<2x8x1xf32>
    %47 = vector.broadcast %46 : vector<2x8x1xf32> to vector<2x8x8xf32>
    %48 = arith.subf %44, %47 : vector<2x8x8xf32>
    %49 = math.exp %48 : vector<2x8x8xf32>
    %cst_18 = arith.constant dense<0.000000e+00> : vector<2x8xf32>
    %50 = vector.multi_reduction <add>, %49, %cst_18 [2] : vector<2x8x8xf32> to vector<2x8xf32>
    %51 = vector.shape_cast %50 : vector<2x8xf32> to vector<2x8x1xf32>
    %52 = tpu.reciprocal %51 : vector<2x8x1xf32> -> vector<2x8x1xf32>
    %53 = vector.broadcast %52 : vector<2x8x1xf32> to vector<2x8x8xf32>
    %54 = arith.mulf %49, %53 : vector<2x8x8xf32>
    "tpu.trace_start"() <{level = 10 : i32, message = "bqk,bkd->bqd"}> : () -> ()
    %cst_19 = arith.constant dense<0.000000e+00> : vector<2x8x32xf32>
    %55 = tpu.matmul %54, %43, %cst_19 {dimension_numbers = #tpu.dot_dimension_numbers<[2], [1], [1], [2], [0, 0, 0, 1, 1, 2], [0], [0]>} : vector<2x8x8xf32>, vector<2x8x32xf32>, vector<2x8x32xf32> -> vector<2x8x32xf32>
    "tpu.trace_stop"() : () -> ()
    %56 = vector.extract_strided_slice %10 {offsets = [0, 0, 96], sizes = [2, 8, 32], strides = [1, 1, 1]} : vector<2x8x768xf32> to vector<2x8x32xf32>
    %57 = vector.extract_strided_slice %10 {offsets = [0, 0, 352], sizes = [2, 8, 32], strides = [1, 1, 1]} : vector<2x8x768xf32> to vector<2x8x32xf32>
    %58 = vector.extract_strided_slice %10 {offsets = [0, 0, 608], sizes = [2, 8, 32], strides = [1, 1, 1]} : vector<2x8x768xf32> to vector<2x8x32xf32>
    "tpu.trace_start"() <{level = 10 : i32, message = "bqd,bkd->bqk"}> : () -> ()
    %cst_20 = arith.constant dense<0.000000e+00> : vector<2x8x8xf32>
    %59 = tpu.matmul %56, %57, %cst_20 {dimension_numbers = #tpu.dot_dimension_numbers<[2], [2], [1], [1], [0, 0, 0, 1, 1, 1], [0], [0]>} : vector<2x8x32xf32>, vector<2x8x32xf32>, vector<2x8x8xf32> -> vector<2x8x8xf32>
    "tpu.trace_stop"() : () -> ()
    %cst_21 = arith.constant dense<0xFF800000> : vector<2x8xf32>
    %60 = vector.multi_reduction <maximumf>, %59, %cst_21 [2] : vector<2x8x8xf32> to vector<2x8xf32>
    %61 = vector.shape_cast %60 : vector<2x8xf32> to vector<2x8x1xf32>
    %62 = vector.broadcast %61 : vector<2x8x1xf32> to vector<2x8x8xf32>
    %63 = arith.subf %59, %62 : vector<2x8x8xf32>
    %64 = math.exp %63 : vector<2x8x8xf32>
    %cst_22 = arith.constant dense<0.000000e+00> : vector<2x8xf32>
    %65 = vector.multi_reduction <add>, %64, %cst_22 [2] : vector<2x8x8xf32> to vector<2x8xf32>
    %66 = vector.shape_cast %65 : vector<2x8xf32> to vector<2x8x1xf32>
    %67 = tpu.reciprocal %66 : vector<2x8x1xf32> -> vector<2x8x1xf32>
    %68 = vector.broadcast %67 : vector<2x8x1xf32> to vector<2x8x8xf32>
    %69 = arith.mulf %64, %68 : vector<2x8x8xf32>
    "tpu.trace_start"() <{level = 10 : i32, message = "bqk,bkd->bqd"}> : () -> ()
    %cst_23 = arith.constant dense<0.000000e+00> : vector<2x8x32xf32>
    %70 = tpu.matmul %69, %58, %cst_23 {dimension_numbers = #tpu.dot_dimension_numbers<[2], [1], [1], [2], [0, 0, 0, 1, 1, 2], [0], [0]>} : vector<2x8x8xf32>, vector<2x8x32xf32>, vector<2x8x32xf32> -> vector<2x8x32xf32>
    "tpu.trace_stop"() : () -> ()
    %71 = vector.extract_strided_slice %10 {offsets = [0, 0, 128], sizes = [2, 8, 32], strides = [1, 1, 1]} : vector<2x8x768xf32> to vector<2x8x32xf32>
    %72 = vector.extract_strided_slice %10 {offsets = [0, 0, 384], sizes = [2, 8, 32], strides = [1, 1, 1]} : vector<2x8x768xf32> to vector<2x8x32xf32>
    %73 = vector.extract_strided_slice %10 {offsets = [0, 0, 640], sizes = [2, 8, 32], strides = [1, 1, 1]} : vector<2x8x768xf32> to vector<2x8x32xf32>
    "tpu.trace_start"() <{level = 10 : i32, message = "bqd,bkd->bqk"}> : () -> ()
    %cst_24 = arith.constant dense<0.000000e+00> : vector<2x8x8xf32>
    %74 = tpu.matmul %71, %72, %cst_24 {dimension_numbers = #tpu.dot_dimension_numbers<[2], [2], [1], [1], [0, 0, 0, 1, 1, 1], [0], [0]>} : vector<2x8x32xf32>, vector<2x8x32xf32>, vector<2x8x8xf32> -> vector<2x8x8xf32>
    "tpu.trace_stop"() : () -> ()
    %cst_25 = arith.constant dense<0xFF800000> : vector<2x8xf32>
    %75 = vector.multi_reduction <maximumf>, %74, %cst_25 [2] : vector<2x8x8xf32> to vector<2x8xf32>
    %76 = vector.shape_cast %75 : vector<2x8xf32> to vector<2x8x1xf32>
    %77 = vector.broadcast %76 : vector<2x8x1xf32> to vector<2x8x8xf32>
    %78 = arith.subf %74, %77 : vector<2x8x8xf32>
    %79 = math.exp %78 : vector<2x8x8xf32>
    %cst_26 = arith.constant dense<0.000000e+00> : vector<2x8xf32>
    %80 = vector.multi_reduction <add>, %79, %cst_26 [2] : vector<2x8x8xf32> to vector<2x8xf32>
    %81 = vector.shape_cast %80 : vector<2x8xf32> to vector<2x8x1xf32>
    %82 = tpu.reciprocal %81 : vector<2x8x1xf32> -> vector<2x8x1xf32>
    %83 = vector.broadcast %82 : vector<2x8x1xf32> to vector<2x8x8xf32>
    %84 = arith.mulf %79, %83 : vector<2x8x8xf32>
    "tpu.trace_start"() <{level = 10 : i32, message = "bqk,bkd->bqd"}> : () -> ()
    %cst_27 = arith.constant dense<0.000000e+00> : vector<2x8x32xf32>
    %85 = tpu.matmul %84, %73, %cst_27 {dimension_numbers = #tpu.dot_dimension_numbers<[2], [1], [1], [2], [0, 0, 0, 1, 1, 2], [0], [0]>} : vector<2x8x8xf32>, vector<2x8x32xf32>, vector<2x8x32xf32> -> vector<2x8x32xf32>
    "tpu.trace_stop"() : () -> ()
    %86 = vector.extract_strided_slice %10 {offsets = [0, 0, 160], sizes = [2, 8, 32], strides = [1, 1, 1]} : vector<2x8x768xf32> to vector<2x8x32xf32>
    %87 = vector.extract_strided_slice %10 {offsets = [0, 0, 416], sizes = [2, 8, 32], strides = [1, 1, 1]} : vector<2x8x768xf32> to vector<2x8x32xf32>
    %88 = vector.extract_strided_slice %10 {offsets = [0, 0, 672], sizes = [2, 8, 32], strides = [1, 1, 1]} : vector<2x8x768xf32> to vector<2x8x32xf32>
    "tpu.trace_start"() <{level = 10 : i32, message = "bqd,bkd->bqk"}> : () -> ()
    %cst_28 = arith.constant dense<0.000000e+00> : vector<2x8x8xf32>
    %89 = tpu.matmul %86, %87, %cst_28 {dimension_numbers = #tpu.dot_dimension_numbers<[2], [2], [1], [1], [0, 0, 0, 1, 1, 1], [0], [0]>} : vector<2x8x32xf32>, vector<2x8x32xf32>, vector<2x8x8xf32> -> vector<2x8x8xf32>
    "tpu.trace_stop"() : () -> ()
    %cst_29 = arith.constant dense<0xFF800000> : vector<2x8xf32>
    %90 = vector.multi_reduction <maximumf>, %89, %cst_29 [2] : vector<2x8x8xf32> to vector<2x8xf32>
    %91 = vector.shape_cast %90 : vector<2x8xf32> to vector<2x8x1xf32>
    %92 = vector.broadcast %91 : vector<2x8x1xf32> to vector<2x8x8xf32>
    %93 = arith.subf %89, %92 : vector<2x8x8xf32>
    %94 = math.exp %93 : vector<2x8x8xf32>
    %cst_30 = arith.constant dense<0.000000e+00> : vector<2x8xf32>
    %95 = vector.multi_reduction <add>, %94, %cst_30 [2] : vector<2x8x8xf32> to vector<2x8xf32>
    %96 = vector.shape_cast %95 : vector<2x8xf32> to vector<2x8x1xf32>
    %97 = tpu.reciprocal %96 : vector<2x8x1xf32> -> vector<2x8x1xf32>
    %98 = vector.broadcast %97 : vector<2x8x1xf32> to vector<2x8x8xf32>
    %99 = arith.mulf %94, %98 : vector<2x8x8xf32>
    "tpu.trace_start"() <{level = 10 : i32, message = "bqk,bkd->bqd"}> : () -> ()
    %cst_31 = arith.constant dense<0.000000e+00> : vector<2x8x32xf32>
    %100 = tpu.matmul %99, %88, %cst_31 {dimension_numbers = #tpu.dot_dimension_numbers<[2], [1], [1], [2], [0, 0, 0, 1, 1, 2], [0], [0]>} : vector<2x8x8xf32>, vector<2x8x32xf32>, vector<2x8x32xf32> -> vector<2x8x32xf32>
    "tpu.trace_stop"() : () -> ()
    %101 = vector.extract_strided_slice %10 {offsets = [0, 0, 192], sizes = [2, 8, 32], strides = [1, 1, 1]} : vector<2x8x768xf32> to vector<2x8x32xf32>
    %102 = vector.extract_strided_slice %10 {offsets = [0, 0, 448], sizes = [2, 8, 32], strides = [1, 1, 1]} : vector<2x8x768xf32> to vector<2x8x32xf32>
    %103 = vector.extract_strided_slice %10 {offsets = [0, 0, 704], sizes = [2, 8, 32], strides = [1, 1, 1]} : vector<2x8x768xf32> to vector<2x8x32xf32>
    "tpu.trace_start"() <{level = 10 : i32, message = "bqd,bkd->bqk"}> : () -> ()
    %cst_32 = arith.constant dense<0.000000e+00> : vector<2x8x8xf32>
    %104 = tpu.matmul %101, %102, %cst_32 {dimension_numbers = #tpu.dot_dimension_numbers<[2], [2], [1], [1], [0, 0, 0, 1, 1, 1], [0], [0]>} : vector<2x8x32xf32>, vector<2x8x32xf32>, vector<2x8x8xf32> -> vector<2x8x8xf32>
    "tpu.trace_stop"() : () -> ()
    %cst_33 = arith.constant dense<0xFF800000> : vector<2x8xf32>
    %105 = vector.multi_reduction <maximumf>, %104, %cst_33 [2] : vector<2x8x8xf32> to vector<2x8xf32>
    %106 = vector.shape_cast %105 : vector<2x8xf32> to vector<2x8x1xf32>
    %107 = vector.broadcast %106 : vector<2x8x1xf32> to vector<2x8x8xf32>
    %108 = arith.subf %104, %107 : vector<2x8x8xf32>
    %109 = math.exp %108 : vector<2x8x8xf32>
    %cst_34 = arith.constant dense<0.000000e+00> : vector<2x8xf32>
    %110 = vector.multi_reduction <add>, %109, %cst_34 [2] : vector<2x8x8xf32> to vector<2x8xf32>
    %111 = vector.shape_cast %110 : vector<2x8xf32> to vector<2x8x1xf32>
    %112 = tpu.reciprocal %111 : vector<2x8x1xf32> -> vector<2x8x1xf32>
    %113 = vector.broadcast %112 : vector<2x8x1xf32> to vector<2x8x8xf32>
    %114 = arith.mulf %109, %113 : vector<2x8x8xf32>
    "tpu.trace_start"() <{level = 10 : i32, message = "bqk,bkd->bqd"}> : () -> ()
    %cst_35 = arith.constant dense<0.000000e+00> : vector<2x8x32xf32>
    %115 = tpu.matmul %114, %103, %cst_35 {dimension_numbers = #tpu.dot_dimension_numbers<[2], [1], [1], [2], [0, 0, 0, 1, 1, 2], [0], [0]>} : vector<2x8x8xf32>, vector<2x8x32xf32>, vector<2x8x32xf32> -> vector<2x8x32xf32>
    "tpu.trace_stop"() : () -> ()
    %116 = vector.extract_strided_slice %10 {offsets = [0, 0, 224], sizes = [2, 8, 32], strides = [1, 1, 1]} : vector<2x8x768xf32> to vector<2x8x32xf32>
    %117 = vector.extract_strided_slice %10 {offsets = [0, 0, 480], sizes = [2, 8, 32], strides = [1, 1, 1]} : vector<2x8x768xf32> to vector<2x8x32xf32>
    %118 = vector.extract_strided_slice %10 {offsets = [0, 0, 736], sizes = [2, 8, 32], strides = [1, 1, 1]} : vector<2x8x768xf32> to vector<2x8x32xf32>
    "tpu.trace_start"() <{level = 10 : i32, message = "bqd,bkd->bqk"}> : () -> ()
    %cst_36 = arith.constant dense<0.000000e+00> : vector<2x8x8xf32>
    %119 = tpu.matmul %116, %117, %cst_36 {dimension_numbers = #tpu.dot_dimension_numbers<[2], [2], [1], [1], [0, 0, 0, 1, 1, 1], [0], [0]>} : vector<2x8x32xf32>, vector<2x8x32xf32>, vector<2x8x8xf32> -> vector<2x8x8xf32>
    "tpu.trace_stop"() : () -> ()
    %cst_37 = arith.constant dense<0xFF800000> : vector<2x8xf32>
    %120 = vector.multi_reduction <maximumf>, %119, %cst_37 [2] : vector<2x8x8xf32> to vector<2x8xf32>
    %121 = vector.shape_cast %120 : vector<2x8xf32> to vector<2x8x1xf32>
    %122 = vector.broadcast %121 : vector<2x8x1xf32> to vector<2x8x8xf32>
    %123 = arith.subf %119, %122 : vector<2x8x8xf32>
    %124 = math.exp %123 : vector<2x8x8xf32>
    %cst_38 = arith.constant dense<0.000000e+00> : vector<2x8xf32>
    %125 = vector.multi_reduction <add>, %124, %cst_38 [2] : vector<2x8x8xf32> to vector<2x8xf32>
    %126 = vector.shape_cast %125 : vector<2x8xf32> to vector<2x8x1xf32>
    %127 = tpu.reciprocal %126 : vector<2x8x1xf32> -> vector<2x8x1xf32>
    %128 = vector.broadcast %127 : vector<2x8x1xf32> to vector<2x8x8xf32>
    %129 = arith.mulf %124, %128 : vector<2x8x8xf32>
    "tpu.trace_start"() <{level = 10 : i32, message = "bqk,bkd->bqd"}> : () -> ()
    %cst_39 = arith.constant dense<0.000000e+00> : vector<2x8x32xf32>
    %130 = tpu.matmul %129, %118, %cst_39 {dimension_numbers = #tpu.dot_dimension_numbers<[2], [1], [1], [2], [0, 0, 0, 1, 1, 2], [0], [0]>} : vector<2x8x8xf32>, vector<2x8x32xf32>, vector<2x8x32xf32> -> vector<2x8x32xf32>
    "tpu.trace_stop"() : () -> ()
    %131 = tpu.concatenate %25, %40, %55, %70, %85, %100, %115, %130 in 2 : vector<2x8x32xf32>, vector<2x8x32xf32>, vector<2x8x32xf32>, vector<2x8x32xf32>, vector<2x8x32xf32>, vector<2x8x32xf32>, vector<2x8x32xf32>, vector<2x8x32xf32> -> vector<2x8x256xf32>
    %132 = vector.shape_cast %131 : vector<2x8x256xf32> to vector<16x256xf32>
    %c0_40 = arith.constant 0 : index
    %c0_41 = arith.constant 0 : index
    %c0_42 = arith.constant 0 : index
    %133 = vector.load %arg2[%c0_40, %c0_41, %c0_42] : memref<2x256x32xf32, #tpu.memory_space<vmem>>, vector<1x256x32xf32>
    %134 = vector.shape_cast %133 : vector<1x256x32xf32> to vector<256x32xf32>
    %cst_43 = arith.constant dense<0.000000e+00> : vector<16x32xf32>
    %135 = tpu.matmul %132, %134, %cst_43 {dimension_numbers = #tpu.dot_dimension_numbers<[1], [0], [0], [1], [0, 0, 1, 1], [], []>} : vector<16x256xf32>, vector<256x32xf32>, vector<16x32xf32> -> vector<16x32xf32>
    %136 = vector.extract_strided_slice %3 {offsets = [0, 0], sizes = [1, 32], strides = [1, 1]} : vector<8x768xf32> to vector<1x32xf32>
    %137 = vector.broadcast %136 : vector<1x32xf32> to vector<16x32xf32>
    %138 = arith.addf %135, %137 : vector<16x32xf32>
    %139 = arith.addf %1, %138 : vector<16x32xf32>
    %140 = vector.extract_strided_slice %3 {offsets = [1, 0], sizes = [1, 32], strides = [1, 1]} : vector<8x768xf32> to vector<1x32xf32>
    %141 = vector.extract_strided_slice %3 {offsets = [2, 0], sizes = [1, 32], strides = [1, 1]} : vector<8x768xf32> to vector<1x32xf32>
    %cst_44 = arith.constant dense<0.000000e+00> : vector<16xf32>
    %142 = vector.multi_reduction <add>, %139, %cst_44 [1] : vector<16x32xf32> to vector<16xf32>
    %143 = vector.shape_cast %142 : vector<16xf32> to vector<16x1xf32>
    %cst_45 = arith.constant 3.200000e+01 : f32
    %144 = vector.broadcast %cst_45 : f32 to vector<16x1xf32>
    %145 = arith.divf %143, %144 : vector<16x1xf32>
    %146 = vector.broadcast %145 : vector<16x1xf32> to vector<16x32xf32>
    %147 = arith.subf %139, %146 : vector<16x32xf32>
    %148 = arith.mulf %147, %147 : vector<16x32xf32>
    %cst_46 = arith.constant dense<0.000000e+00> : vector<16xf32>
    %149 = vector.multi_reduction <add>, %148, %cst_46 [1] : vector<16x32xf32> to vector<16xf32>
    %150 = vector.shape_cast %149 : vector<16xf32> to vector<16x1xf32>
    %cst_47 = arith.constant 3.200000e+01 : f32
    %151 = vector.broadcast %cst_47 : f32 to vector<16x1xf32>
    %152 = arith.divf %150, %151 : vector<16x1xf32>
    %153 = vector.broadcast %145 : vector<16x1xf32> to vector<16x32xf32>
    %154 = arith.subf %139, %153 : vector<16x32xf32>
    %cst_48 = arith.constant 9.99999974E-6 : f32
    %155 = vector.broadcast %cst_48 : f32 to vector<16x1xf32>
    %156 = arith.addf %152, %155 : vector<16x1xf32>
    %157 = math.rsqrt %156 : vector<16x1xf32>
    %158 = vector.broadcast %157 : vector<16x1xf32> to vector<16x32xf32>
    %159 = arith.mulf %154, %158 : vector<16x32xf32>
    %160 = vector.broadcast %140 : vector<1x32xf32> to vector<16x32xf32>
    %161 = arith.mulf %159, %160 : vector<16x32xf32>
    %162 = vector.broadcast %141 : vector<1x32xf32> to vector<16x32xf32>
    %163 = arith.addf %161, %162 : vector<16x32xf32>
    %c0_49 = arith.constant 0 : index
    %c0_50 = arith.constant 0 : index
    %c0_51 = arith.constant 0 : index
    %164 = vector.load %arg3[%c0_49, %c0_50, %c0_51] : memref<2x32x64xf32, #tpu.memory_space<vmem>>, vector<1x32x64xf32>
    %165 = vector.shape_cast %164 : vector<1x32x64xf32> to vector<32x64xf32>
    %cst_52 = arith.constant dense<0.000000e+00> : vector<16x64xf32>
    %166 = tpu.matmul %163, %165, %cst_52 {dimension_numbers = #tpu.dot_dimension_numbers<[1], [0], [0], [1], [0, 0, 1, 1], [], []>} : vector<16x32xf32>, vector<32x64xf32>, vector<16x64xf32> -> vector<16x64xf32>
    %167 = vector.extract_strided_slice %3 {offsets = [3, 0], sizes = [1, 64], strides = [1, 1]} : vector<8x768xf32> to vector<1x64xf32>
    %168 = vector.broadcast %167 : vector<1x64xf32> to vector<16x64xf32>
    %169 = arith.addf %166, %168 : vector<16x64xf32>
    %cst_53 = arith.constant 0.000000e+00 : f32
    %170 = vector.broadcast %cst_53 : f32 to vector<16x64xf32>
    %171 = arith.maximumf %169, %170 : vector<16x64xf32>
    %c0_54 = arith.constant 0 : index
    %c0_55 = arith.constant 0 : index
    %c0_56 = arith.constant 0 : index
    %172 = vector.load %arg4[%c0_54, %c0_55, %c0_56] : memref<2x64x32xf32, #tpu.memory_space<vmem>>, vector<1x64x32xf32>
    %173 = vector.shape_cast %172 : vector<1x64x32xf32> to vector<64x32xf32>
    %cst_57 = arith.constant dense<0.000000e+00> : vector<16x32xf32>
    %174 = tpu.matmul %171, %173, %cst_57 {dimension_numbers = #tpu.dot_dimension_numbers<[1], [0], [0], [1], [0, 0, 1, 1], [], []>} : vector<16x64xf32>, vector<64x32xf32>, vector<16x32xf32> -> vector<16x32xf32>
    %175 = vector.extract_strided_slice %3 {offsets = [4, 0], sizes = [1, 32], strides = [1, 1]} : vector<8x768xf32> to vector<1x32xf32>
    %176 = vector.broadcast %175 : vector<1x32xf32> to vector<16x32xf32>
    %177 = arith.addf %174, %176 : vector<16x32xf32>
    %178 = arith.addf %163, %177 : vector<16x32xf32>
    %179 = vector.extract_strided_slice %3 {offsets = [5, 0], sizes = [1, 32], strides = [1, 1]} : vector<8x768xf32> to vector<1x32xf32>
    %180 = vector.extract_strided_slice %3 {offsets = [6, 0], sizes = [1, 32], strides = [1, 1]} : vector<8x768xf32> to vector<1x32xf32>
    %cst_58 = arith.constant dense<0.000000e+00> : vector<16xf32>
    %181 = vector.multi_reduction <add>, %178, %cst_58 [1] : vector<16x32xf32> to vector<16xf32>
    %182 = vector.shape_cast %181 : vector<16xf32> to vector<16x1xf32>
    %cst_59 = arith.constant 3.200000e+01 : f32
    %183 = vector.broadcast %cst_59 : f32 to vector<16x1xf32>
    %184 = arith.divf %182, %183 : vector<16x1xf32>
    %185 = vector.broadcast %184 : vector<16x1xf32> to vector<16x32xf32>
    %186 = arith.subf %178, %185 : vector<16x32xf32>
    %187 = arith.mulf %186, %186 : vector<16x32xf32>
    %cst_60 = arith.constant dense<0.000000e+00> : vector<16xf32>
    %188 = vector.multi_reduction <add>, %187, %cst_60 [1] : vector<16x32xf32> to vector<16xf32>
    %189 = vector.shape_cast %188 : vector<16xf32> to vector<16x1xf32>
    %cst_61 = arith.constant 3.200000e+01 : f32
    %190 = vector.broadcast %cst_61 : f32 to vector<16x1xf32>
    %191 = arith.divf %189, %190 : vector<16x1xf32>
    %192 = vector.broadcast %184 : vector<16x1xf32> to vector<16x32xf32>
    %193 = arith.subf %178, %192 : vector<16x32xf32>
    %cst_62 = arith.constant 9.99999974E-6 : f32
    %194 = vector.broadcast %cst_62 : f32 to vector<16x1xf32>
    %195 = arith.addf %191, %194 : vector<16x1xf32>
    %196 = math.rsqrt %195 : vector<16x1xf32>
    %197 = vector.broadcast %196 : vector<16x1xf32> to vector<16x32xf32>
    %198 = arith.mulf %193, %197 : vector<16x32xf32>
    %199 = vector.broadcast %179 : vector<1x32xf32> to vector<16x32xf32>
    %200 = arith.mulf %198, %199 : vector<16x32xf32>
    %201 = vector.broadcast %180 : vector<1x32xf32> to vector<16x32xf32>
    %202 = arith.addf %200, %201 : vector<16x32xf32>
    %c1 = arith.constant 1 : index
    %c0_63 = arith.constant 0 : index
    %c0_64 = arith.constant 0 : index
    %203 = vector.load %arg5[%c1, %c0_63, %c0_64] : memref<2x8x768xf32, #tpu.memory_space<vmem>>, vector<1x8x768xf32>
    %204 = vector.shape_cast %203 : vector<1x8x768xf32> to vector<8x768xf32>
    %c1_65 = arith.constant 1 : index
    %c0_66 = arith.constant 0 : index
    %c0_67 = arith.constant 0 : index
    %205 = vector.load %arg1[%c1_65, %c0_66, %c0_67] : memref<2x32x768xf32, #tpu.memory_space<vmem>>, vector<1x32x768xf32>
    %206 = vector.shape_cast %205 : vector<1x32x768xf32> to vector<32x768xf32>
    %cst_68 = arith.constant dense<0.000000e+00> : vector<16x768xf32>
    %207 = tpu.matmul %202, %206, %cst_68 {dimension_numbers = #tpu.dot_dimension_numbers<[1], [0], [0], [1], [0, 0, 1, 1], [], []>} : vector<16x32xf32>, vector<32x768xf32>, vector<16x768xf32> -> vector<16x768xf32>
    %208 = vector.extract_strided_slice %204 {offsets = [7, 0], sizes = [1, 768], strides = [1, 1]} : vector<8x768xf32> to vector<1x768xf32>
    %209 = vector.broadcast %208 : vector<1x768xf32> to vector<16x768xf32>
    %210 = arith.addf %207, %209 : vector<16x768xf32>
    %211 = vector.shape_cast %210 : vector<16x768xf32> to vector<2x8x768xf32>
    %212 = vector.extract_strided_slice %211 {offsets = [0, 0, 0], sizes = [2, 8, 32], strides = [1, 1, 1]} : vector<2x8x768xf32> to vector<2x8x32xf32>
    %213 = vector.extract_strided_slice %211 {offsets = [0, 0, 256], sizes = [2, 8, 32], strides = [1, 1, 1]} : vector<2x8x768xf32> to vector<2x8x32xf32>
    %214 = vector.extract_strided_slice %211 {offsets = [0, 0, 512], sizes = [2, 8, 32], strides = [1, 1, 1]} : vector<2x8x768xf32> to vector<2x8x32xf32>
    "tpu.trace_start"() <{level = 10 : i32, message = "bqd,bkd->bqk"}> : () -> ()
    %cst_69 = arith.constant dense<0.000000e+00> : vector<2x8x8xf32>
    %215 = tpu.matmul %212, %213, %cst_69 {dimension_numbers = #tpu.dot_dimension_numbers<[2], [2], [1], [1], [0, 0, 0, 1, 1, 1], [0], [0]>} : vector<2x8x32xf32>, vector<2x8x32xf32>, vector<2x8x8xf32> -> vector<2x8x8xf32>
    "tpu.trace_stop"() : () -> ()
    %cst_70 = arith.constant dense<0xFF800000> : vector<2x8xf32>
    %216 = vector.multi_reduction <maximumf>, %215, %cst_70 [2] : vector<2x8x8xf32> to vector<2x8xf32>
    %217 = vector.shape_cast %216 : vector<2x8xf32> to vector<2x8x1xf32>
    %218 = vector.broadcast %217 : vector<2x8x1xf32> to vector<2x8x8xf32>
    %219 = arith.subf %215, %218 : vector<2x8x8xf32>
    %220 = math.exp %219 : vector<2x8x8xf32>
    %cst_71 = arith.constant dense<0.000000e+00> : vector<2x8xf32>
    %221 = vector.multi_reduction <add>, %220, %cst_71 [2] : vector<2x8x8xf32> to vector<2x8xf32>
    %222 = vector.shape_cast %221 : vector<2x8xf32> to vector<2x8x1xf32>
    %223 = tpu.reciprocal %222 : vector<2x8x1xf32> -> vector<2x8x1xf32>
    %224 = vector.broadcast %223 : vector<2x8x1xf32> to vector<2x8x8xf32>
    %225 = arith.mulf %220, %224 : vector<2x8x8xf32>
    "tpu.trace_start"() <{level = 10 : i32, message = "bqk,bkd->bqd"}> : () -> ()
    %cst_72 = arith.constant dense<0.000000e+00> : vector<2x8x32xf32>
    %226 = tpu.matmul %225, %214, %cst_72 {dimension_numbers = #tpu.dot_dimension_numbers<[2], [1], [1], [2], [0, 0, 0, 1, 1, 2], [0], [0]>} : vector<2x8x8xf32>, vector<2x8x32xf32>, vector<2x8x32xf32> -> vector<2x8x32xf32>
    "tpu.trace_stop"() : () -> ()
    %227 = vector.extract_strided_slice %211 {offsets = [0, 0, 32], sizes = [2, 8, 32], strides = [1, 1, 1]} : vector<2x8x768xf32> to vector<2x8x32xf32>
    %228 = vector.extract_strided_slice %211 {offsets = [0, 0, 288], sizes = [2, 8, 32], strides = [1, 1, 1]} : vector<2x8x768xf32> to vector<2x8x32xf32>
    %229 = vector.extract_strided_slice %211 {offsets = [0, 0, 544], sizes = [2, 8, 32], strides = [1, 1, 1]} : vector<2x8x768xf32> to vector<2x8x32xf32>
    "tpu.trace_start"() <{level = 10 : i32, message = "bqd,bkd->bqk"}> : () -> ()
    %cst_73 = arith.constant dense<0.000000e+00> : vector<2x8x8xf32>
    %230 = tpu.matmul %227, %228, %cst_73 {dimension_numbers = #tpu.dot_dimension_numbers<[2], [2], [1], [1], [0, 0, 0, 1, 1, 1], [0], [0]>} : vector<2x8x32xf32>, vector<2x8x32xf32>, vector<2x8x8xf32> -> vector<2x8x8xf32>
    "tpu.trace_stop"() : () -> ()
    %cst_74 = arith.constant dense<0xFF800000> : vector<2x8xf32>
    %231 = vector.multi_reduction <maximumf>, %230, %cst_74 [2] : vector<2x8x8xf32> to vector<2x8xf32>
    %232 = vector.shape_cast %231 : vector<2x8xf32> to vector<2x8x1xf32>
    %233 = vector.broadcast %232 : vector<2x8x1xf32> to vector<2x8x8xf32>
    %234 = arith.subf %230, %233 : vector<2x8x8xf32>
    %235 = math.exp %234 : vector<2x8x8xf32>
    %cst_75 = arith.constant dense<0.000000e+00> : vector<2x8xf32>
    %236 = vector.multi_reduction <add>, %235, %cst_75 [2] : vector<2x8x8xf32> to vector<2x8xf32>
    %237 = vector.shape_cast %236 : vector<2x8xf32> to vector<2x8x1xf32>
    %238 = tpu.reciprocal %237 : vector<2x8x1xf32> -> vector<2x8x1xf32>
    %239 = vector.broadcast %238 : vector<2x8x1xf32> to vector<2x8x8xf32>
    %240 = arith.mulf %235, %239 : vector<2x8x8xf32>
    "tpu.trace_start"() <{level = 10 : i32, message = "bqk,bkd->bqd"}> : () -> ()
    %cst_76 = arith.constant dense<0.000000e+00> : vector<2x8x32xf32>
    %241 = tpu.matmul %240, %229, %cst_76 {dimension_numbers = #tpu.dot_dimension_numbers<[2], [1], [1], [2], [0, 0, 0, 1, 1, 2], [0], [0]>} : vector<2x8x8xf32>, vector<2x8x32xf32>, vector<2x8x32xf32> -> vector<2x8x32xf32>
    "tpu.trace_stop"() : () -> ()
    %242 = vector.extract_strided_slice %211 {offsets = [0, 0, 64], sizes = [2, 8, 32], strides = [1, 1, 1]} : vector<2x8x768xf32> to vector<2x8x32xf32>
    %243 = vector.extract_strided_slice %211 {offsets = [0, 0, 320], sizes = [2, 8, 32], strides = [1, 1, 1]} : vector<2x8x768xf32> to vector<2x8x32xf32>
    %244 = vector.extract_strided_slice %211 {offsets = [0, 0, 576], sizes = [2, 8, 32], strides = [1, 1, 1]} : vector<2x8x768xf32> to vector<2x8x32xf32>
    "tpu.trace_start"() <{level = 10 : i32, message = "bqd,bkd->bqk"}> : () -> ()
    %cst_77 = arith.constant dense<0.000000e+00> : vector<2x8x8xf32>
    %245 = tpu.matmul %242, %243, %cst_77 {dimension_numbers = #tpu.dot_dimension_numbers<[2], [2], [1], [1], [0, 0, 0, 1, 1, 1], [0], [0]>} : vector<2x8x32xf32>, vector<2x8x32xf32>, vector<2x8x8xf32> -> vector<2x8x8xf32>
    "tpu.trace_stop"() : () -> ()
    %cst_78 = arith.constant dense<0xFF800000> : vector<2x8xf32>
    %246 = vector.multi_reduction <maximumf>, %245, %cst_78 [2] : vector<2x8x8xf32> to vector<2x8xf32>
    %247 = vector.shape_cast %246 : vector<2x8xf32> to vector<2x8x1xf32>
    %248 = vector.broadcast %247 : vector<2x8x1xf32> to vector<2x8x8xf32>
    %249 = arith.subf %245, %248 : vector<2x8x8xf32>
    %250 = math.exp %249 : vector<2x8x8xf32>
    %cst_79 = arith.constant dense<0.000000e+00> : vector<2x8xf32>
    %251 = vector.multi_reduction <add>, %250, %cst_79 [2] : vector<2x8x8xf32> to vector<2x8xf32>
    %252 = vector.shape_cast %251 : vector<2x8xf32> to vector<2x8x1xf32>
    %253 = tpu.reciprocal %252 : vector<2x8x1xf32> -> vector<2x8x1xf32>
    %254 = vector.broadcast %253 : vector<2x8x1xf32> to vector<2x8x8xf32>
    %255 = arith.mulf %250, %254 : vector<2x8x8xf32>
    "tpu.trace_start"() <{level = 10 : i32, message = "bqk,bkd->bqd"}> : () -> ()
    %cst_80 = arith.constant dense<0.000000e+00> : vector<2x8x32xf32>
    %256 = tpu.matmul %255, %244, %cst_80 {dimension_numbers = #tpu.dot_dimension_numbers<[2], [1], [1], [2], [0, 0, 0, 1, 1, 2], [0], [0]>} : vector<2x8x8xf32>, vector<2x8x32xf32>, vector<2x8x32xf32> -> vector<2x8x32xf32>
    "tpu.trace_stop"() : () -> ()
    %257 = vector.extract_strided_slice %211 {offsets = [0, 0, 96], sizes = [2, 8, 32], strides = [1, 1, 1]} : vector<2x8x768xf32> to vector<2x8x32xf32>
    %258 = vector.extract_strided_slice %211 {offsets = [0, 0, 352], sizes = [2, 8, 32], strides = [1, 1, 1]} : vector<2x8x768xf32> to vector<2x8x32xf32>
    %259 = vector.extract_strided_slice %211 {offsets = [0, 0, 608], sizes = [2, 8, 32], strides = [1, 1, 1]} : vector<2x8x768xf32> to vector<2x8x32xf32>
    "tpu.trace_start"() <{level = 10 : i32, message = "bqd,bkd->bqk"}> : () -> ()
    %cst_81 = arith.constant dense<0.000000e+00> : vector<2x8x8xf32>
    %260 = tpu.matmul %257, %258, %cst_81 {dimension_numbers = #tpu.dot_dimension_numbers<[2], [2], [1], [1], [0, 0, 0, 1, 1, 1], [0], [0]>} : vector<2x8x32xf32>, vector<2x8x32xf32>, vector<2x8x8xf32> -> vector<2x8x8xf32>
    "tpu.trace_stop"() : () -> ()
    %cst_82 = arith.constant dense<0xFF800000> : vector<2x8xf32>
    %261 = vector.multi_reduction <maximumf>, %260, %cst_82 [2] : vector<2x8x8xf32> to vector<2x8xf32>
    %262 = vector.shape_cast %261 : vector<2x8xf32> to vector<2x8x1xf32>
    %263 = vector.broadcast %262 : vector<2x8x1xf32> to vector<2x8x8xf32>
    %264 = arith.subf %260, %263 : vector<2x8x8xf32>
    %265 = math.exp %264 : vector<2x8x8xf32>
    %cst_83 = arith.constant dense<0.000000e+00> : vector<2x8xf32>
    %266 = vector.multi_reduction <add>, %265, %cst_83 [2] : vector<2x8x8xf32> to vector<2x8xf32>
    %267 = vector.shape_cast %266 : vector<2x8xf32> to vector<2x8x1xf32>
    %268 = tpu.reciprocal %267 : vector<2x8x1xf32> -> vector<2x8x1xf32>
    %269 = vector.broadcast %268 : vector<2x8x1xf32> to vector<2x8x8xf32>
    %270 = arith.mulf %265, %269 : vector<2x8x8xf32>
    "tpu.trace_start"() <{level = 10 : i32, message = "bqk,bkd->bqd"}> : () -> ()
    %cst_84 = arith.constant dense<0.000000e+00> : vector<2x8x32xf32>
    %271 = tpu.matmul %270, %259, %cst_84 {dimension_numbers = #tpu.dot_dimension_numbers<[2], [1], [1], [2], [0, 0, 0, 1, 1, 2], [0], [0]>} : vector<2x8x8xf32>, vector<2x8x32xf32>, vector<2x8x32xf32> -> vector<2x8x32xf32>
    "tpu.trace_stop"() : () -> ()
    %272 = vector.extract_strided_slice %211 {offsets = [0, 0, 128], sizes = [2, 8, 32], strides = [1, 1, 1]} : vector<2x8x768xf32> to vector<2x8x32xf32>
    %273 = vector.extract_strided_slice %211 {offsets = [0, 0, 384], sizes = [2, 8, 32], strides = [1, 1, 1]} : vector<2x8x768xf32> to vector<2x8x32xf32>
    %274 = vector.extract_strided_slice %211 {offsets = [0, 0, 640], sizes = [2, 8, 32], strides = [1, 1, 1]} : vector<2x8x768xf32> to vector<2x8x32xf32>
    "tpu.trace_start"() <{level = 10 : i32, message = "bqd,bkd->bqk"}> : () -> ()
    %cst_85 = arith.constant dense<0.000000e+00> : vector<2x8x8xf32>
    %275 = tpu.matmul %272, %273, %cst_85 {dimension_numbers = #tpu.dot_dimension_numbers<[2], [2], [1], [1], [0, 0, 0, 1, 1, 1], [0], [0]>} : vector<2x8x32xf32>, vector<2x8x32xf32>, vector<2x8x8xf32> -> vector<2x8x8xf32>
    "tpu.trace_stop"() : () -> ()
    %cst_86 = arith.constant dense<0xFF800000> : vector<2x8xf32>
    %276 = vector.multi_reduction <maximumf>, %275, %cst_86 [2] : vector<2x8x8xf32> to vector<2x8xf32>
    %277 = vector.shape_cast %276 : vector<2x8xf32> to vector<2x8x1xf32>
    %278 = vector.broadcast %277 : vector<2x8x1xf32> to vector<2x8x8xf32>
    %279 = arith.subf %275, %278 : vector<2x8x8xf32>
    %280 = math.exp %279 : vector<2x8x8xf32>
    %cst_87 = arith.constant dense<0.000000e+00> : vector<2x8xf32>
    %281 = vector.multi_reduction <add>, %280, %cst_87 [2] : vector<2x8x8xf32> to vector<2x8xf32>
    %282 = vector.shape_cast %281 : vector<2x8xf32> to vector<2x8x1xf32>
    %283 = tpu.reciprocal %282 : vector<2x8x1xf32> -> vector<2x8x1xf32>
    %284 = vector.broadcast %283 : vector<2x8x1xf32> to vector<2x8x8xf32>
    %285 = arith.mulf %280, %284 : vector<2x8x8xf32>
    "tpu.trace_start"() <{level = 10 : i32, message = "bqk,bkd->bqd"}> : () -> ()
    %cst_88 = arith.constant dense<0.000000e+00> : vector<2x8x32xf32>
    %286 = tpu.matmul %285, %274, %cst_88 {dimension_numbers = #tpu.dot_dimension_numbers<[2], [1], [1], [2], [0, 0, 0, 1, 1, 2], [0], [0]>} : vector<2x8x8xf32>, vector<2x8x32xf32>, vector<2x8x32xf32> -> vector<2x8x32xf32>
    "tpu.trace_stop"() : () -> ()
    %287 = vector.extract_strided_slice %211 {offsets = [0, 0, 160], sizes = [2, 8, 32], strides = [1, 1, 1]} : vector<2x8x768xf32> to vector<2x8x32xf32>
    %288 = vector.extract_strided_slice %211 {offsets = [0, 0, 416], sizes = [2, 8, 32], strides = [1, 1, 1]} : vector<2x8x768xf32> to vector<2x8x32xf32>
    %289 = vector.extract_strided_slice %211 {offsets = [0, 0, 672], sizes = [2, 8, 32], strides = [1, 1, 1]} : vector<2x8x768xf32> to vector<2x8x32xf32>
    "tpu.trace_start"() <{level = 10 : i32, message = "bqd,bkd->bqk"}> : () -> ()
    %cst_89 = arith.constant dense<0.000000e+00> : vector<2x8x8xf32>
    %290 = tpu.matmul %287, %288, %cst_89 {dimension_numbers = #tpu.dot_dimension_numbers<[2], [2], [1], [1], [0, 0, 0, 1, 1, 1], [0], [0]>} : vector<2x8x32xf32>, vector<2x8x32xf32>, vector<2x8x8xf32> -> vector<2x8x8xf32>
    "tpu.trace_stop"() : () -> ()
    %cst_90 = arith.constant dense<0xFF800000> : vector<2x8xf32>
    %291 = vector.multi_reduction <maximumf>, %290, %cst_90 [2] : vector<2x8x8xf32> to vector<2x8xf32>
    %292 = vector.shape_cast %291 : vector<2x8xf32> to vector<2x8x1xf32>
    %293 = vector.broadcast %292 : vector<2x8x1xf32> to vector<2x8x8xf32>
    %294 = arith.subf %290, %293 : vector<2x8x8xf32>
    %295 = math.exp %294 : vector<2x8x8xf32>
    %cst_91 = arith.constant dense<0.000000e+00> : vector<2x8xf32>
    %296 = vector.multi_reduction <add>, %295, %cst_91 [2] : vector<2x8x8xf32> to vector<2x8xf32>
    %297 = vector.shape_cast %296 : vector<2x8xf32> to vector<2x8x1xf32>
    %298 = tpu.reciprocal %297 : vector<2x8x1xf32> -> vector<2x8x1xf32>
    %299 = vector.broadcast %298 : vector<2x8x1xf32> to vector<2x8x8xf32>
    %300 = arith.mulf %295, %299 : vector<2x8x8xf32>
    "tpu.trace_start"() <{level = 10 : i32, message = "bqk,bkd->bqd"}> : () -> ()
    %cst_92 = arith.constant dense<0.000000e+00> : vector<2x8x32xf32>
    %301 = tpu.matmul %300, %289, %cst_92 {dimension_numbers = #tpu.dot_dimension_numbers<[2], [1], [1], [2], [0, 0, 0, 1, 1, 2], [0], [0]>} : vector<2x8x8xf32>, vector<2x8x32xf32>, vector<2x8x32xf32> -> vector<2x8x32xf32>
    "tpu.trace_stop"() : () -> ()
    %302 = vector.extract_strided_slice %211 {offsets = [0, 0, 192], sizes = [2, 8, 32], strides = [1, 1, 1]} : vector<2x8x768xf32> to vector<2x8x32xf32>
    %303 = vector.extract_strided_slice %211 {offsets = [0, 0, 448], sizes = [2, 8, 32], strides = [1, 1, 1]} : vector<2x8x768xf32> to vector<2x8x32xf32>
    %304 = vector.extract_strided_slice %211 {offsets = [0, 0, 704], sizes = [2, 8, 32], strides = [1, 1, 1]} : vector<2x8x768xf32> to vector<2x8x32xf32>
    "tpu.trace_start"() <{level = 10 : i32, message = "bqd,bkd->bqk"}> : () -> ()
    %cst_93 = arith.constant dense<0.000000e+00> : vector<2x8x8xf32>
    %305 = tpu.matmul %302, %303, %cst_93 {dimension_numbers = #tpu.dot_dimension_numbers<[2], [2], [1], [1], [0, 0, 0, 1, 1, 1], [0], [0]>} : vector<2x8x32xf32>, vector<2x8x32xf32>, vector<2x8x8xf32> -> vector<2x8x8xf32>
    "tpu.trace_stop"() : () -> ()
    %cst_94 = arith.constant dense<0xFF800000> : vector<2x8xf32>
    %306 = vector.multi_reduction <maximumf>, %305, %cst_94 [2] : vector<2x8x8xf32> to vector<2x8xf32>
    %307 = vector.shape_cast %306 : vector<2x8xf32> to vector<2x8x1xf32>
    %308 = vector.broadcast %307 : vector<2x8x1xf32> to vector<2x8x8xf32>
    %309 = arith.subf %305, %308 : vector<2x8x8xf32>
    %310 = math.exp %309 : vector<2x8x8xf32>
    %cst_95 = arith.constant dense<0.000000e+00> : vector<2x8xf32>
    %311 = vector.multi_reduction <add>, %310, %cst_95 [2] : vector<2x8x8xf32> to vector<2x8xf32>
    %312 = vector.shape_cast %311 : vector<2x8xf32> to vector<2x8x1xf32>
    %313 = tpu.reciprocal %312 : vector<2x8x1xf32> -> vector<2x8x1xf32>
    %314 = vector.broadcast %313 : vector<2x8x1xf32> to vector<2x8x8xf32>
    %315 = arith.mulf %310, %314 : vector<2x8x8xf32>
    "tpu.trace_start"() <{level = 10 : i32, message = "bqk,bkd->bqd"}> : () -> ()
    %cst_96 = arith.constant dense<0.000000e+00> : vector<2x8x32xf32>
    %316 = tpu.matmul %315, %304, %cst_96 {dimension_numbers = #tpu.dot_dimension_numbers<[2], [1], [1], [2], [0, 0, 0, 1, 1, 2], [0], [0]>} : vector<2x8x8xf32>, vector<2x8x32xf32>, vector<2x8x32xf32> -> vector<2x8x32xf32>
    "tpu.trace_stop"() : () -> ()
    %317 = vector.extract_strided_slice %211 {offsets = [0, 0, 224], sizes = [2, 8, 32], strides = [1, 1, 1]} : vector<2x8x768xf32> to vector<2x8x32xf32>
    %318 = vector.extract_strided_slice %211 {offsets = [0, 0, 480], sizes = [2, 8, 32], strides = [1, 1, 1]} : vector<2x8x768xf32> to vector<2x8x32xf32>
    %319 = vector.extract_strided_slice %211 {offsets = [0, 0, 736], sizes = [2, 8, 32], strides = [1, 1, 1]} : vector<2x8x768xf32> to vector<2x8x32xf32>
    "tpu.trace_start"() <{level = 10 : i32, message = "bqd,bkd->bqk"}> : () -> ()
    %cst_97 = arith.constant dense<0.000000e+00> : vector<2x8x8xf32>
    %320 = tpu.matmul %317, %318, %cst_97 {dimension_numbers = #tpu.dot_dimension_numbers<[2], [2], [1], [1], [0, 0, 0, 1, 1, 1], [0], [0]>} : vector<2x8x32xf32>, vector<2x8x32xf32>, vector<2x8x8xf32> -> vector<2x8x8xf32>
    "tpu.trace_stop"() : () -> ()
    %cst_98 = arith.constant dense<0xFF800000> : vector<2x8xf32>
    %321 = vector.multi_reduction <maximumf>, %320, %cst_98 [2] : vector<2x8x8xf32> to vector<2x8xf32>
    %322 = vector.shape_cast %321 : vector<2x8xf32> to vector<2x8x1xf32>
    %323 = vector.broadcast %322 : vector<2x8x1xf32> to vector<2x8x8xf32>
    %324 = arith.subf %320, %323 : vector<2x8x8xf32>
    %325 = math.exp %324 : vector<2x8x8xf32>
    %cst_99 = arith.constant dense<0.000000e+00> : vector<2x8xf32>
    %326 = vector.multi_reduction <add>, %325, %cst_99 [2] : vector<2x8x8xf32> to vector<2x8xf32>
    %327 = vector.shape_cast %326 : vector<2x8xf32> to vector<2x8x1xf32>
    %328 = tpu.reciprocal %327 : vector<2x8x1xf32> -> vector<2x8x1xf32>
    %329 = vector.broadcast %328 : vector<2x8x1xf32> to vector<2x8x8xf32>
    %330 = arith.mulf %325, %329 : vector<2x8x8xf32>
    "tpu.trace_start"() <{level = 10 : i32, message = "bqk,bkd->bqd"}> : () -> ()
    %cst_100 = arith.constant dense<0.000000e+00> : vector<2x8x32xf32>
    %331 = tpu.matmul %330, %319, %cst_100 {dimension_numbers = #tpu.dot_dimension_numbers<[2], [1], [1], [2], [0, 0, 0, 1, 1, 2], [0], [0]>} : vector<2x8x8xf32>, vector<2x8x32xf32>, vector<2x8x32xf32> -> vector<2x8x32xf32>
    "tpu.trace_stop"() : () -> ()
    %332 = tpu.concatenate %226, %241, %256, %271, %286, %301, %316, %331 in 2 : vector<2x8x32xf32>, vector<2x8x32xf32>, vector<2x8x32xf32>, vector<2x8x32xf32>, vector<2x8x32xf32>, vector<2x8x32xf32>, vector<2x8x32xf32>, vector<2x8x32xf32> -> vector<2x8x256xf32>
    %333 = vector.shape_cast %332 : vector<2x8x256xf32> to vector<16x256xf32>
    %c1_101 = arith.constant 1 : index
    %c0_102 = arith.constant 0 : index
    %c0_103 = arith.constant 0 : index
    %334 = vector.load %arg2[%c1_101, %c0_102, %c0_103] : memref<2x256x32xf32, #tpu.memory_space<vmem>>, vector<1x256x32xf32>
    %335 = vector.shape_cast %334 : vector<1x256x32xf32> to vector<256x32xf32>
    %cst_104 = arith.constant dense<0.000000e+00> : vector<16x32xf32>
    %336 = tpu.matmul %333, %335, %cst_104 {dimension_numbers = #tpu.dot_dimension_numbers<[1], [0], [0], [1], [0, 0, 1, 1], [], []>} : vector<16x256xf32>, vector<256x32xf32>, vector<16x32xf32> -> vector<16x32xf32>
    %337 = vector.extract_strided_slice %204 {offsets = [0, 0], sizes = [1, 32], strides = [1, 1]} : vector<8x768xf32> to vector<1x32xf32>
    %338 = vector.broadcast %337 : vector<1x32xf32> to vector<16x32xf32>
    %339 = arith.addf %336, %338 : vector<16x32xf32>
    %340 = arith.addf %202, %339 : vector<16x32xf32>
    %341 = vector.extract_strided_slice %204 {offsets = [1, 0], sizes = [1, 32], strides = [1, 1]} : vector<8x768xf32> to vector<1x32xf32>
    %342 = vector.extract_strided_slice %204 {offsets = [2, 0], sizes = [1, 32], strides = [1, 1]} : vector<8x768xf32> to vector<1x32xf32>
    %cst_105 = arith.constant dense<0.000000e+00> : vector<16xf32>
    %343 = vector.multi_reduction <add>, %340, %cst_105 [1] : vector<16x32xf32> to vector<16xf32>
    %344 = vector.shape_cast %343 : vector<16xf32> to vector<16x1xf32>
    %cst_106 = arith.constant 3.200000e+01 : f32
    %345 = vector.broadcast %cst_106 : f32 to vector<16x1xf32>
    %346 = arith.divf %344, %345 : vector<16x1xf32>
    %347 = vector.broadcast %346 : vector<16x1xf32> to vector<16x32xf32>
    %348 = arith.subf %340, %347 : vector<16x32xf32>
    %349 = arith.mulf %348, %348 : vector<16x32xf32>
    %cst_107 = arith.constant dense<0.000000e+00> : vector<16xf32>
    %350 = vector.multi_reduction <add>, %349, %cst_107 [1] : vector<16x32xf32> to vector<16xf32>
    %351 = vector.shape_cast %350 : vector<16xf32> to vector<16x1xf32>
    %cst_108 = arith.constant 3.200000e+01 : f32
    %352 = vector.broadcast %cst_108 : f32 to vector<16x1xf32>
    %353 = arith.divf %351, %352 : vector<16x1xf32>
    %354 = vector.broadcast %346 : vector<16x1xf32> to vector<16x32xf32>
    %355 = arith.subf %340, %354 : vector<16x32xf32>
    %cst_109 = arith.constant 9.99999974E-6 : f32
    %356 = vector.broadcast %cst_109 : f32 to vector<16x1xf32>
    %357 = arith.addf %353, %356 : vector<16x1xf32>
    %358 = math.rsqrt %357 : vector<16x1xf32>
    %359 = vector.broadcast %358 : vector<16x1xf32> to vector<16x32xf32>
    %360 = arith.mulf %355, %359 : vector<16x32xf32>
    %361 = vector.broadcast %341 : vector<1x32xf32> to vector<16x32xf32>
    %362 = arith.mulf %360, %361 : vector<16x32xf32>
    %363 = vector.broadcast %342 : vector<1x32xf32> to vector<16x32xf32>
    %364 = arith.addf %362, %363 : vector<16x32xf32>
    %c1_110 = arith.constant 1 : index
    %c0_111 = arith.constant 0 : index
    %c0_112 = arith.constant 0 : index
    %365 = vector.load %arg3[%c1_110, %c0_111, %c0_112] : memref<2x32x64xf32, #tpu.memory_space<vmem>>, vector<1x32x64xf32>
    %366 = vector.shape_cast %365 : vector<1x32x64xf32> to vector<32x64xf32>
    %cst_113 = arith.constant dense<0.000000e+00> : vector<16x64xf32>
    %367 = tpu.matmul %364, %366, %cst_113 {dimension_numbers = #tpu.dot_dimension_numbers<[1], [0], [0], [1], [0, 0, 1, 1], [], []>} : vector<16x32xf32>, vector<32x64xf32>, vector<16x64xf32> -> vector<16x64xf32>
    %368 = vector.extract_strided_slice %204 {offsets = [3, 0], sizes = [1, 64], strides = [1, 1]} : vector<8x768xf32> to vector<1x64xf32>
    %369 = vector.broadcast %368 : vector<1x64xf32> to vector<16x64xf32>
    %370 = arith.addf %367, %369 : vector<16x64xf32>
    %cst_114 = arith.constant 0.000000e+00 : f32
    %371 = vector.broadcast %cst_114 : f32 to vector<16x64xf32>
    %372 = arith.maximumf %370, %371 : vector<16x64xf32>
    %c1_115 = arith.constant 1 : index
    %c0_116 = arith.constant 0 : index
    %c0_117 = arith.constant 0 : index
    %373 = vector.load %arg4[%c1_115, %c0_116, %c0_117] : memref<2x64x32xf32, #tpu.memory_space<vmem>>, vector<1x64x32xf32>
    %374 = vector.shape_cast %373 : vector<1x64x32xf32> to vector<64x32xf32>
    %cst_118 = arith.constant dense<0.000000e+00> : vector<16x32xf32>
    %375 = tpu.matmul %372, %374, %cst_118 {dimension_numbers = #tpu.dot_dimension_numbers<[1], [0], [0], [1], [0, 0, 1, 1], [], []>} : vector<16x64xf32>, vector<64x32xf32>, vector<16x32xf32> -> vector<16x32xf32>
    %376 = vector.extract_strided_slice %204 {offsets = [4, 0], sizes = [1, 32], strides = [1, 1]} : vector<8x768xf32> to vector<1x32xf32>
    %377 = vector.broadcast %376 : vector<1x32xf32> to vector<16x32xf32>
    %378 = arith.addf %375, %377 : vector<16x32xf32>
    %379 = arith.addf %364, %378 : vector<16x32xf32>
    %380 = vector.extract_strided_slice %204 {offsets = [5, 0], sizes = [1, 32], strides = [1, 1]} : vector<8x768xf32> to vector<1x32xf32>
    %381 = vector.extract_strided_slice %204 {offsets = [6, 0], sizes = [1, 32], strides = [1, 1]} : vector<8x768xf32> to vector<1x32xf32>
    %cst_119 = arith.constant dense<0.000000e+00> : vector<16xf32>
    %382 = vector.multi_reduction <add>, %379, %cst_119 [1] : vector<16x32xf32> to vector<16xf32>
    %383 = vector.shape_cast %382 : vector<16xf32> to vector<16x1xf32>
    %cst_120 = arith.constant 3.200000e+01 : f32
    %384 = vector.broadcast %cst_120 : f32 to vector<16x1xf32>
    %385 = arith.divf %383, %384 : vector<16x1xf32>
    %386 = vector.broadcast %385 : vector<16x1xf32> to vector<16x32xf32>
    %387 = arith.subf %379, %386 : vector<16x32xf32>
    %388 = arith.mulf %387, %387 : vector<16x32xf32>
    %cst_121 = arith.constant dense<0.000000e+00> : vector<16xf32>
    %389 = vector.multi_reduction <add>, %388, %cst_121 [1] : vector<16x32xf32> to vector<16xf32>
    %390 = vector.shape_cast %389 : vector<16xf32> to vector<16x1xf32>
    %cst_122 = arith.constant 3.200000e+01 : f32
    %391 = vector.broadcast %cst_122 : f32 to vector<16x1xf32>
    %392 = arith.divf %390, %391 : vector<16x1xf32>
    %393 = vector.broadcast %385 : vector<16x1xf32> to vector<16x32xf32>
    %394 = arith.subf %379, %393 : vector<16x32xf32>
    %cst_123 = arith.constant 9.99999974E-6 : f32
    %395 = vector.broadcast %cst_123 : f32 to vector<16x1xf32>
    %396 = arith.addf %392, %395 : vector<16x1xf32>
    %397 = math.rsqrt %396 : vector<16x1xf32>
    %398 = vector.broadcast %397 : vector<16x1xf32> to vector<16x32xf32>
    %399 = arith.mulf %394, %398 : vector<16x32xf32>
    %400 = vector.broadcast %380 : vector<1x32xf32> to vector<16x32xf32>
    %401 = arith.mulf %399, %400 : vector<16x32xf32>
    %402 = vector.broadcast %381 : vector<1x32xf32> to vector<16x32xf32>
    %403 = arith.addf %401, %402 : vector<16x32xf32>
    %404 = vector.shape_cast %403 : vector<16x32xf32> to vector<2x8x32xf32>
    %c0_124 = arith.constant 0 : index
    %c0_125 = arith.constant 0 : index
    %c0_126 = arith.constant 0 : index
    %405 = vector.load %arg6[%c0_124, %c0_125, %c0_126] : memref<2x8x32xf32, #tpu.memory_space<vmem>>, vector<2x8x32xf32>
    tpu.vector_store %arg6[%c0_124, %c0_125, %c0_126], %404 {strides = array<i32>} : memref<2x8x32xf32, #tpu.memory_space<vmem>>, vector<2x8x32xf32>,
    return
  }
}

</mosaic_0001>

<bundles_post_ra>
// kernel: tpu_custom_call.1
= control target key start
LH: loop header
LB: loop body
LE: loop exit
PB: predicated region body
PF: predicated region fallthrough
CT: control target
= control target key end

     0   :  { %vm62_vm0 = vcmask 261120   ;;  %s5283_s0 = inlined_call_operand.vmem [shape: f32[2,8,32], index: 0, kind: input, shape index: {}]   ;;  %s5284_s1 = inlined_call_operand.vmem [shape: f32[2,32,768], index: 1, kind: input, shape index: {}]   ;;  %s5285_s2 = inlined_call_operand.vmem [shape: f32[2,256,32], index: 2, kind: input, shape index: {}]   ;;  %s5286_s3 = inlined_call_operand.vmem [shape: f32[2,32,64], index: 3, kind: input, shape index: {}]   ;;  %s5287_s4 = inlined_call_operand.vmem [shape: f32[2,64,32], index: 4, kind: input, shape index: {}]   ;;  %s5288_s5 = inlined_call_operand.vmem [shape: f32[2,8,768], index: 5, kind: input, shape index: {}]   ;;  %s5289_s6 = inlined_call_operand.hbm [shape: f32[2,8,32], index: 6, kind: output, shape index: {}]  }
   0x1   :  { %v52_v0 = vld [vmem:[%s5284_s1 + $0xa0] sm:$0xff]  ;;  %v46_v1 = vld [vmem:[%s5284_s1 + $0x70] sm:$0xff]  ;;  %v53_v6 = vld [vmem:[%s5284_s1 + $0xa8] sm:$0xff] }
   0x2   :  { %127 = vmatpush.msra.mxu2 %v52_v0  ;;  %v50_v2 = vld [vmem:[%s5284_s1 + $0x90] sm:$0xff]  ;;  %v40_v3 = vld [vmem:[%s5284_s1 + $0x40] sm:$0xff]  ;;  %v47_v7 = vld [vmem:[%s5284_s1 + $0x78] sm:$0xff]  ;;  %150 = vmatpush.msra.mxu3 %v53_v6 }
   0x3   :  { %81 = vmatpush.msra.mxu1 %v50_v2  ;;  %v44_v4 = vld [vmem:[%s5284_s1 + $0x60] sm:$0xff]  ;;  %v38_v5 = vld [vmem:[%s5284_s1 + $0x30] sm:$0xff]  ;;  %v41_v11 = vld [vmem:[%s5284_s1 + $0x48] sm:$0xff] }
   0x4   :  { %128 = vmatpush.msra.mxu2 %v46_v1  ;;  %v34_v8 = vld [vmem:[%s5284_s1 + $0x10] sm:$0xff]  ;;  %v4072_v9 = vld [vmem:[%s5283_s0] sm:$0xff]  ;;  %151 = vmatpush.msra.mxu3 %v47_v7  ;;  %v51_v13 = vld [vmem:[%s5284_s1 + $0x98] sm:$0xff] }
   0x5   :  { %82 = vmatpush.msra.mxu1 %v44_v4  ;;  %v32_v10 = vld [vmem:[%s5284_s1] sm:$0xff]  ;;  %v54_v12 = vld [vmem:[%s5284_s1 + $0xb0] sm:$0xff] }
   0x6   :  { %129 = vmatpush.msra.mxu2 %v40_v3  ;;  %173 = vmatpush.msra.mxu0 %v54_v12  ;;  %v48_v14 = vld [vmem:[%s5284_s1 + $0x80] sm:$0xff] }
   0x7   :  { %83 = vmatpush.msra.mxu1 %v38_v5 }
   0x8   :  { %130 = vmatpush.msra.mxu2 %v34_v8 }
   0x9   :  { %11 = vsyncpa [#allocation3], 0  ;;  %3524 = vmatmul.msk.f32.vlgmr.msra.gmra.mxu2 %vm62_vm0, %v4072_v9  ;;  %84 = vmatpush.msra.mxu1 %v32_v10  ;;  %v35_v15 = vld [vmem:[%s5284_s1 + $0x18] sm:$0xff]  ;;  %v45_v16 = vld [vmem:[%s5284_s1 + $0x68] sm:$0xff]  ;;  %s4000_s21 = smov 64   ;;  %s4001_s22 = smov 96  }
   0xa   :  { %3520 = vmatmul.msk.f32.vlgmr.msra.gmra.mxu1 %vm62_vm0, %v4072_v9  ;;  %152 = vmatpush.msra.mxu3 %v41_v11  ;;  %v42_v17 = vld [vmem:[%s5284_s1 + $0x50] sm:$0xff]  ;;  %v39_v18 = vld [vmem:[%s5284_s1 + $0x38] sm:$0xff]  ;;  %v36_v19 = vld [vmem:[%s5284_s1 + $0x20] sm:$0xff]  ;;  %s4002_s23 = smov 32   ;;  %vm259_vm1 = vcmask 64512   ;;  %s4005_s10 = smov 128  }
   0xb   :  { %104 = vmatpush.msrb.mxu1 %v51_v13  ;;  %174 = vmatpush.msra.mxu0 %v48_v14  ;;  %v4113_v20 = vld [vmem:[%s5283_s0 + $0x8] sm:$0xff]  ;;  %v26_v22 = vld [vmem:[%s5288_s5] sm:$0xff]  ;;  %v28_v24 = vld [vmem:[%s5288_s5 + $0x10] sm:$0xff] }
   0xc   :  { %153 = vmatpush.msra.mxu3 %v35_v15  ;;  %v33_v21 = vld [vmem:[%s5284_s1 + $0x8] sm:$0xff]  ;;  %v56_v23 = vperm.slane %v26_v22, 7  ;;  %v58_v27 = vperm.slane %v28_v24, 7  ;;  %v29_v35 = vld [vmem:[%s5288_s5 + $0x18] sm:$0xff]  ;;  %v30_v41 = vld [vmem:[%s5288_s5 + $0x20] sm:$0xff] }
   0xd   :  { %3526 = vmatmul.msk.f32.vlgmr.msra.gmra.mxu3 %vm62_vm0, %v4072_v9  ;;  %105 = vmatpush.msrb.mxu1 %v45_v16  ;;  %v27_v36 = vld [vmem:[%s5288_s5 + $0x8] sm:$0xff]  ;;  %v59_v38 = vperm.slane %v29_v35, 7  ;;  %v60_v44 = vperm.slane %v30_v41, 7  ;;  %v55_v52 = vld [vmem:[%s5284_s1 + $0xb8] sm:$0xff] }
   0xe   :  { %175 = vmatpush.msra.mxu0 %v42_v17  ;;  %v57_v40 = vperm.slane %v27_v36, 7  ;;  %v49_v53 = vld [vmem:[%s5284_s1 + $0x88] sm:$0xff]  ;;  %v43_v54 = vld [vmem:[%s5284_s1 + $0x58] sm:$0xff] }
   0xf   :  { %106 = vmatpush.msrb.mxu1 %v39_v18  ;;  %v37_v55 = vld [vmem:[%s5284_s1 + $0x28] sm:$0xff] }
  0x10   :  { %176 = vmatpush.msra.mxu0 %v36_v19 }
  0x11   :  { %3525 = vmatmul.msk.f32.gmra.mxu2 %vm62_vm0, %v4113_v20  ;;  %107 = vmatpush.msrb.mxu1 %v33_v21 }
  0x12   :  { %3521 = vmatmul.msk.f32.gmra.mxu1 %vm62_vm0, %v4113_v20  ;;  %3528 = vmatmul.msk.f32.vlgmr.msra.gmra.mxu0 %vm62_vm0, %v4072_v9 }
  0x13   :  { %196 = vmatpush.msra.mxu1 %v55_v52 }
  0x15   :  { %3527 = vmatmul.msk.f32.gmra.mxu3 %vm62_vm0, %v4113_v20  ;;  %197 = vmatpush.msra.mxu1 %v49_v53 }
  0x17   :  { %198 = vmatpush.msra.mxu1 %v43_v54 }
  0x19   :  { %199 = vmatpush.msra.mxu1 %v37_v55 }
  0x1a   :  { %3522 = vmatmul.msk.f32.vlgmr.msrb.gmra.mxu1 %vm62_vm0, %v4072_v9  ;;  %3529 = vmatmul.msk.f32.gmra.mxu0 %vm62_vm0, %v4113_v20 }
  0x22   :  { %3523 = vmatmul.msk.f32.gmra.mxu1 %vm62_vm0, %v4113_v20 }
  0x2a   :  { %3530 = vmatmul.msk.f32.vlgmr.msra.gmra.mxu1 %vm62_vm0, %v4072_v9 }
  0x32   :  { %3531 = vmatmul.msk.f32.gmra.mxu1 %vm62_vm0, %v4113_v20 }
  0x87   :  { %v86_v25 = vpop.f32.mrf.mxu1 }
  0x88   :  { %v87_v26 = vadd.f32 %v86_v25, %v56_v23 }
  0x8a   :  { %512 = vrot.lane.b32.xlu2 %v87_v26, %s4000_s21 }
  0x8c   :  { %v132_v28 = vpop.f32.mrf.mxu2 }
  0x8d   :  { %v133_v29 = vadd.f32 %v132_v28, %v58_v27 }
  0x8f   :  { %514 = vrot.lane.b32.xlu1 %v133_v29, %s4000_s21  ;;  %356 = vrot.lane.b32.xlu0 %v133_v29, %s4001_s22  ;;  %v89_v30 = vpop.f32.mrf.mxu1  ;;  %v178_v42 = vpop.f32.mrf.mxu0 }
  0x90   :  { %3532 = vmatpush.xpose.msk.msrb.mxu2 %vm62_vm0, %v133_v29  ;;  %v90_v31 = vadd.f32 %v89_v30, %v56_v23  ;;  %v155_v34 = vpop.f32.mrf.mxu3  ;;  %v179_v45 = vadd.f32 %v178_v42, %v60_v44 }
  0x91   :  { %v156_v47 = vadd.f32 %v155_v34, %v59_v38 }
  0x92   :  { %382 = vrot.lane.b32.xlu2 %v90_v31, %s4001_s22 }
  0x93   :  { %3533 = vmatmul.msk.f32.vlgmr.msrb.gmra.mxu2 %vm62_vm0, %v87_v26 }
  0x94   :  { %v135_v32 = vpop.f32.mrf.mxu2  ;;  %326 = vmatpush.msra.mxu2 %v179_v45 }
  0x95   :  { %v136_v33 = vadd.f32 %v135_v32, %v58_v27 }
  0x97   :  { %3534 = vmatpush.xpose.msk.msrb.mxu3 %vm62_vm0, %v136_v33  ;;  %384 = vrot.lane.b32.xlu1 %v136_v33, %s4001_s22  ;;  %v109_v39 = vpop.f32.mrf.mxu1  ;;  %v181_v48 = vpop.f32.mrf.mxu0 }
  0x98   :  { %354 = vrot.lane.b32.xlu0 %v87_v26, %s4001_s22  ;;  %v158_v37 = vpop.f32.mrf.mxu3  ;;  %v4167_v46 = vadd.f32 %v109_v39, %v57_v40  ;;  %v182_v50 = vadd.f32 %v181_v48, %v60_v44 }
  0x99   :  { %v4163_v43 = vadd.f32 %v158_v37, %v59_v38 }
  0x9a   :  { %3535 = vmatmul.msk.f32.vlgmr.msrb.gmra.mxu3 %vm62_vm0, %v90_v31  ;;  %540 = vrot.lane.b32.xlu2 %v90_v31, %s4000_s21  ;;  %v4197_v56 = vpack.i.bf16 %v182_v50, %v179_v45 }
  0x9b   :  { %349 = vmatpush.msra.mxu3 %v182_v50 }
  0x9f   :  { %670 = vrot.lane.b32.xlu1 %v133_v29, %s4002_s23  ;;  %v112_v49 = vpop.f32.mrf.mxu1 }
  0xa0   :  { %542 = vrot.lane.b32.xlu0 %v136_v33, %s4000_s21  ;;  %v113_v51 = vadd.f32 %v112_v49, %v57_v40 }
  0xa2   :  { %696 = vrot.lane.b32.xlu2 %v90_v31, %s4002_s23 }
  0xa7   :  { %698 = vrot.lane.b32.xlu1 %v136_v33, %s4002_s23  ;;  %v4237_v24 = vpop.f32.mrf.mxu1 }
  0xa8   :  { %668 = vrot.lane.b32.xlu0 %v87_v26, %s4002_s23 }
  0xaa   :  { %1000 = vrot.lane.b32.xlu2 %v4163_v43, %s4001_s22 }
  0xaf   :  { %970 = vrot.lane.b32.xlu1 %v4167_v46, %s4001_s22  ;;  %v4239_v25 = vpop.f32.mrf.mxu1 }
  0xb0   :  { %972 = vrot.lane.b32.xlu0 %v156_v47, %s4001_s22 }
  0xb2   :  { %1128 = vrot.lane.b32.xlu2 %v4167_v46, %s4000_s21 }
  0xb7   :  { %998 = vrot.lane.b32.xlu1 %v113_v51, %s4001_s22 }
  0xb8   :  { %1130 = vrot.lane.b32.xlu0 %v156_v47, %s4000_s21 }
  0xba   :  { %1156 = vrot.lane.b32.xlu2 %v113_v51, %s4000_s21 }
  0xbf   :  { %1286 = vrot.lane.b32.xlu1 %v156_v47, %s4002_s23 }
  0xc0   :  { %1158 = vrot.lane.b32.xlu0 %v4163_v43, %s4000_s21 }
  0xc2   :  { %1312 = vrot.lane.b32.xlu2 %v113_v51, %s4002_s23 }
  0xc7   :  { %1314 = vrot.lane.b32.xlu1 %v4163_v43, %s4002_s23 }
  0xc8   :  { %1284 = vrot.lane.b32.xlu0 %v4167_v46, %s4002_s23 }
  0xcf   :  { %3730 = vrot.lane.b32.xlu1 %v4197_v56, %s4001_s22 }
  0xe4   :  { %v513_v57 = vpop.permute.xlu2 %512 }
  0xec   :  { %v383_v60 = vpop.permute.xlu2 %382 }
  0xf4   :  { %v541_v63 = vpop.permute.xlu2 %540 }
  0xfc   :  { %v697_v2 = vpop.permute.xlu2 %696 }
 0x101   :  { %v515_v58 = vpop.permute.xlu1 %514  ;;  %v357_v59 = vpop.permute.xlu0 %356 }
 0x102   :  { %3538 = vmatpush.xpose.msk.msrb.mxu0 %vm62_vm0, %v357_v59 }
 0x104   :  { %v1001_v9 = vpop.permute.xlu2 %1000 }
 0x106   :  { %3544 = vmatpush.xpose.msk.msra.mxu0 %vm62_vm0, %v515_v58 }
 0x109   :  { %v385_v61 = vpop.permute.xlu1 %384 }
 0x10a   :  { %v355_v62 = vpop.permute.xlu0 %354  ;;  %3540 = vmatpush.xpose.msk.msrb.mxu1 %vm62_vm0, %v385_v61 }
 0x10b   :  { %3539 = vmatmul.msk.f32.vlgmr.msrb.gmra.mxu0 %vm62_vm0, %v355_v62 }
 0x10c   :  { %v1129_v13 = vpop.permute.xlu2 %1128 }
 0x10d   :  { %3541 = vmatmul.msk.f32.vlgmr.msrb.gmra.mxu1 %vm62_vm0, %v383_v60 }
 0x111   :  { %v671_v0 = vpop.permute.xlu1 %670 }
 0x112   :  { %v543_v1 = vpop.permute.xlu0 %542  ;;  %3550 = vmatpush.xpose.msk.msrb.mxu0 %vm62_vm0, %v671_v0 }
 0x113   :  { %3545 = vmatmul.msk.f32.vlgmr.msra.gmra.mxu0 %vm62_vm0, %v513_v57  ;;  %3546 = vmatpush.xpose.msk.msra.mxu1 %vm62_vm0, %v543_v1 }
 0x114   :  { %v1157_v17 = vpop.permute.xlu2 %1156 }
 0x116   :  { %3556 = vmatpush.xpose.msk.msra.mxu0 %vm62_vm0, %v156_v47  ;;  %v230_v3 = vpop.f32.mrf.mxu2  ;;  %3547 = vmatmul.msk.f32.vlgmr.msra.gmra.mxu1 %vm62_vm0, %v541_v63 }
 0x117   :  { %v260_v4 = vsel %vm259_vm1, %v230_v3, -inf }
 0x118   :  { %261 = vmax.xlane.f32.xlu0 %v260_v4 }
 0x119   :  { %v699_v5 = vpop.permute.xlu1 %698 }
 0x11a   :  { %v669_v6 = vpop.permute.xlu0 %668  ;;  %3552 = vmatpush.xpose.msk.msrb.mxu1 %vm62_vm0, %v699_v5 }
 0x11b   :  { %3551 = vmatmul.msk.f32.vlgmr.msrb.gmra.mxu0 %vm62_vm0, %v669_v6 }
 0x11c   :  { %v1313_v20 = vpop.permute.xlu2 %1312 }
 0x11d   :  { %v256_v7 = vpop.f32.mrf.mxu3 }
 0x11e   :  { %3558 = vmatpush.xpose.msk.msra.mxu1 %vm62_vm0, %v4163_v43  ;;  %v263_v8 = vsel %vm259_vm1, %v256_v7, -inf }
 0x11f   :  { %3553 = vmatmul.msk.f32.vlgmr.msrb.gmra.mxu1 %vm62_vm0, %v697_v2  ;;  %264 = vmax.xlane.f32.xlu1 %v263_v8 }
 0x121   :  { %v971_v10 = vpop.permute.xlu1 %970 }
 0x122   :  { %3564 = vmatpush.xpose.msk.msrb.mxu1 %vm62_vm0, %v1001_v9  ;;  %v973_v11 = vpop.permute.xlu0 %972 }
 0x123   :  { %3557 = vmatmul.msk.f32.vlgmr.msra.gmra.mxu0 %vm62_vm0, %v4167_v46 }
 0x124   :  { %3562 = vmatpush.xpose.msk.msrb.mxu0 %vm62_vm0, %v973_v11 }
 0x127   :  { %3559 = vmatmul.msk.f32.vlgmr.msra.gmra.mxu1 %vm62_vm0, %v113_v51 }
 0x129   :  { %v999_v12 = vpop.permute.xlu1 %998 }
 0x12a   :  { %v1131_v14 = vpop.permute.xlu0 %1130 }
 0x12b   :  { %3563 = vmatmul.msk.f32.vlgmr.msrb.gmra.mxu0 %vm62_vm0, %v971_v10 }
 0x12c   :  { %3568 = vmatpush.xpose.msk.msra.mxu0 %vm62_vm0, %v1131_v14 }
 0x12f   :  { %3565 = vmatmul.msk.f32.vlgmr.msrb.gmra.mxu1 %vm62_vm0, %v999_v12 }
 0x131   :  { %v1287_v15 = vpop.permute.xlu1 %1286 }
 0x132   :  { %v1159_v16 = vpop.permute.xlu0 %1158  ;;  %3574 = vmatpush.xpose.msk.msrb.mxu0 %vm62_vm0, %v1287_v15 }
 0x133   :  { %3570 = vmatpush.xpose.msk.msra.mxu1 %vm62_vm0, %v1159_v16  ;;  %3569 = vmatmul.msk.f32.vlgmr.msra.gmra.mxu0 %vm62_vm0, %v1129_v13 }
 0x137   :  { %3571 = vmatmul.msk.f32.vlgmr.msra.gmra.mxu1 %vm62_vm0, %v1157_v17 }
 0x139   :  { %v1315_v18 = vpop.permute.xlu1 %1314 }
 0x13a   :  { %3576 = vmatpush.xpose.msk.msrb.mxu1 %vm62_vm0, %v1315_v18  ;;  %v1285_v19 = vpop.permute.xlu0 %1284 }
 0x13b   :  { %3575 = vmatmul.msk.f32.vlgmr.msrb.gmra.mxu0 %vm62_vm0, %v1285_v19 }
 0x13f   :  { %3577 = vmatmul.msk.f32.vlgmr.msrb.gmra.mxu1 %vm62_vm0, %v1313_v20 }
 0x141   :  { %v3731_v21 = vpop.permute.xlu1 %3730 }
 0x142   :  { %v3733_v22 = vunpack.i.h.bf16 %v3731_v21  ;;  %v3732_v23 = vunpack.i.l.bf16 %v3731_v21 }
 0x144   :  { %480 = vmatpush.msrb.mxu2 %v3732_v23  ;;  %507 = vmatpush.msrb.mxu3 %v3733_v22 }
 0x188   :  { %v379_v26 = vpop.f32.mrf.mxu0 }
 0x189   :  { %v410_v27 = vsel %vm259_vm1, %v379_v26, -inf }
 0x18a   :  { %411 = vmax.xlane.f32.xlu2 %v410_v27  ;;  %v4242_v28 = vpop.f32.mrf.mxu1 }
 0x18b   :  { %v262_v29 = vpop.xlane.xlu0 %261  ;;  %v413_v32 = vsel %vm259_vm1, %v4242_v28, -inf }
 0x18c   :  { %v266_v30 = vsub.f32 %v230_v3, %v262_v29 }
 0x18e   :  { %v268_v31 = vmul.f32 1.442695, %v266_v30 }
 0x190   :  { %3824 = vpow2.f32 %v268_v31  ;;  %v537_v33 = vpop.f32.mrf.mxu0 }
 0x191   :  { %v568_v34 = vsel %vm259_vm1, %v537_v33, -inf }
 0x192   :  { %414 = vmax.xlane.f32.xlu2 %v413_v32  ;;  %569 = vmax.xlane.f32.xlu0 %v568_v34  ;;  %v265_v37 = vpop.xlane.xlu1 %264  ;;  %v31_v32 = vld [vmem:[%s5288_s5 + $0x28] sm:$0xff] }
 0x193   :  { %v565_v35 = vpop.f32.mrf.mxu1  ;;  %v267_v39 = vsub.f32 %v256_v7, %v265_v37  ;;  %v61_v37 = vperm.slane %v31_v32, 7 }
 0x194   :  { %v571_v36 = vsel %vm259_vm1, %v565_v35, -inf }
 0x195   :  { %572 = vmax.xlane.f32.xlu1 %v571_v36  ;;  %v270_v44 = vmul.f32 1.442695, %v267_v39 }
 0x196   :  { %v4248_v38 = vpop.eup %3824 }
 0x197   :  { %v272_v42 = vsel %vm259_vm1, %v4248_v38, 0.0  ;;  %3826 = vpow2.f32 %v270_v44 }
 0x198   :  { %v4250_v40 = vpop.f32.mrf.mxu0 }
 0x199   :  { %v724_v41 = vsel %vm259_vm1, %v4250_v40, -inf }
 0x19a   :  { %725 = vmax.xlane.f32.xlu2 %v724_v41  ;;  %273 = vadd.xlane.f32.xlu0 %v272_v42 }
 0x19c   :  { %v4256_v43 = vpop.f32.mrf.mxu1 }
 0x19d   :  { %v727_v47 = vsel %vm259_vm1, %v4256_v43, -inf  ;;  %v4266_v49 = vpop.eup %3826 }
 0x19e   :  { %v275_v50 = vsel %vm259_vm1, %v4266_v49, 0.0 }
 0x1a0   :  { %v4258_v45 = vpop.f32.mrf.mxu0 }
 0x1a1   :  { %v876_v46 = vsel %vm259_vm1, %v4258_v45, -inf }
 0x1a2   :  { %877 = vmax.xlane.f32.xlu1 %v876_v46  ;;  %728 = vmax.xlane.f32.xlu0 %v727_v47  ;;  %v4322_v46 = vadd.f32 %v4237_v24, %v61_v37  ;;  %v4325_v47 = vadd.f32 %v4239_v25, %v61_v37 }
 0x1a4   :  { %v4264_v48 = vpop.f32.mrf.mxu1  ;;  %v3744_v24 = vpack.i.bf16 %v4325_v47, %v4322_v46 }
 0x1a5   :  { %v879_v58 = vsel %vm259_vm1, %v4264_v48, -inf }
 0x1a8   :  { %v4274_v53 = vpop.f32.mrf.mxu0 }
 0x1a9   :  { %v1026_v54 = vsel %vm259_vm1, %v4274_v53, -inf }
 0x1aa   :  { %276 = vadd.xlane.f32.xlu0 %v275_v50 }
 0x1ac   :  { %v4270_v51 = vpop.f32.mrf.mxu1 }
 0x1ad   :  { %v1029_v52 = vsel %vm259_vm1, %v4270_v51, -inf }
 0x1ae   :  { %1030 = vmax.xlane.f32.xlu1 %v1029_v52 }
 0x1b0   :  { %v4286_v59 = vpop.f32.mrf.mxu0 }
 0x1b1   :  { %v1184_v60 = vsel %vm259_vm1, %v4286_v59, -inf }
 0x1b2   :  { %3735 = vrot.lane.b32.xlu2 %v4197_v56, %s4000_s21  ;;  %1027 = vmax.xlane.f32.xlu0 %v1026_v54 }
 0x1b4   :  { %v4280_v55 = vpop.f32.mrf.mxu1 }
 0x1b5   :  { %v1187_v57 = vsel %vm259_vm1, %v4280_v55, -inf }
 0x1b6   :  { %1188 = vmax.xlane.f32.xlu1 %v1187_v57 }
 0x1b8   :  { %v4290_v61 = vpop.f32.mrf.mxu0 }
 0x1b9   :  { %v1340_v62 = vsel %vm259_vm1, %v4290_v61, -inf }
 0x1bc   :  { %v4294_v63 = vpop.f32.mrf.mxu1 }
 0x1bd   :  { %v1343_v0 = vsel %vm259_vm1, %v4294_v63, -inf }
 0x1db   :  { %880 = vmax.xlane.f32.xlu2 %v879_v58 }
 0x1e3   :  { %1185 = vmax.xlane.f32.xlu2 %v1184_v60 }
 0x1eb   :  { %1341 = vmax.xlane.f32.xlu2 %v1340_v62 }
 0x1f3   :  { %1344 = vmax.xlane.f32.xlu2 %v1343_v0 }
 0x1fd   :  { %v412_v1 = vpop.xlane.xlu2 %411 }
 0x1fe   :  { %v416_v2 = vsub.f32 %v379_v26, %v412_v1 }
 0x200   :  { %v418_v3 = vmul.f32 1.442695, %v416_v2 }
 0x202   :  { %3828 = vpow2.f32 %v418_v3 }
 0x205   :  { %v415_v4 = vpop.xlane.xlu2 %414  ;;  %v570_v5 = vpop.xlane.xlu0 %569 }
 0x206   :  { %v417_v6 = vsub.f32 %v4242_v28, %v415_v4  ;;  %v574_v7 = vsub.f32 %v537_v33, %v570_v5 }
 0x208   :  { %v4299_v8 = vpop.eup %3828  ;;  %v420_v9 = vmul.f32 1.442695, %v417_v6  ;;  %v576_v10 = vmul.f32 1.442695, %v574_v7  ;;  %v573_v11 = vpop.xlane.xlu1 %572 }
 0x209   :  { %v575_v12 = vsub.f32 %v565_v35, %v573_v11  ;;  %v422_v13 = vsel %vm259_vm1, %v4299_v8, 0.0 }
 0x20a   :  { %3830 = vpow2.f32 %v420_v9  ;;  %423 = vadd.xlane.f32.xlu1 %v422_v13 }
 0x20b   :  { %3832 = vpow2.f32 %v576_v10  ;;  %v578_v14 = vmul.f32 1.442695, %v575_v12 }
 0x20d   :  { %3834 = vpow2.f32 %v578_v14  ;;  %v274_v15 = vpop.xlane.xlu0 %273  ;;  %v4313_v22 = vpop.xlane.xlu2 %725 }
 0x20e   :  { %3836 = vrcp.f32 %v274_v15  ;;  %v289_v30 = vand.u32 2147483648, %v274_v15  ;;  %v287_v34 = vand.u32 2147483647, %v274_v15  ;;  %vm283_vm3 = vweird.f32 %v274_v15 }
 0x210   :  { %v4303_v16 = vpop.eup %3830  ;;  %v290_v39 = vor.u32 1.1754944e-38, %v289_v30  ;;  %vm288_vm5 = vcmp.eq.f32.partialorder %v287_v34, 8.507059e+37 }
 0x211   :  { %v4305_v17 = vpop.eup %3832  ;;  %v425_v18 = vsel %vm259_vm1, %v4303_v16, 0.0 }
 0x212   :  { %426 = vadd.xlane.f32.xlu0 %v425_v18  ;;  %v580_v19 = vsel %vm259_vm1, %v4305_v17, 0.0 }
 0x213   :  { %v4311_v20 = vpop.eup %3834  ;;  %581 = vadd.xlane.f32.xlu1 %v580_v19 }
 0x214   :  { %v3837_v21 = vpop.eup %3836  ;;  %v583_v23 = vsel %vm259_vm1, %v4311_v20, 0.0 }
 0x215   :  { %v279_v26 = vmul.f32 %v3837_v21, %v274_v15  ;;  %584 = vadd.xlane.f32.xlu2 %v583_v23  ;;  %v729_v27 = vpop.xlane.xlu0 %728  ;;  %v878_v31 = vpop.xlane.xlu1 %877  ;;  %vm284_vm2 = vweird.f32 %v3837_v21 }
 0x216   :  { %v731_v29 = vsub.f32 %v4256_v43, %v729_v27  ;;  %vm285_vm4 = vmor %vm283_vm3, %vm284_vm2  ;;  %v3736_v43 = vpop.permute.xlu2 %3735  ;;  %v882_v14 = vsub.f32 %v4258_v45, %v878_v31 }
 0x217   :  { %v280_v28 = vsub.f32 1.0, %v279_v26  ;;  %v3737_v57 = vunpack.i.l.bf16 %v3736_v43  ;;  %v3738_v11 = vunpack.i.h.bf16 %v3736_v43 }
 0x218   :  { %v734_v35 = vmul.f32 1.442695, %v731_v29  ;;  %v884_v15 = vmul.f32 1.442695, %v882_v14 }
 0x219   :  { %v281_v33 = vmul.f32 %v3837_v21, %v280_v28 }
 0x21a   :  { %3838 = vpow2.f32 %v734_v35 }
 0x21b   :  { %v282_v36 = vadd.f32 %v3837_v21, %v281_v33 }
 0x21d   :  { %v286_v41 = vsel %vm285_vm4, %v3837_v21, %v282_v36  ;;  %v277_v44 = vpop.xlane.xlu0 %276 }
 0x21e   :  { %v291_v42 = vsel %vm288_vm5, %v290_v39, %v286_v41  ;;  %3840 = vrcp.f32 %v277_v44  ;;  %v301_v3 = vand.u32 2147483647, %v277_v44  ;;  %vm297_vm7 = vweird.f32 %v277_v44 }
 0x21f   :  { %v306_v52 = vmul.f32 %v4248_v38, %v291_v42  ;;  %v303_v38 = vand.u32 2147483648, %v277_v44 }
 0x220   :  { %v4330_v54 = vpop.eup %3838  ;;  %vm302_vm9 = vcmp.eq.f32.partialorder %v301_v3, 8.507059e+37 }
 0x221   :  { %v4327_v50 = vpop.xlane.xlu1 %1030  ;;  %3536 = vmatmul.msk.f32.vlgmr.msra.gmra.mxu2 %vm259_vm1, %v306_v52  ;;  %v739_v58 = vsel %vm259_vm1, %v4330_v54, 0.0  ;;  %v304_v6 = vor.u32 1.1754944e-38, %v303_v38 }
 0x222   :  { %637 = vmatpush.msra.mxu2 %v3737_v57  ;;  %740 = vadd.xlane.f32.xlu2 %v739_v58  ;;  %v1033_v31 = vsub.f32 %v4270_v51, %v4327_v50 }
 0x224   :  { %v3841_v60 = vpop.eup %3840  ;;  %v1036_v33 = vmul.f32 1.442695, %v1033_v31 }
 0x225   :  { %v293_v25 = vmul.f32 %v3841_v60, %v277_v44  ;;  %vm298_vm6 = vweird.f32 %v3841_v60 }
 0x226   :  { %3745 = vrot.lane.b32.xlu0 %v3744_v24, %s4001_s22  ;;  %vm299_vm8 = vmor %vm297_vm7, %vm298_vm6 }
 0x227   :  { %v294_v62 = vsub.f32 1.0, %v293_v25 }
 0x229   :  { %v1189_v0 = vpop.xlane.xlu1 %1188  ;;  %v295_v2 = vmul.f32 %v3841_v60, %v294_v62 }
 0x22a   :  { %v1191_v1 = vsub.f32 %v4280_v55, %v1189_v0 }
 0x22b   :  { %v296_v5 = vadd.f32 %v3841_v60, %v295_v2 }
 0x22c   :  { %v1194_v4 = vmul.f32 1.442695, %v1191_v1  ;;  %3740 = vrot.lane.b32.xlu1 %v4197_v56, %s4002_s23  ;;  %v730_v56 = vsub.f32 %v4250_v40, %v4313_v22  ;;  %v1028_v40 = vpop.xlane.xlu0 %1027 }
 0x22d   :  { %v300_v7 = vsel %vm299_vm8, %v3841_v60, %v296_v5  ;;  %v1032_v45 = vsub.f32 %v4274_v53, %v1028_v40 }
 0x22e   :  { %3842 = vpow2.f32 %v1194_v4  ;;  %v305_v9 = vsel %vm302_vm9, %v304_v6, %v300_v7  ;;  %v732_v13 = vmul.f32 1.442695, %v730_v56 }
 0x22f   :  { %v307_v10 = vmul.f32 %v4266_v49, %v305_v9  ;;  %v1034_v29 = vmul.f32 1.442695, %v1032_v45 }
 0x230   :  { %3844 = vpow2.f32 %v732_v13 }
 0x231   :  { %3537 = vmatmul.msk.f32.vlgmr.msra.gmra.mxu3 %vm259_vm1, %v307_v10  ;;  %3846 = vpow2.f32 %v884_v15 }
 0x232   :  { %663 = vmatpush.msra.mxu3 %v3738_v11 }
 0x234   :  { %v4343_v55 = vpop.eup %3842 }
 0x235   :  { %v1199_v12 = vsel %vm259_vm1, %v4343_v55, 0.0 }
 0x236   :  { %1200 = vadd.xlane.f32.xlu2 %v1199_v12  ;;  %v4350_v18 = vpop.eup %3844 }
 0x237   :  { %v736_v21 = vsel %vm259_vm1, %v4350_v18, 0.0  ;;  %v4357_v22 = vpop.eup %3846 }
 0x24e   :  { %1258 = vrot.lane.b32.xlu2 %v4325_v47, %s4000_s21  ;;  %v881_v49 = vpop.xlane.xlu2 %880 }
 0x24f   :  { %v883_v19 = vsub.f32 %v4264_v48, %v881_v49  ;;  %v888_v48 = vsel %vm259_vm1, %v4357_v22, 0.0 }
 0x250   :  { %737 = vadd.xlane.f32.xlu0 %v736_v21 }
 0x251   :  { %v886_v23 = vmul.f32 1.442695, %v883_v19 }
 0x253   :  { %3848 = vpow2.f32 %v886_v23 }
 0x256   :  { %1414 = vrot.lane.b32.xlu2 %v4325_v47, %s4002_s23  ;;  %v1186_v26 = vpop.xlane.xlu2 %1185 }
 0x257   :  { %v1190_v27 = vsub.f32 %v4286_v59, %v1186_v26 }
 0x258   :  { %889 = vadd.xlane.f32.xlu0 %v888_v48 }
 0x259   :  { %v1192_v28 = vmul.f32 1.442695, %v1190_v27  ;;  %v4365_v30 = vpop.eup %3848 }
 0x25a   :  { %v891_v53 = vsel %vm259_vm1, %v4365_v30, 0.0 }
 0x25b   :  { %3850 = vpow2.f32 %v1192_v28 }
 0x25c   :  { %3852 = vpow2.f32 %v1034_v29 }
 0x25d   :  { %3854 = vpow2.f32 %v1036_v33 }
 0x25e   :  { %v1342_v59 = vpop.xlane.xlu2 %1341 }
 0x25f   :  { %v1346_v36 = vsub.f32 %v4290_v61, %v1342_v59 }
 0x260   :  { %892 = vadd.xlane.f32.xlu0 %v891_v53 }
 0x261   :  { %v4371_v32 = vpop.eup %3850  ;;  %v1348_v37 = vmul.f32 1.442695, %v1346_v36 }
 0x262   :  { %v1196_v34 = vsel %vm259_vm1, %v4371_v32, 0.0  ;;  %v4375_v35 = vpop.eup %3852 }
 0x263   :  { %1197 = vadd.xlane.f32.xlu1 %v1196_v34  ;;  %v1038_v51 = vsel %vm259_vm1, %v4375_v35, 0.0  ;;  %v4380_v41 = vpop.eup %3854  ;;  %3856 = vpow2.f32 %v1348_v37 }
 0x264   :  { %v1041_v43 = vsel %vm259_vm1, %v4380_v41, 0.0 }
 0x266   :  { %v1345_v39 = vpop.xlane.xlu2 %1344 }
 0x267   :  { %v1347_v42 = vsub.f32 %v4294_v63, %v1345_v39 }
 0x268   :  { %1039 = vadd.xlane.f32.xlu0 %v1038_v51 }
 0x269   :  { %v1350_v44 = vmul.f32 1.442695, %v1347_v42  ;;  %v4385_v50 = vpop.eup %3856 }
 0x26a   :  { %v1352_v61 = vsel %vm259_vm1, %v4385_v50, 0.0 }
 0x26b   :  { %3858 = vpow2.f32 %v1350_v44 }
 0x270   :  { %1042 = vadd.xlane.f32.xlu0 %v1041_v43 }
 0x271   :  { %v4389_v52 = vpop.eup %3858 }
 0x272   :  { %v1355_v63 = vsel %vm259_vm1, %v4389_v52, 0.0 }
 0x278   :  { %1353 = vadd.xlane.f32.xlu0 %v1352_v61 }
 0x27c   :  { %1232 = vrot.lane.b32.xlu1 %v4322_v46, %s4000_s21 }
 0x27d   :  { %v424_v57 = vpop.xlane.xlu1 %423 }
 0x27e   :  { %3860 = vrcp.f32 %v424_v57  ;;  %v439_v0 = vand.u32 2147483648, %v424_v57  ;;  %v437_v2 = vand.u32 2147483647, %v424_v57  ;;  %vm433_vm11 = vweird.f32 %v424_v57 }
 0x280   :  { %1356 = vadd.xlane.f32.xlu0 %v1355_v63  ;;  %v440_v5 = vor.u32 1.1754944e-38, %v439_v0  ;;  %vm438_vm13 = vcmp.eq.f32.partialorder %v437_v2, 8.507059e+37 }
 0x284   :  { %v3861_v58 = vpop.eup %3860  ;;  %1388 = vrot.lane.b32.xlu1 %v4322_v46, %s4002_s23 }
 0x285   :  { %v429_v24 = vmul.f32 %v3861_v58, %v424_v57  ;;  %v427_v60 = vpop.xlane.xlu0 %426  ;;  %vm434_vm10 = vweird.f32 %v3861_v58 }
 0x286   :  { %v582_v25 = vpop.xlane.xlu1 %581  ;;  %3862 = vrcp.f32 %v427_v60  ;;  %vm435_vm12 = vmor %vm433_vm11, %vm434_vm10  ;;  %v451_v15 = vand.u32 2147483647, %v427_v60  ;;  %v453_v49 = vand.u32 2147483648, %v427_v60  ;;  %vm447_vm2 = vweird.f32 %v427_v60 }
 0x287   :  { %v430_v62 = vsub.f32 1.0, %v429_v24  ;;  %3864 = vrcp.f32 %v582_v25  ;;  %v595_v21 = vand.u32 2147483647, %v582_v25  ;;  %v597_v23 = vand.u32 2147483648, %v582_v25 }
 0x288   :  { %v585_v38 = vpop.xlane.xlu2 %584  ;;  %vm591_vm3 = vweird.f32 %v582_v25  ;;  %v454_v28 = vor.u32 1.1754944e-38, %v453_v49  ;;  %vm452_vm7 = vcmp.eq.f32.partialorder %v451_v15, 8.507059e+37 }
 0x289   :  { %v431_v1 = vmul.f32 %v3861_v58, %v430_v62  ;;  %3866 = vrcp.f32 %v585_v38  ;;  %vm596_vm6 = vcmp.eq.f32.partialorder %v595_v21, 8.507059e+37  ;;  %v598_v29 = vor.u32 1.1754944e-38, %v597_v23 }
 0x28a   :  { %v611_v51 = vand.u32 2147483648, %v585_v38  ;;  %vm605_vm9 = vweird.f32 %v585_v38  ;;  %v609_v37 = vand.u32 2147483647, %v585_v38 }
 0x28b   :  { %v432_v3 = vadd.f32 %v3861_v58, %v431_v1 }
 0x28c   :  { %v3863_v4 = vpop.eup %3862  ;;  %v612_v44 = vor.u32 1.1754944e-38, %v611_v51  ;;  %vm610_vm11 = vcmp.eq.f32.partialorder %v609_v37, 8.507059e+37 }
 0x28d   :  { %v3865_v6 = vpop.eup %3864  ;;  %v436_v7 = vsel %vm435_vm12, %v3861_v58, %v432_v3  ;;  %v443_v9 = vmul.f32 %v3863_v4, %v427_v60  ;;  %vm448_vm14 = vweird.f32 %v3863_v4 }
 0x28e   :  { %v441_v10 = vsel %vm438_vm13, %v440_v5, %v436_v7  ;;  %v587_v11 = vmul.f32 %v3865_v6, %v582_v25  ;;  %vm592_vm15 = vweird.f32 %v3865_v6  ;;  %vm449_vm4 = vmor %vm447_vm2, %vm448_vm14 }
 0x28f   :  { %v3867_v12 = vpop.eup %3866  ;;  %v444_v56 = vsub.f32 1.0, %v443_v9  ;;  %v456_v13 = vmul.f32 %v4299_v8, %v441_v10  ;;  %vm593_vm5 = vmor %vm591_vm3, %vm592_vm15 }
 0x290   :  { %v588_v14 = vsub.f32 1.0, %v587_v11  ;;  %v601_v19 = vmul.f32 %v3867_v12, %v585_v38  ;;  %vm606_vm8 = vweird.f32 %v3867_v12 }
 0x291   :  { %v445_v40 = vmul.f32 %v3863_v4, %v444_v56  ;;  %3542 = vmatmul.msk.f32.vlgmr.msrb.gmra.mxu2 %vm259_vm1, %v456_v13  ;;  %vm607_vm10 = vmor %vm605_vm9, %vm606_vm8 }
 0x292   :  { %v589_v45 = vmul.f32 %v3865_v6, %v588_v14  ;;  %v602_v26 = vsub.f32 1.0, %v601_v19 }
 0x293   :  { %v446_v27 = vadd.f32 %v3863_v4, %v445_v40 }
 0x294   :  { %v590_v48 = vadd.f32 %v3865_v6, %v589_v45  ;;  %v603_v8 = vmul.f32 %v3867_v12, %v602_v26 }
 0x295   :  { %v450_v31 = vsel %vm449_vm4, %v3863_v4, %v446_v27  ;;  %v741_v34 = vpop.xlane.xlu2 %740 }
 0x296   :  { %v594_v53 = vsel %vm593_vm5, %v3865_v6, %v590_v48  ;;  %v455_v59 = vsel %vm452_vm7, %v454_v28, %v450_v31  ;;  %v604_v33 = vadd.f32 %v3867_v12, %v603_v8  ;;  %3868 = vrcp.f32 %v741_v34 }
 0x297   :  { %v599_v36 = vsel %vm596_vm6, %v598_v29, %v594_v53  ;;  %v457_v39 = vmul.f32 %v4303_v16, %v455_v59  ;;  %v767_v16 = vand.u32 2147483648, %v741_v34  ;;  %v765_v0 = vand.u32 2147483647, %v741_v34 }
 0x298   :  { %v614_v42 = vmul.f32 %v4305_v17, %v599_v36  ;;  %v608_v43 = vsel %vm607_vm10, %v3867_v12, %v604_v33  ;;  %vm761_vm13 = vweird.f32 %v741_v34  ;;  %v3746_v3 = vpop.permute.xlu0 %3745 }
 0x299   :  { %3543 = vmatmul.msk.f32.vlgmr.msrb.gmra.mxu3 %vm259_vm1, %v457_v39  ;;  %v613_v57 = vsel %vm610_vm11, %v612_v44, %v608_v43  ;;  %v768_v1 = vor.u32 1.1754944e-38, %v767_v16  ;;  %vm766_vm15 = vcmp.eq.f32.partialorder %v765_v0, 8.507059e+37  ;;  %v3748_v5 = vunpack.i.h.bf16 %v3746_v3 }
 0x29a   :  { %3548 = vmatmul.msk.f32.vlgmr.msra.gmra.mxu2 %vm259_vm1, %v614_v42  ;;  %v615_v62 = vmul.f32 %v4311_v20, %v613_v57  ;;  %v3747_v40 = vunpack.i.l.bf16 %v3746_v3 }
 0x29c   :  { %v3869_v61 = vpop.eup %3868 }
 0x29d   :  { %v757_v63 = vmul.f32 %v3869_v61, %v741_v34  ;;  %vm762_vm12 = vweird.f32 %v3869_v61 }
 0x29e   :  { %v3741_v58 = vpop.permute.xlu1 %3740  ;;  %vm763_vm14 = vmor %vm761_vm13, %vm762_vm12 }
 0x29f   :  { %v3743_v24 = vunpack.i.h.bf16 %v3741_v58  ;;  %v3742_v60 = vunpack.i.l.bf16 %v3741_v58  ;;  %v758_v25 = vsub.f32 1.0, %v757_v63 }
 0x2a1   :  { %793 = vmatpush.msrb.mxu2 %v3742_v60  ;;  %819 = vmatpush.msrb.mxu3 %v3743_v24  ;;  %v759_v17 = vmul.f32 %v3869_v61, %v758_v25 }
 0x2a2   :  { %3549 = vmatmul.msk.f32.vlgmr.msra.gmra.mxu3 %vm259_vm1, %v615_v62 }
 0x2a3   :  { %942 = vmatpush.msra.mxu2 %v4322_v46  ;;  %965 = vmatpush.msra.mxu3 %v4325_v47  ;;  %v760_v38 = vadd.f32 %v3869_v61, %v759_v17 }
 0x2a5   :  { %v764_v2 = vsel %vm763_vm14, %v3869_v61, %v760_v38 }
 0x2a6   :  { %v769_v20 = vsel %vm766_vm15, %v768_v1, %v764_v2 }
 0x2a7   :  { %v771_v4 = vmul.f32 %v4330_v54, %v769_v20 }
 0x2a9   :  { %v4414_v29 = vpop.xlane.xlu2 %1200 }
 0x2aa   :  { %3555 = vmatmul.msk.f32.vlgmr.msrb.gmra.mxu3 %vm259_vm1, %v771_v4 }
 0x2ab   :  { %1123 = vmatpush.msrb.mxu3 %v3748_v5 }
 0x2b1   :  { %v1259_v38 = vpop.permute.xlu2 %1258 }
 0x2c3   :  { %v738_v6 = vpop.xlane.xlu0 %737 }
 0x2c4   :  { %3870 = vrcp.f32 %v738_v6  ;;  %v753_v10 = vand.u32 2147483648, %v738_v6  ;;  %v751_v12 = vand.u32 2147483647, %v738_v6  ;;  %vm747_vm3 = vweird.f32 %v738_v6 }
 0x2c6   :  { %v754_v54 = vor.u32 1.1754944e-38, %v753_v10  ;;  %vm752_vm5 = vcmp.eq.f32.partialorder %v751_v12, 8.507059e+37 }
 0x2ca   :  { %v3871_v7 = vpop.eup %3870 }
 0x2cb   :  { %v743_v46 = vmul.f32 %v3871_v7, %v738_v6  ;;  %v890_v9 = vpop.xlane.xlu0 %889  ;;  %vm748_vm2 = vweird.f32 %v3871_v7 }
 0x2cc   :  { %3872 = vrcp.f32 %v890_v9  ;;  %vm749_vm4 = vmor %vm747_vm3, %vm748_vm2  ;;  %v905_v45 = vand.u32 2147483648, %v890_v9  ;;  %v903_v48 = vand.u32 2147483647, %v890_v9  ;;  %vm899_vm7 = vweird.f32 %v890_v9 }
 0x2cd   :  { %v744_v47 = vsub.f32 1.0, %v743_v46 }
 0x2ce   :  { %v906_v31 = vor.u32 1.1754944e-38, %v905_v45  ;;  %vm904_vm9 = vcmp.eq.f32.partialorder %v903_v48, 8.507059e+37 }
 0x2cf   :  { %v745_v11 = vmul.f32 %v3871_v7, %v744_v47 }
 0x2d1   :  { %v746_v56 = vadd.f32 %v3871_v7, %v745_v11 }
 0x2d2   :  { %v3873_v13 = vpop.eup %3872 }
 0x2d3   :  { %v750_v14 = vsel %vm749_vm4, %v3871_v7, %v746_v56  ;;  %v895_v15 = vmul.f32 %v3873_v13, %v890_v9  ;;  %v893_v49 = vpop.xlane.xlu0 %892  ;;  %vm900_vm6 = vweird.f32 %v3873_v13 }
 0x2d4   :  { %v755_v19 = vsel %vm752_vm5, %v754_v54, %v750_v14  ;;  %3874 = vrcp.f32 %v893_v49  ;;  %vm901_vm8 = vmor %vm899_vm7, %vm900_vm6  ;;  %v919_v37 = vand.u32 2147483648, %v893_v49  ;;  %v917_v42 = vand.u32 2147483647, %v893_v49 }
 0x2d5   :  { %v896_v21 = vsub.f32 1.0, %v895_v15  ;;  %v770_v23 = vmul.f32 %v4350_v18, %v755_v19  ;;  %vm913_vm11 = vweird.f32 %v893_v49 }
 0x2d6   :  { %v4410_v26 = vpop.xlane.xlu1 %1197  ;;  %v920_v57 = vor.u32 1.1754944e-38, %v919_v37  ;;  %vm918_vm13 = vcmp.eq.f32.partialorder %v917_v42, 8.507059e+37  ;;  %v1415_v42 = vpop.permute.xlu2 %1414 }
 0x2d7   :  { %v897_v27 = vmul.f32 %v3873_v13, %v896_v21  ;;  %3876 = vrcp.f32 %v4410_v26  ;;  %3554 = vmatmul.msk.f32.vlgmr.msrb.gmra.mxu2 %vm259_vm1, %v770_v23  ;;  %v1213_v47 = vand.u32 2147483648, %v4410_v26  ;;  %vm1207_vm5 = vweird.f32 %v4410_v26 }
 0x2d8   :  { %1096 = vmatpush.msrb.mxu2 %v3747_v40  ;;  %v1211_v11 = vand.u32 2147483647, %v4410_v26 }
 0x2d9   :  { %v898_v28 = vadd.f32 %v3873_v13, %v897_v27 }
 0x2da   :  { %v3875_v8 = vpop.eup %3874 }
 0x2db   :  { %v902_v18 = vsel %vm901_vm8, %v3873_v13, %v898_v28  ;;  %v909_v53 = vmul.f32 %v3875_v8, %v893_v49  ;;  %v1040_v59 = vpop.xlane.xlu0 %1039  ;;  %vm914_vm10 = vweird.f32 %v3875_v8  ;;  %vm1212_vm8 = vcmp.eq.f32.partialorder %v1211_v11, 8.507059e+37  ;;  %v1515_v11 = vld [vmem:[%s5285_s2 + $0x68] sm:$0xff] }
 0x2dc   :  { %v907_v33 = vsel %vm904_vm9, %v906_v31, %v902_v18  ;;  %3878 = vrcp.f32 %v1040_v59  ;;  %vm915_vm12 = vmor %vm913_vm11, %vm914_vm10  ;;  %v1055_v0 = vand.u32 2147483648, %v1040_v59  ;;  %v1053_v3 = vand.u32 2147483647, %v1040_v59 }
 0x2dd   :  { %v4416_v34 = vpop.eup %3876  ;;  %3880 = vrcp.f32 %v4414_v29  ;;  %v910_v36 = vsub.f32 1.0, %v909_v53  ;;  %v922_v51 = vmul.f32 %v4357_v22, %v907_v33  ;;  %vm1049_vm15 = vweird.f32 %v1040_v59 }
 0x2de   :  { %v1203_v43 = vmul.f32 %v4416_v34, %v4410_v26  ;;  %vm1208_vm2 = vweird.f32 %v4416_v34  ;;  %vm1054_vm4 = vcmp.eq.f32.partialorder %v1053_v3, 8.507059e+37  ;;  %v1227_v31 = vand.u32 2147483648, %v4414_v29 }
 0x2df   :  { %v911_v39 = vmul.f32 %v3875_v8, %v910_v36  ;;  %3560 = vmatmul.msk.f32.vlgmr.msra.gmra.mxu2 %vm259_vm1, %v922_v51  ;;  %vm4439_vm6 = vmor %vm1207_vm5, %vm1208_vm2  ;;  %v1225_v53 = vand.u32 2147483647, %v4414_v29  ;;  %v1509_v36 = vld [vmem:[%s5285_s2 + $0x38] sm:$0xff] }
 0x2e0   :  { %v1204_v24 = vsub.f32 1.0, %v1203_v43 }
 0x2e1   :  { %v912_v44 = vadd.f32 %v3875_v8, %v911_v39  ;;  %vm1226_vm2 = vcmp.eq.f32.partialorder %v1225_v53, 8.507059e+37  ;;  %v1511_v53 = vld [vmem:[%s5285_s2 + $0x48] sm:$0xff] }
 0x2e2   :  { %v3879_v61 = vpop.eup %3878  ;;  %v1205_v1 = vmul.f32 %v4416_v34, %v1204_v24 }
 0x2e3   :  { %v4423_v63 = vpop.eup %3880  ;;  %v916_v58 = vsel %vm915_vm12, %v3875_v8, %v912_v44  ;;  %v1045_v22 = vmul.f32 %v3879_v61, %v1040_v59  ;;  %v1043_v60 = vpop.xlane.xlu0 %1042  ;;  %vm1050_vm14 = vweird.f32 %v3879_v61 }
 0x2e4   :  { %v921_v25 = vsel %vm918_vm13, %v920_v57, %v916_v58  ;;  %3882 = vrcp.f32 %v1043_v60  ;;  %v1217_v17 = vmul.f32 %v4423_v63, %v4414_v29  ;;  %vm1051_vm3 = vmor %vm1049_vm15, %vm1050_vm14  ;;  %v1206_v6 = vadd.f32 %v4416_v34, %v1205_v1 }
 0x2e5   :  { %v1046_v62 = vsub.f32 1.0, %v1045_v22  ;;  %v923_v16 = vmul.f32 %v4365_v30, %v921_v25  ;;  %v1056_v30 = vor.u32 1.1754944e-38, %v1055_v0  ;;  %v1069_v14 = vand.u32 2147483648, %v1043_v60 }
 0x2e6   :  { %v1218_v5 = vsub.f32 1.0, %v1217_v17  ;;  %v1210_v49 = vsel %vm4439_vm6, %v4416_v34, %v1206_v6  ;;  %v1067_v21 = vand.u32 2147483647, %v1043_v60  ;;  %vm1063_vm9 = vweird.f32 %v1043_v60 }
 0x2e7   :  { %v1047_v2 = vmul.f32 %v3879_v61, %v1046_v62  ;;  %3561 = vmatmul.msk.f32.vlgmr.msra.gmra.mxu3 %vm259_vm1, %v923_v16  ;;  %vm1222_vm10 = vweird.f32 %v4423_v63  ;;  %v1070_v26 = vor.u32 1.1754944e-38, %v1069_v14  ;;  %vm1221_vm13 = vweird.f32 %v4414_v29 }
 0x2e8   :  { %1279 = vmatpush.msra.mxu3 %v1259_v38  ;;  %v1219_v13 = vmul.f32 %v4423_v63, %v1218_v5  ;;  %vm1068_vm12 = vcmp.eq.f32.partialorder %v1067_v21, 8.507059e+37  ;;  %vm4456_vm14 = vmor %vm1221_vm13, %vm1222_vm10  ;;  %v1512_v21 = vld [vmem:[%s5285_s2 + $0x50] sm:$0xff]  ;;  %vm1490_vm10 = vcmask 523264  }
 0x2e9   :  { %v1048_v20 = vadd.f32 %v3879_v61, %v1047_v2 }
 0x2ea   :  { %v3883_v4 = vpop.eup %3882  ;;  %v1220_v27 = vadd.f32 %v4423_v63, %v1219_v13  ;;  %v1530_v13 = vld [vmem:[%s5285_s2 + $0xe0] sm:$0xff] }
 0x2eb   :  { %v1052_v7 = vsel %vm1051_vm3, %v3879_v61, %v1048_v20  ;;  %v1059_v46 = vmul.f32 %v3883_v4, %v1043_v60  ;;  %v1354_v9 = vpop.xlane.xlu0 %1353  ;;  %vm1064_vm7 = vweird.f32 %v3883_v4 }
 0x2ec   :  { %v1057_v10 = vsel %vm1054_vm4, %v1056_v30, %v1052_v7  ;;  %3884 = vrcp.f32 %v1354_v9  ;;  %vm1065_vm11 = vmor %vm1063_vm9, %vm1064_vm7  ;;  %v1369_v51 = vand.u32 2147483648, %v1354_v9  ;;  %v1224_v39 = vsel %vm4456_vm14, %v4423_v63, %v1220_v27 }
 0x2ed   :  { %v1060_v12 = vsub.f32 1.0, %v1059_v46  ;;  %v1072_v56 = vmul.f32 %v4375_v35, %v1057_v10  ;;  %v1214_v35 = vor.u32 1.1754944e-38, %v1213_v47  ;;  %v1367_v29 = vand.u32 2147483647, %v1354_v9  ;;  %v1516_v47 = vld [vmem:[%s5285_s2 + $0x70] sm:$0xff] }
 0x2ee   :  { %v1233_v15 = vpop.permute.xlu1 %1232  ;;  %vm1363_vm3 = vweird.f32 %v1354_v9  ;;  %v1370_v57 = vor.u32 1.1754944e-38, %v1369_v51  ;;  %v1532_v10 = vld [vmem:[%s5285_s2 + $0xf0] sm:$0xff]  ;;  %v1525_v51 = vld [vmem:[%s5285_s2 + $0xb8] sm:$0xff] }
 0x2ef   :  { %v1061_v19 = vmul.f32 %v3883_v4, %v1060_v12  ;;  %3566 = vmatmul.msk.f32.vlgmr.msrb.gmra.mxu2 %vm259_vm1, %v1072_v56  ;;  %v1215_v45 = vsel %vm1212_vm8, %v1214_v35, %v1210_v49  ;;  %vm1368_vm5 = vcmp.eq.f32.partialorder %v1367_v29, 8.507059e+37  ;;  %v1531_v12 = vld [vmem:[%s5285_s2 + $0xe8] sm:$0xff]  ;;  %v1514_v56 = vld [vmem:[%s5285_s2 + $0x60] sm:$0xff]  ;;  %v1513_v49 = vld [vmem:[%s5285_s2 + $0x58] sm:$0xff] }
 0x2f0   :  { %1253 = vmatpush.msra.mxu2 %v1233_v15  ;;  %v1230_v34 = vmul.f32 %v4371_v32, %v1215_v45  ;;  %v1228_v32 = vor.u32 1.1754944e-38, %v1227_v31  ;;  %v1528_v35 = vld [vmem:[%s5285_s2 + $0xd0] sm:$0xff]  ;;  %v1506_v29 = vld [vmem:[%s5285_s2 + $0x20] sm:$0xff] }
 0x2f1   :  { %v1062_v23 = vadd.f32 %v3883_v4, %v1061_v19  ;;  %v1529_v19 = vld [vmem:[%s5285_s2 + $0xd8] sm:$0xff] }
 0x2f2   :  { %v3885_v40 = vpop.eup %3884  ;;  %v1229_v61 = vsel %vm1226_vm2, %v1228_v32, %v1224_v39  ;;  %v1524_v39 = vld [vmem:[%s5285_s2 + $0xb0] sm:$0xff]  ;;  %v1522_v32 = vld [vmem:[%s5285_s2 + $0xa0] sm:$0xff] }
 0x2f3   :  { %v1066_v48 = vsel %vm1065_vm11, %v3883_v4, %v1062_v23  ;;  %v1359_v28 = vmul.f32 %v3885_v40, %v1354_v9  ;;  %v1357_v8 = vpop.xlane.xlu0 %1356  ;;  %vm1364_vm15 = vweird.f32 %v3885_v40  ;;  %v1231_v60 = vmul.f32 %v4343_v55, %v1229_v61  ;;  %v4471_v55 = vpop.f32.mrf.mxu2  ;;  %v1517_v9 = vld [vmem:[%s5285_s2 + $0x78] sm:$0xff]  ;;  %v1504_v61 = vld [vmem:[%s5285_s2 + $0x10] sm:$0xff] }
 0x2f4   :  { %v1071_v18 = vsel %vm1068_vm12, %v1070_v26, %v1066_v48  ;;  %3886 = vrcp.f32 %v1357_v8  ;;  %vm1365_vm4 = vmor %vm1363_vm3, %vm1364_vm15  ;;  %v1383_v62 = vand.u32 2147483648, %v1357_v8  ;;  %v1381_v17 = vand.u32 2147483647, %v1357_v8  ;;  %1535 = vmatpush.msra.mxu0 %v1517_v9 }
 0x2f5   :  { %v1360_v59 = vsub.f32 1.0, %v1359_v28  ;;  %v1073_v33 = vmul.f32 %v4380_v41, %v1071_v18  ;;  %vm1377_vm7 = vweird.f32 %v1357_v8  ;;  %vm1493_vm11 = vcmask 785408  }
 0x2f6   :  { %v1389_v37 = vpop.permute.xlu1 %1388  ;;  %v1384_v38 = vor.u32 1.1754944e-38, %v1383_v62  ;;  %vm1382_vm9 = vcmp.eq.f32.partialorder %v1381_v17, 8.507059e+37  ;;  %1536 = vmatpush.msra.mxu0 %v1516_v47 }
 0x2f7   :  { %v1361_v43 = vmul.f32 %v3885_v40, %v1360_v59  ;;  %3567 = vmatmul.msk.f32.vlgmr.msrb.gmra.mxu3 %vm259_vm1, %v1073_v33  ;;  %3572 = vmatmul.msk.f32.vlgmr.msra.gmra.mxu2 %vm259_vm1, %v1230_v34  ;;  %v1527_v59 = vld [vmem:[%s5285_s2 + $0xc8] sm:$0xff]  ;;  %v1510_v33 = vld [vmem:[%s5285_s2 + $0x40] sm:$0xff] }
 0x2f8   :  { %1409 = vmatpush.msrb.mxu2 %v1389_v37  ;;  %1435 = vmatpush.msrb.mxu3 %v1415_v42  ;;  %v1526_v34 = vld [vmem:[%s5285_s2 + $0xc0] sm:$0xff]  ;;  %v1508_v37 = vld [vmem:[%s5285_s2 + $0x30] sm:$0xff]  ;;  %v1507_v42 = vld [vmem:[%s5285_s2 + $0x28] sm:$0xff] }
 0x2f9   :  { %v1362_v41 = vadd.f32 %v3885_v40, %v1361_v43  ;;  %1537 = vmatpush.msra.mxu0 %v1515_v11  ;;  %v1523_v43 = vld [vmem:[%s5285_s2 + $0xa8] sm:$0xff] }
 0x2fa   :  { %v3887_v44 = vpop.eup %3886 }
 0x2fb   :  { %v1366_v58 = vsel %vm1365_vm4, %v3885_v40, %v1362_v41  ;;  %v1373_v63 = vmul.f32 %v3887_v44, %v1357_v8  ;;  %vm1378_vm6 = vweird.f32 %v3887_v44  ;;  %1538 = vmatpush.msra.mxu0 %v1514_v56  ;;  %v1505_v41 = vld [vmem:[%s5285_s2 + $0x18] sm:$0xff] }
 0x2fc   :  { %v1371_v24 = vsel %vm1368_vm5, %v1370_v57, %v1366_v58  ;;  %vm1379_vm8 = vmor %vm1377_vm7, %vm1378_vm6  ;;  %v1520_v57 = vld [vmem:[%s5285_s2 + $0x90] sm:$0xff]  ;;  %v1503_v58 = vld [vmem:[%s5285_s2 + $0x8] sm:$0xff] }
 0x2fd   :  { %v1374_v22 = vsub.f32 1.0, %v1373_v63  ;;  %v1386_v25 = vmul.f32 %v4385_v50, %v1371_v24  ;;  %v4473_v50 = vpop.f32.mrf.mxu3  ;;  %1539 = vmatpush.msra.mxu0 %v1513_v49  ;;  %v1519_v63 = vld [vmem:[%s5285_s2 + $0x88] sm:$0xff]  ;;  %v1502_v24 = vld [vmem:[%s5285_s2] sm:$0xff] }
 0x2ff   :  { %v1375_v16 = vmul.f32 %v3887_v44, %v1374_v22  ;;  %3573 = vmatmul.msk.f32.vlgmr.msra.gmra.mxu3 %vm259_vm1, %v1231_v60  ;;  %3578 = vmatmul.msk.f32.vlgmr.msrb.gmra.mxu2 %vm259_vm1, %v1386_v25  ;;  %v1518_v22 = vld [vmem:[%s5285_s2 + $0x80] sm:$0xff] }
 0x300   :  { %1540 = vmatpush.msra.mxu0 %v1512_v21 }
 0x301   :  { %v1376_v0 = vadd.f32 %v3887_v44, %v1375_v16 }
 0x302   :  { %1541 = vmatpush.msra.mxu0 %v1511_v53 }
 0x303   :  { %v1380_v1 = vsel %vm1379_vm8, %v3887_v44, %v1376_v0  ;;  %v1521_v44 = vld [vmem:[%s5285_s2 + $0x98] sm:$0xff] }
 0x304   :  { %v1385_v2 = vsel %vm1382_vm9, %v1384_v38, %v1380_v1  ;;  %1542 = vmatpush.msra.mxu0 %v1510_v33  ;;  %v4003_v33 = vmov 32.0  }
 0x305   :  { %v1387_v3 = vmul.f32 %v4389_v52, %v1385_v2  ;;  %v1533_v52 = vld [vmem:[%s5285_s2 + $0xf8] sm:$0xff]  ;;  %3888 = vrcp.f32 %v4003_v33 }
 0x306   :  { %1558 = vmatpush.msra.mxu1 %v1533_v52  ;;  %1543 = vmatpush.msra.mxu0 %v1509_v36 }
 0x307   :  { %3579 = vmatmul.msk.f32.vlgmr.msrb.gmra.mxu3 %vm259_vm1, %v1387_v3 }
 0x308   :  { %1559 = vmatpush.msra.mxu1 %v1532_v10  ;;  %1544 = vmatpush.msra.mxu0 %v1508_v37 }
 0x30a   :  { %1560 = vmatpush.msra.mxu1 %v1531_v12  ;;  %1545 = vmatpush.msra.mxu0 %v1507_v42 }
 0x30c   :  { %1561 = vmatpush.msra.mxu1 %v1530_v13  ;;  %1546 = vmatpush.msra.mxu0 %v1506_v29 }
 0x30e   :  { %1562 = vmatpush.msra.mxu1 %v1529_v19  ;;  %1547 = vmatpush.msra.mxu0 %v1505_v41 }
 0x310   :  { %1563 = vmatpush.msra.mxu1 %v1528_v35  ;;  %1548 = vmatpush.msra.mxu0 %v1504_v61 }
 0x312   :  { %1564 = vmatpush.msra.mxu1 %v1527_v59  ;;  %1549 = vmatpush.msra.mxu0 %v1503_v58 }
 0x314   :  { %v482_v20 = vpop.f32.mrf.mxu2  ;;  %1565 = vmatpush.msra.mxu1 %v1526_v34  ;;  %1550 = vmatpush.msra.mxu0 %v1502_v24  ;;  %v3889_v34 = vpop.eup %3888 }
 0x315   :  { %v1590_v36 = vmul.f32 32.0, %v3889_v34  ;;  %vm1594_vm12 = vweird.f32 %v3889_v34 }
 0x316   :  { %1566 = vmatpush.msra.mxu1 %v1525_v51 }
 0x317   :  { %v1591_v51 = vsub.f32 1.0, %v1590_v36 }
 0x318   :  { %1567 = vmatpush.msra.mxu1 %v1524_v39 }
 0x319   :  { %v1592_v37 = vmul.f32 %v3889_v34, %v1591_v51 }
 0x31a   :  { %1568 = vmatpush.msra.mxu1 %v1523_v43 }
 0x31b   :  { %v1593_v39 = vadd.f32 %v3889_v34, %v1592_v37 }
 0x31c   :  { %v509_v4 = vpop.f32.mrf.mxu3  ;;  %1569 = vmatpush.msra.mxu1 %v1522_v32 }
 0x31d   :  { %v639_v5 = vpop.f32.mrf.mxu2  ;;  %v4611_v42 = vsel %vm1594_vm12, %v3889_v34, %v1593_v39 }
 0x31e   :  { %1570 = vmatpush.msra.mxu1 %v1521_v44 }
 0x320   :  { %1571 = vmatpush.msra.mxu1 %v1520_v57 }
 0x322   :  { %1572 = vmatpush.msra.mxu1 %v1519_v63 }
 0x324   :  { %1573 = vmatpush.msra.mxu1 %v1518_v22  ;;  %v1643_v22 = vld [vmem:[%s5286_s3 + $0x18] sm:$0xff] }
 0x325   :  { %v665_v30 = vpop.f32.mrf.mxu3  ;;  %1663 = vmatpush.msra.mxu2 %v1643_v22 }
 0x32d   :  { %v821_v7 = vpop.f32.mrf.mxu3 }
 0x35a   :  { %v795_v6 = vpop.f32.mrf.mxu2 }
 0x362   :  { %v4475_v46 = vpop.f32.mrf.mxu2 }
 0x36a   :  { %v4501_v54 = vpop.f32.mrf.mxu3 }
 0x372   :  { %v1098_v14 = vpop.f32.mrf.mxu2 }
 0x373   :  { %v3749_v15 = vpack.i.bf16 %v1098_v14, %v482_v20 }
 0x375   :  { %3750 = vrot.lane.b32.xlu1 %v3749_v15, %s4002_s23 }
 0x37a   :  { %v1125_v23 = vpop.f32.mrf.mxu3  ;;  %v1255_v40 = vpop.f32.mrf.mxu2 }
 0x37b   :  { %v3759_v45 = vpack.i.bf16 %v1125_v23, %v509_v4  ;;  %v3754_v26 = vpack.i.bf16 %v1255_v40, %v639_v5 }
 0x37d   :  { %3760 = vrot.lane.b32.xlu1 %v3759_v45, %s4002_s23  ;;  %3755 = vrot.lane.b32.xlu0 %v3754_v26, %s4000_s21  ;;  %v3971_v45 = vld [vmem:[%s5283_s0] sm:$0xff] }
 0x382   :  { %v1281_v27 = vpop.f32.mrf.mxu3  ;;  %v1411_v48 = vpop.f32.mrf.mxu2 }
 0x383   :  { %v3764_v28 = vpack.i.bf16 %v1411_v48, %v795_v6  ;;  %v3769_v31 = vpack.i.bf16 %v1281_v27, %v665_v30 }
 0x385   :  { %3765 = vrot.lane.b32.xlu2 %v3764_v28, %s4001_s22 }
 0x38a   :  { %v1437_v8 = vpop.f32.mrf.mxu3 }
 0x38b   :  { %v3774_v18 = vpack.i.bf16 %v1437_v8, %v821_v7 }
 0x38d   :  { %3775 = vrot.lane.b32.xlu1 %v3774_v18, %s4001_s22  ;;  %3770 = vrot.lane.b32.xlu2 %v3769_v31, %s4000_s21  ;;  %v3972_v18 = vld [vmem:[%s5283_s0 + $0x8] sm:$0xff] }
 0x3df   :  { %v3766_v16 = vpop.permute.xlu2 %3765 }
 0x3e0   :  { %v3768_v1 = vunpack.i.h.bf16 %v3766_v16  ;;  %v3767_v2 = vunpack.i.l.bf16 %v3766_v16 }
 0x3e7   :  { %v3751_v60 = vpop.permute.xlu1 %3750  ;;  %v3771_v47 = vpop.permute.xlu2 %3770 }
 0x3e8   :  { %v3753_v25 = vunpack.i.h.bf16 %v3751_v60  ;;  %v3752_v62 = vunpack.i.l.bf16 %v3751_v60  ;;  %v3773_v10 = vunpack.i.h.bf16 %v3771_v47  ;;  %v3772_v11 = vunpack.i.l.bf16 %v3771_v47  ;;  %v1642_v60 = vld [vmem:[%s5286_s3 + $0x10] sm:$0xff]  ;;  %v1679_v47 = vld [vmem:[%s5287_s4 + $0x18] sm:$0xff] }
 0x3e9   :  { %1664 = vmatpush.msra.mxu2 %v1642_v60 }
 0x3ea   :  { %v1496_v3 = vsel %vm62_vm0, %v4475_v46, %v3753_v25  ;;  %v1488_v20 = vsel %vm62_vm0, %v4471_v55, %v3752_v62  ;;  %v1641_v25 = vld [vmem:[%s5286_s3 + $0x8] sm:$0xff]  ;;  %v1640_v62 = vld [vmem:[%s5286_s3] sm:$0xff] }
 0x3eb   :  { %1665 = vmatpush.msra.mxu2 %v1641_v25 }
 0x3ed   :  { %1666 = vmatpush.msra.mxu2 %v1640_v62 }
 0x3ef   :  { %v3756_v17 = vpop.permute.xlu0 %3755  ;;  %v3761_v7 = vpop.permute.xlu1 %3760 }
 0x3f0   :  { %v3758_v0 = vunpack.i.h.bf16 %v3756_v17  ;;  %v3757_v38 = vunpack.i.l.bf16 %v3756_v17  ;;  %v3763_v9 = vunpack.i.h.bf16 %v3761_v7  ;;  %v3762_v52 = vunpack.i.l.bf16 %v3761_v7  ;;  %v1680_v7 = vld [vmem:[%s5287_s4 + $0x20] sm:$0xff] }
 0x3f2   :  { %v1491_v4 = vsel %vm1490_vm10, %v1488_v20, %v3757_v38  ;;  %v1498_v5 = vsel %vm1490_vm10, %v1496_v3, %v3758_v0  ;;  %v1489_v46 = vsel %vm62_vm0, %v4473_v50, %v3762_v52  ;;  %v1497_v55 = vsel %vm62_vm0, %v4501_v54, %v3763_v9  ;;  %v4600_v50 = vld [vmem:[%s5288_s5] sm:$0xff]  ;;  %v1682_v3 = vld [vmem:[%s5287_s4 + $0x30] sm:$0xff] }
 0x3f3   :  { %v1494_v30 = vsel %vm1493_vm11, %v1491_v4, %v3767_v2  ;;  %v1500_v6 = vsel %vm1493_vm11, %v1498_v5, %v3768_v1  ;;  %v1492_v14 = vsel %vm1490_vm10, %v1489_v46, %v3772_v11  ;;  %v1499_v15 = vsel %vm1490_vm10, %v1497_v55, %v3773_v10  ;;  %v1683_v2 = vld [vmem:[%s5287_s4 + $0x38] sm:$0xff]  ;;  %v1681_v4 = vld [vmem:[%s5287_s4 + $0x28] sm:$0xff] }
 0x3f4   :  { %1551 = vmatmul.f32.vlgmr.msra.gmra.mxu0 %v1494_v30  ;;  %1574 = vmatmul.f32.vlgmr.msra.gmra.mxu1 %v1500_v6  ;;  %v1534_v54 = vperm.slane %v4600_v50, 0  ;;  %v1634_v55 = vperm.slane %v4600_v50, 1  ;;  %v1684_v34 = vperm.slane %v4600_v50, 4 }
 0x3f5   :  { %1699 = vmatpush.msra.mxu3 %v1683_v2  ;;  %v3603_v2 = vld [vmem:[%s5284_s1 + $0x128] sm:$0xff] }
 0x3f7   :  { %1700 = vmatpush.msra.mxu3 %v1682_v3  ;;  %v3605_v3 = vld [vmem:[%s5284_s1 + $0x138] sm:$0xff] }
 0x3f9   :  { %1701 = vmatpush.msra.mxu3 %v1681_v4  ;;  %v3596_v4 = vld [vmem:[%s5284_s1 + $0xf0] sm:$0xff] }
 0x3fb   :  { %1702 = vmatpush.msra.mxu3 %v1680_v7  ;;  %v3590_v7 = vld [vmem:[%s5284_s1 + $0xc0] sm:$0xff] }
 0x3fd   :  { %1703 = vmatpush.msra.mxu3 %v1679_v47  ;;  %v3594_v47 = vld [vmem:[%s5284_s1 + $0xe0] sm:$0xff] }
 0x3ff   :  { %v3776_v12 = vpop.permute.xlu1 %3775 }
 0x400   :  { %v3778_v56 = vunpack.i.h.bf16 %v3776_v12  ;;  %v3777_v13 = vunpack.i.l.bf16 %v3776_v12  ;;  %v1637_v12 = vperm.slane %v4600_v50, 2 }
 0x402   :  { %v1495_v49 = vsel %vm1493_vm11, %v1492_v14, %v3777_v13  ;;  %v1501_v19 = vsel %vm1493_vm11, %v1499_v15, %v3778_v56 }
 0x403   :  { %1554 = vmatmul.f32.gmra.mxu0 %v1495_v49  ;;  %1577 = vmatmul.f32.gmra.mxu1 %v1501_v19 }
 0x471   :  { %v1552_v21 = vpop.f32.mrf.mxu0  ;;  %v1575_v23 = vpop.f32.mrf.mxu1 }
 0x472   :  { %v1553_v35 = vadd.f32 %v1552_v21, %v1534_v54 }
 0x474   :  { %v1576_v40 = vadd.f32 %v1575_v23, %v1553_v35 }
 0x476   :  { %v1581_v26 = vadd.f32 %v3971_v45, %v1576_v40 }
 0x478   :  { %v1583_v27 = vsel %vm62_vm0, %v1581_v26, 0.0 }
 0x479   :  { %1584 = vadd.xlane.f32.xlu2 %v1583_v27  ;;  %v1677_v27 = vld [vmem:[%s5287_s4 + $0x8] sm:$0xff] }
 0x480   :  { %v1555_v48 = vpop.f32.mrf.mxu0  ;;  %v1578_v8 = vpop.f32.mrf.mxu1 }
 0x481   :  { %v1556_v28 = vadd.f32 %v1555_v48, %v1534_v54  ;;  %v1676_v48 = vld [vmem:[%s5287_s4] sm:$0xff] }
 0x483   :  { %v1579_v31 = vadd.f32 %v1578_v8, %v1556_v28  ;;  %v1644_v28 = vperm.slane %v4600_v50, 3 }
 0x485   :  { %v1582_v53 = vadd.f32 %v3972_v18, %v1579_v31 }
 0x487   :  { %v1586_v59 = vsel %vm62_vm0, %v1582_v53, 0.0 }
 0x488   :  { %1587 = vadd.xlane.f32.xlu0 %v1586_v59 }
 0x4ec   :  { %v1585_v43 = vpop.xlane.xlu2 %1584 }
 0x4ed   :  { %v1596_v29 = vmul.f32 %v4611_v42, %v1585_v43 }
 0x4ef   :  { %v1598_v32 = vsub.f32 %v1581_v26, %v1596_v29  ;;  %v1678_v26 = vld [vmem:[%s5287_s4 + $0x10] sm:$0xff] }
 0x4f0   :  { %1704 = vmatpush.msra.mxu3 %v1678_v26 }
 0x4f1   :  { %v1600_v41 = vmul.f32 %v1598_v32, %v1598_v32 }
 0x4f2   :  { %1705 = vmatpush.msra.mxu3 %v1677_v27 }
 0x4f3   :  { %v1602_v44 = vsel %vm62_vm0, %v1600_v41, 0.0 }
 0x4f4   :  { %1603 = vadd.xlane.f32.xlu1 %v1602_v44  ;;  %1706 = vmatpush.msra.mxu3 %v1676_v48 }
 0x4fb   :  { %v1588_v61 = vpop.xlane.xlu0 %1587 }
 0x4fc   :  { %v1597_v57 = vmul.f32 %v4611_v42, %v1588_v61 }
 0x4fe   :  { %v1599_v58 = vsub.f32 %v1582_v53, %v1597_v57 }
 0x500   :  { %v1601_v63 = vmul.f32 %v1599_v58, %v1599_v58 }
 0x502   :  { %v1605_v24 = vsel %vm62_vm0, %v1601_v63, 0.0 }
 0x503   :  { %1606 = vadd.xlane.f32.xlu2 %v1605_v24 }
 0x567   :  { %v1604_v16 = vpop.xlane.xlu1 %1603 }
 0x568   :  { %v1608_v17 = vmul.f32 %v1604_v16, %v4611_v42  ;;  %v3608_v16 = vld [vmem:[%s5284_s1 + $0x150] sm:$0xff] }
 0x569   :  { %1822 = vmatpush.msrb.mxu2 %v3608_v16 }
 0x56a   :  { %v1610_v0 = vadd.f32 1e-05, %v1608_v17  ;;  %v3609_v17 = vld [vmem:[%s5284_s1 + $0x158] sm:$0xff] }
 0x56b   :  { %1845 = vmatpush.msrb.mxu3 %v3609_v17 }
 0x56c   :  { %3890 = vrsqrt.f32 %v1610_v0  ;;  %vm1618_vm14 = vweird.f32 %v1610_v0 }
 0x56d   :  { %1846 = vmatpush.msrb.mxu3 %v3603_v2 }
 0x572   :  { %v3891_v38 = vpop.eup %3890 }
 0x573   :  { %v1613_v1 = vmul.f32 %v3891_v38, %v1610_v0  ;;  %vm1619_vm13 = vweird.f32 %v3891_v38  ;;  %v3611_v0 = vld [vmem:[%s5284_s1 + $0x168] sm:$0xff] }
 0x574   :  { %vm1620_vm15 = vmor %vm1618_vm14, %vm1619_vm13  ;;  %1891 = vmatpush.msrb.mxu0 %v3611_v0  ;;  %v3586_v0 = vld [vmem:[%s5288_s5 + $0x40] sm:$0xff] }
 0x575   :  { %v1614_v20 = vmul.f32 %v3891_v38, %v1613_v1  ;;  %v3602_v1 = vld [vmem:[%s5284_s1 + $0x120] sm:$0xff] }
 0x576   :  { %v1607_v5 = vpop.xlane.xlu2 %1606  ;;  %1823 = vmatpush.msrb.mxu2 %v3602_v1  ;;  %1892 = vmatpush.msrb.mxu0 %v3605_v3 }
 0x577   :  { %v1615_v30 = vmul.f32 0.5, %v1614_v20  ;;  %v1609_v6 = vmul.f32 %v1607_v5, %v4611_v42  ;;  %v3606_v20 = vld [vmem:[%s5284_s1 + $0x140] sm:$0xff]  ;;  %v3597_v5 = vld [vmem:[%s5284_s1 + $0xf8] sm:$0xff] }
 0x578   :  { %1824 = vmatpush.msrb.mxu2 %v3596_v4  ;;  %1847 = vmatpush.msrb.mxu3 %v3597_v5 }
 0x579   :  { %v1616_v9 = vsub.f32 1.5, %v1615_v30  ;;  %v1611_v52 = vadd.f32 1e-05, %v1609_v6  ;;  %v3599_v30 = vld [vmem:[%s5284_s1 + $0x108] sm:$0xff]  ;;  %v3600_v6 = vld [vmem:[%s5284_s1 + $0x110] sm:$0xff] }
 0x57a   :  { %1893 = vmatpush.msrb.mxu0 %v3599_v30  ;;  %1825 = vmatpush.msrb.mxu2 %v3590_v7 }
 0x57b   :  { %v1617_v46 = vmul.f32 %v3891_v38, %v1616_v9  ;;  %3892 = vrsqrt.f32 %v1611_v52  ;;  %vm1628_vm3 = vweird.f32 %v1611_v52  ;;  %v3591_v9 = vld [vmem:[%s5284_s1 + $0xc8] sm:$0xff] }
 0x57c   :  { %1848 = vmatpush.msrb.mxu3 %v3591_v9  ;;  %v3585_v9 = vld [vmem:[%s5288_s5 + $0x38] sm:$0xff] }
 0x57d   :  { %v1621_v10 = vsel %vm1620_vm15, %v3891_v38, %v1617_v46  ;;  %v3612_v38 = vld [vmem:[%s5284_s1 + $0x170] sm:$0xff] }
 0x57e   :  { %v1632_v11 = vmul.f32 %v1621_v10, %v1598_v32  ;;  %1914 = vmatpush.msrb.mxu1 %v3612_v38  ;;  %v1800_v38 = vperm.slane %v3586_v0, 7 }
 0x580   :  { %v1635_v56 = vmul.f32 %v1634_v55, %v1632_v11  ;;  %1915 = vmatpush.msrb.mxu1 %v3606_v20  ;;  %v3587_v20 = vld [vmem:[%s5288_s5 + $0x48] sm:$0xff] }
 0x581   :  { %v3893_v13 = vpop.eup %3892  ;;  %v1801_v5 = vperm.slane %v3587_v20, 7 }
 0x582   :  { %v1623_v14 = vmul.f32 %v3893_v13, %v1611_v52  ;;  %v1638_v15 = vadd.f32 %v1637_v12, %v1635_v56  ;;  %vm1629_vm2 = vweird.f32 %v3893_v13  ;;  %1916 = vmatpush.msrb.mxu1 %v3600_v6  ;;  %v3593_v52 = vld [vmem:[%s5284_s1 + $0xd8] sm:$0xff]  ;;  %v3610_v56 = vld [vmem:[%s5284_s1 + $0x160] sm:$0xff] }
 0x583   :  { %vm1630_vm4 = vmor %vm1628_vm3, %vm1629_vm2  ;;  %1894 = vmatpush.msrb.mxu0 %v3593_v52  ;;  %v1799_v52 = vperm.slane %v3585_v9, 7 }
 0x584   :  { %v1624_v49 = vmul.f32 %v3893_v13, %v1623_v14  ;;  %3580 = vmatmul.msk.f32.vlgmr.msra.gmra.mxu2 %vm62_vm0, %v1638_v15  ;;  %1917 = vmatpush.msrb.mxu1 %v3594_v47 }
 0x585   :  { %1868 = vmatpush.msra.mxu2 %v3610_v56 }
 0x586   :  { %v1625_v19 = vmul.f32 0.5, %v1624_v49  ;;  %v3607_v49 = vld [vmem:[%s5284_s1 + $0x148] sm:$0xff] }
 0x588   :  { %v1626_v54 = vsub.f32 1.5, %v1625_v19 }
 0x58a   :  { %v1627_v21 = vmul.f32 %v3893_v13, %v1626_v54  ;;  %v3598_v54 = vld [vmem:[%s5284_s1 + $0x100] sm:$0xff] }
 0x58c   :  { %v1631_v35 = vsel %vm1630_vm4, %v3893_v13, %v1627_v21  ;;  %v3613_v13 = vld [vmem:[%s5284_s1 + $0x178] sm:$0xff] }
 0x58d   :  { %v1633_v23 = vmul.f32 %v1631_v35, %v1599_v58  ;;  %v3601_v21 = vld [vmem:[%s5284_s1 + $0x118] sm:$0xff] }
 0x58f   :  { %v1636_v40 = vmul.f32 %v1634_v55, %v1633_v23 }
 0x591   :  { %v1639_v45 = vadd.f32 %v1637_v12, %v1636_v40  ;;  %v3592_v40 = vld [vmem:[%s5284_s1 + $0xd0] sm:$0xff] }
 0x593   :  { %3581 = vmatmul.msk.f32.gmra.mxu2 %vm62_vm0, %v1639_v45 }
 0x607   :  { %v1668_v8 = vpop.f32.mrf.mxu2 }
 0x608   :  { %v1669_v31 = vadd.f32 %v1668_v8, %v1644_v28 }
 0x60a   :  { %v1674_v18 = vmax.f32 %v1669_v31, 0.0  ;;  %v1763_v31 = vperm.slane %v4600_v50, 6 }
 0x60c   :  { %3582 = vmatmul.msk.f32.vlgmr.msra.gmra.mxu3 %vm1490_vm10, %v1674_v18 }
 0x60d   :  { %1937 = vmatpush.msra.mxu3 %v3613_v13 }
 0x60f   :  { %1938 = vmatpush.msra.mxu3 %v3607_v49 }
 0x611   :  { %1939 = vmatpush.msra.mxu3 %v3601_v21 }
 0x616   :  { %v1671_v53 = vpop.f32.mrf.mxu2 }
 0x617   :  { %v1672_v59 = vadd.f32 %v1671_v53, %v1644_v28  ;;  %v1760_v28 = vperm.slane %v4600_v50, 5 }
 0x619   :  { %v1675_v33 = vmax.f32 %v1672_v59, 0.0 }
 0x61b   :  { %3583 = vmatmul.msk.f32.gmra.mxu3 %vm1490_vm10, %v1675_v33 }
 0x68f   :  { %v1708_v36 = vpop.f32.mrf.mxu3 }
 0x690   :  { %v1709_v51 = vadd.f32 %v1708_v36, %v1684_v34 }
 0x692   :  { %v1714_v37 = vadd.f32 %v1709_v51, %v1638_v15  ;;  %v3604_v15 = vld [vmem:[%s5284_s1 + $0x130] sm:$0xff] }
 0x693   :  { %1869 = vmatpush.msra.mxu2 %v3604_v15 }
 0x694   :  { %v1716_v39 = vsel %vm62_vm0, %v1714_v37, 0.0 }
 0x695   :  { %1717 = vadd.xlane.f32.xlu0 %v1716_v39  ;;  %1870 = vmatpush.msra.mxu2 %v3598_v54 }
 0x697   :  { %1871 = vmatpush.msra.mxu2 %v3592_v40 }
 0x69e   :  { %v1711_v43 = vpop.f32.mrf.mxu3 }
 0x69f   :  { %v1712_v29 = vadd.f32 %v1711_v43, %v1684_v34 }
 0x6a1   :  { %v1715_v32 = vadd.f32 %v1712_v29, %v1639_v45  ;;  %v3595_v45 = vld [vmem:[%s5284_s1 + $0xe8] sm:$0xff] }
 0x6a2   :  { %1940 = vmatpush.msra.mxu3 %v3595_v45 }
 0x6a3   :  { %v1719_v41 = vsel %vm62_vm0, %v1715_v32, 0.0 }
 0x6a4   :  { %1720 = vadd.xlane.f32.xlu1 %v1719_v41  ;;  %v3588_v41 = vld [vmem:[%s5288_s5 + $0x50] sm:$0xff] }
 0x708   :  { %v1718_v44 = vpop.xlane.xlu0 %1717 }
 0x709   :  { %v1722_v61 = vmul.f32 %v1718_v44, %v4611_v42  ;;  %v1802_v44 = vperm.slane %v3588_v41, 7 }
 0x70b   :  { %v4666_v57 = vsub.f32 %v1714_v37, %v1722_v61  ;;  %v3584_v61 = vld [vmem:[%s5288_s5 + $0x30] sm:$0xff] }
 0x70d   :  { %v1726_v58 = vmul.f32 %v4666_v57, %v4666_v57 }
 0x70f   :  { %v1728_v63 = vsel %vm62_vm0, %v1726_v58, 0.0 }
 0x710   :  { %1729 = vadd.xlane.f32.xlu2 %v1728_v63  ;;  %v1798_v63 = vperm.slane %v3584_v61, 7 }
 0x717   :  { %v1721_v24 = vpop.xlane.xlu1 %1720 }
 0x718   :  { %v1723_v22 = vmul.f32 %v1721_v24, %v4611_v42 }
 0x71a   :  { %v4672_v60 = vsub.f32 %v1715_v32, %v1723_v22 }
 0x71c   :  { %v1727_v25 = vmul.f32 %v4672_v60, %v4672_v60 }
 0x71e   :  { %v1731_v62 = vsel %vm62_vm0, %v1727_v25, 0.0 }
 0x71f   :  { %1732 = vadd.xlane.f32.xlu0 %v1731_v62 }
 0x783   :  { %v1730_v46 = vpop.xlane.xlu2 %1729 }
 0x784   :  { %v1734_v55 = vmul.f32 %v1730_v46, %v4611_v42 }
 0x786   :  { %v1736_v10 = vadd.f32 1e-05, %v1734_v55 }
 0x788   :  { %3894 = vrsqrt.f32 %v1736_v10  ;;  %vm1744_vm6 = vweird.f32 %v1736_v10 }
 0x78e   :  { %v3895_v11 = vpop.eup %3894 }
 0x78f   :  { %v1739_v12 = vmul.f32 %v3895_v11, %v1736_v10  ;;  %vm1745_vm5 = vweird.f32 %v3895_v11 }
 0x790   :  { %vm1746_vm7 = vmor %vm1744_vm6, %vm1745_vm5 }
 0x791   :  { %v1740_v14 = vmul.f32 %v3895_v11, %v1739_v12 }
 0x792   :  { %v1733_v19 = vpop.xlane.xlu0 %1732 }
 0x793   :  { %v1741_v35 = vmul.f32 0.5, %v1740_v14  ;;  %v1735_v23 = vmul.f32 %v1733_v19, %v4611_v42 }
 0x795   :  { %v1742_v26 = vsub.f32 1.5, %v1741_v35  ;;  %v1737_v27 = vadd.f32 1e-05, %v1735_v23 }
 0x797   :  { %v1743_v48 = vmul.f32 %v3895_v11, %v1742_v26  ;;  %3896 = vrsqrt.f32 %v1737_v27  ;;  %vm1754_vm9 = vweird.f32 %v1737_v27 }
 0x799   :  { %v1747_v8 = vsel %vm1746_vm7, %v3895_v11, %v1743_v48 }
 0x79a   :  { %v1758_v18 = vmul.f32 %v1747_v8, %v4666_v57 }
 0x79c   :  { %v1761_v53 = vmul.f32 %v1760_v28, %v1758_v18 }
 0x79d   :  { %v3897_v59 = vpop.eup %3896 }
 0x79e   :  { %v4754_v33 = vadd.f32 %v1763_v31, %v1761_v53  ;;  %v1749_v34 = vmul.f32 %v3897_v59, %v1737_v27  ;;  %vm1755_vm8 = vweird.f32 %v3897_v59 }
 0x79f   :  { %vm1756_vm12 = vmor %vm1754_vm9, %vm1755_vm8 }
 0x7a0   :  { %v1750_v36 = vmul.f32 %v3897_v59, %v1749_v34  ;;  %3614 = vmatmul.msk.f32.vlgmr.msrb.gmra.mxu2 %vm62_vm0, %v4754_v33  ;;  %3616 = vmatmul.msk.f32.vlgmr.msrb.gmra.mxu3 %vm62_vm0, %v4754_v33 }
 0x7a1   :  { %3620 = vmatmul.msk.f32.vlgmr.msrb.gmra.mxu0 %vm62_vm0, %v4754_v33  ;;  %3622 = vmatmul.msk.f32.vlgmr.msrb.gmra.mxu1 %vm62_vm0, %v4754_v33 }
 0x7a2   :  { %v1751_v50 = vmul.f32 0.5, %v1750_v36 }
 0x7a4   :  { %v1752_v51 = vsub.f32 1.5, %v1751_v50 }
 0x7a6   :  { %v1753_v37 = vmul.f32 %v3897_v59, %v1752_v51 }
 0x7a8   :  { %v1757_v39 = vsel %vm1756_vm12, %v3897_v59, %v1753_v37 }
 0x7a9   :  { %v1759_v43 = vmul.f32 %v1757_v39, %v4672_v60 }
 0x7ab   :  { %v1762_v29 = vmul.f32 %v1760_v28, %v1759_v43 }
 0x7ad   :  { %v4765_v32 = vadd.f32 %v1763_v31, %v1762_v29 }
 0x7af   :  { %3615 = vmatmul.msk.f32.gmra.mxu2 %vm62_vm0, %v4765_v32  ;;  %3617 = vmatmul.msk.f32.gmra.mxu3 %vm62_vm0, %v4765_v32 }
 0x7b0   :  { %3621 = vmatmul.msk.f32.gmra.mxu0 %vm62_vm0, %v4765_v32  ;;  %3623 = vmatmul.msk.f32.gmra.mxu1 %vm62_vm0, %v4765_v32 }
 0x7b7   :  { %3618 = vmatmul.msk.f32.vlgmr.msra.gmra.mxu2 %vm62_vm0, %v4754_v33  ;;  %3624 = vmatmul.msk.f32.vlgmr.msra.gmra.mxu3 %vm62_vm0, %v4754_v33 }
 0x7bf   :  { %3619 = vmatmul.msk.f32.gmra.mxu2 %vm62_vm0, %v4765_v32  ;;  %3625 = vmatmul.msk.f32.gmra.mxu3 %vm62_vm0, %v4765_v32 }
 0x81e   :  { %v1919_v57 = vpop.f32.mrf.mxu1  ;;  %v1896_v1 = vpop.f32.mrf.mxu0 }
 0x81f   :  { %v1920_v58 = vadd.f32 %v1919_v57, %v1802_v44  ;;  %v1897_v11 = vadd.f32 %v1896_v1, %v1801_v5 }
 0x821   :  { %2066 = vmatpush.msra.mxu1 %v1920_v58 }
 0x823   :  { %v1827_v24 = vpop.f32.mrf.mxu2  ;;  %v1850_v47 = vpop.f32.mrf.mxu3 }
 0x824   :  { %v1828_v22 = vadd.f32 %v1827_v24, %v1798_v63  ;;  %v1851_v46 = vadd.f32 %v1850_v47, %v1799_v52 }
 0x826   :  { %2094 = vrot.lane.b32.xlu2 %v1828_v22, %s4001_s22 }
 0x82d   :  { %v1922_v60 = vpop.f32.mrf.mxu1  ;;  %v1899_v4 = vpop.f32.mrf.mxu0 }
 0x82e   :  { %v1923_v25 = vadd.f32 %v1922_v60, %v1802_v44  ;;  %2252 = vrot.lane.b32.xlu2 %v1828_v22, %s4000_s21  ;;  %v1900_v7 = vadd.f32 %v1899_v4, %v1801_v5 }
 0x830   :  { %v4791_v62 = vpack.i.bf16 %v1923_v25, %v1920_v58 }
 0x832   :  { %v1830_v16 = vpop.f32.mrf.mxu2  ;;  %v1853_v55 = vpop.f32.mrf.mxu3 }
 0x833   :  { %v1831_v17 = vadd.f32 %v1830_v16, %v1798_v63  ;;  %v1854_v10 = vadd.f32 %v1853_v55, %v1799_v52 }
 0x835   :  { %2122 = vrot.lane.b32.xlu0 %v1831_v17, %s4001_s22 }
 0x836   :  { %2280 = vrot.lane.b32.xlu2 %v1831_v17, %s4000_s21 }
 0x83a   :  { %v1873_v2 = vpop.f32.mrf.mxu2  ;;  %v4860_v44 = vpop.f32.mrf.mxu3 }
 0x83b   :  { %v1874_v3 = vadd.f32 %v1873_v2, %v1800_v38 }
 0x83d   :  { %2096 = vrot.lane.b32.xlu1 %v1874_v3, %s4001_s22  ;;  %3626 = vmatpush.xpose.msk.msrb.mxu2 %vm62_vm0, %v1874_v3 }
 0x83e   :  { %2436 = vrot.lane.b32.xlu2 %v1831_v17, %s4002_s23 }
 0x840   :  { %3627 = vmatmul.msk.f32.vlgmr.msrb.gmra.mxu2 %vm62_vm0, %v1828_v22 }
 0x841   :  { %2089 = vmatpush.msra.mxu2 %v1923_v25 }
 0x842   :  { %v1876_v30 = vpop.f32.mrf.mxu2  ;;  %v4862_v61 = vpop.f32.mrf.mxu3 }
 0x843   :  { %v1877_v6 = vadd.f32 %v1876_v30, %v1800_v38 }
 0x845   :  { %3628 = vmatpush.xpose.msk.msra.mxu0 %vm62_vm0, %v1877_v6  ;;  %2254 = vrot.lane.b32.xlu1 %v1874_v3, %s4000_s21 }
 0x846   :  { %2124 = vrot.lane.b32.xlu0 %v1877_v6, %s4001_s22  ;;  %2740 = vrot.lane.b32.xlu2 %v1900_v7, %s4001_s22 }
 0x848   :  { %3629 = vmatmul.msk.f32.vlgmr.msra.gmra.mxu0 %vm62_vm0, %v1831_v17 }
 0x84d   :  { %2282 = vrot.lane.b32.xlu1 %v1877_v6, %s4000_s21 }
 0x84e   :  { %2410 = vrot.lane.b32.xlu0 %v1874_v3, %s4002_s23  ;;  %2868 = vrot.lane.b32.xlu2 %v1851_v46, %s4000_s21 }
 0x855   :  { %2408 = vrot.lane.b32.xlu1 %v1828_v22, %s4002_s23 }
 0x856   :  { %2438 = vrot.lane.b32.xlu0 %v1877_v6, %s4002_s23  ;;  %2896 = vrot.lane.b32.xlu2 %v1854_v10, %s4000_s21 }
 0x85d   :  { %2712 = vrot.lane.b32.xlu1 %v1897_v11, %s4001_s22 }
 0x85e   :  { %2710 = vrot.lane.b32.xlu0 %v1851_v46, %s4001_s22  ;;  %3052 = vrot.lane.b32.xlu2 %v1854_v10, %s4002_s23 }
 0x865   :  { %2870 = vrot.lane.b32.xlu1 %v1897_v11, %s4000_s21 }
 0x866   :  { %2738 = vrot.lane.b32.xlu0 %v1854_v10, %s4001_s22 }
 0x86d   :  { %2898 = vrot.lane.b32.xlu1 %v1900_v7, %s4000_s21 }
 0x86e   :  { %3026 = vrot.lane.b32.xlu0 %v1897_v11, %s4002_s23 }
 0x875   :  { %3024 = vrot.lane.b32.xlu1 %v1851_v46, %s4002_s23 }
 0x876   :  { %3054 = vrot.lane.b32.xlu0 %v1900_v7, %s4002_s23 }
 0x87d   :  { %3780 = vrot.lane.b32.xlu1 %v4791_v62, %s4001_s22 }
 0x880   :  { %v2095_v12 = vpop.permute.xlu2 %2094 }
 0x888   :  { %v2253_v56 = vpop.permute.xlu2 %2252 }
 0x890   :  { %v2281_v49 = vpop.permute.xlu2 %2280 }
 0x898   :  { %v2437_v35 = vpop.permute.xlu2 %2436 }
 0x8a0   :  { %v2741_v28 = vpop.permute.xlu2 %2740 }
 0x8a7   :  { %v2123_v14 = vpop.permute.xlu0 %2122 }
 0x8a8   :  { %v2869_v18 = vpop.permute.xlu2 %2868 }
 0x8af   :  { %v2097_v13 = vpop.permute.xlu1 %2096 }
 0x8b0   :  { %3632 = vmatpush.xpose.msk.msrb.mxu3 %vm62_vm0, %v2097_v13  ;;  %v2897_v50 = vpop.permute.xlu2 %2896 }
 0x8b3   :  { %3633 = vmatmul.msk.f32.vlgmr.msrb.gmra.mxu3 %vm62_vm0, %v2095_v12 }
 0x8b7   :  { %v2255_v15 = vpop.permute.xlu1 %2254 }
 0x8b8   :  { %v2125_v19 = vpop.permute.xlu0 %2124  ;;  %3638 = vmatpush.xpose.msk.msra.mxu3 %vm62_vm0, %v2255_v15  ;;  %v3053_v39 = vpop.permute.xlu2 %3052 }
 0x8b9   :  { %3634 = vmatpush.xpose.msk.msrb.mxu0 %vm62_vm0, %v2125_v19 }
 0x8bb   :  { %3639 = vmatmul.msk.f32.vlgmr.msra.gmra.mxu3 %vm62_vm0, %v2253_v56 }
 0x8bc   :  { %3635 = vmatmul.msk.f32.vlgmr.msrb.gmra.mxu0 %vm62_vm0, %v2123_v14 }
 0x8bf   :  { %v2283_v54 = vpop.permute.xlu1 %2282 }
 0x8c0   :  { %v2411_v21 = vpop.permute.xlu0 %2410  ;;  %3640 = vmatpush.xpose.msk.msra.mxu0 %vm62_vm0, %v2283_v54 }
 0x8c1   :  { %3644 = vmatpush.xpose.msk.msrb.mxu3 %vm62_vm0, %v2411_v21 }
 0x8c3   :  { %v1971_v23 = vpop.f32.mrf.mxu2 }
 0x8c4   :  { %3641 = vmatmul.msk.f32.vlgmr.msra.gmra.mxu0 %vm62_vm0, %v2281_v49  ;;  %v2000_v40 = vsel %vm259_vm1, %v1971_v23, -inf }
 0x8c5   :  { %3650 = vmatpush.xpose.msk.msra.mxu3 %vm62_vm0, %v1897_v11  ;;  %v1997_v45 = vpop.f32.mrf.mxu0  ;;  %2001 = vmax.xlane.f32.xlu1 %v2000_v40 }
 0x8c6   :  { %v2003_v26 = vsel %vm259_vm1, %v1997_v45, -inf }
 0x8c7   :  { %2004 = vmax.xlane.f32.xlu0 %v2003_v26  ;;  %v2409_v27 = vpop.permute.xlu1 %2408 }
 0x8c8   :  { %v2439_v48 = vpop.permute.xlu0 %2438  ;;  %3645 = vmatmul.msk.f32.vlgmr.msrb.gmra.mxu3 %vm62_vm0, %v2409_v27 }
 0x8c9   :  { %3646 = vmatpush.xpose.msk.msrb.mxu0 %vm62_vm0, %v2439_v48 }
 0x8cc   :  { %3647 = vmatmul.msk.f32.vlgmr.msrb.gmra.mxu0 %vm62_vm0, %v2437_v35 }
 0x8cd   :  { %3652 = vmatpush.xpose.msk.msra.mxu0 %vm62_vm0, %v1900_v7 }
 0x8cf   :  { %v2713_v8 = vpop.permute.xlu1 %2712 }
 0x8d0   :  { %v2711_v31 = vpop.permute.xlu0 %2710  ;;  %3651 = vmatmul.msk.f32.vlgmr.msra.gmra.mxu3 %vm62_vm0, %v1851_v46 }
 0x8d1   :  { %3658 = vmatpush.xpose.msk.msrb.mxu0 %vm62_vm0, %v2741_v28  ;;  %3656 = vmatpush.xpose.msk.msrb.mxu3 %vm62_vm0, %v2713_v8 }
 0x8d4   :  { %3653 = vmatmul.msk.f32.vlgmr.msra.gmra.mxu0 %vm62_vm0, %v1854_v10 }
 0x8d7   :  { %v2871_v53 = vpop.permute.xlu1 %2870 }
 0x8d8   :  { %v2739_v59 = vpop.permute.xlu0 %2738  ;;  %3657 = vmatmul.msk.f32.vlgmr.msrb.gmra.mxu3 %vm62_vm0, %v2711_v31 }
 0x8d9   :  { %3662 = vmatpush.xpose.msk.msra.mxu3 %vm62_vm0, %v2871_v53 }
 0x8dc   :  { %3659 = vmatmul.msk.f32.vlgmr.msrb.gmra.mxu0 %vm62_vm0, %v2739_v59 }
 0x8df   :  { %v2899_v34 = vpop.permute.xlu1 %2898 }
 0x8e0   :  { %v3027_v36 = vpop.permute.xlu0 %3026  ;;  %3663 = vmatmul.msk.f32.vlgmr.msra.gmra.mxu3 %vm62_vm0, %v2869_v18  ;;  %3664 = vmatpush.xpose.msk.msra.mxu0 %vm62_vm0, %v2899_v34 }
 0x8e1   :  { %3668 = vmatpush.xpose.msk.msrb.mxu3 %vm62_vm0, %v3027_v36 }
 0x8e4   :  { %3665 = vmatmul.msk.f32.vlgmr.msra.gmra.mxu0 %vm62_vm0, %v2897_v50 }
 0x8e7   :  { %v3025_v51 = vpop.permute.xlu1 %3024 }
 0x8e8   :  { %v3055_v37 = vpop.permute.xlu0 %3054  ;;  %3669 = vmatmul.msk.f32.vlgmr.msrb.gmra.mxu3 %vm62_vm0, %v3025_v51 }
 0x8e9   :  { %3670 = vmatpush.xpose.msk.msrb.mxu0 %vm62_vm0, %v3055_v37 }
 0x8ec   :  { %3671 = vmatmul.msk.f32.vlgmr.msrb.gmra.mxu0 %vm62_vm0, %v3053_v39 }
 0x8ef   :  { %v3781_v43 = vpop.permute.xlu1 %3780 }
 0x8f0   :  { %v3783_v29 = vunpack.i.h.bf16 %v3781_v43  ;;  %v3782_v41 = vunpack.i.l.bf16 %v3781_v43 }
 0x8f2   :  { %2220 = vmatpush.msrb.mxu1 %v3782_v41  ;;  %2247 = vmatpush.msrb.mxu2 %v3783_v29 }
 0x936   :  { %v2119_v57 = vpop.f32.mrf.mxu3 }
 0x937   :  { %v2150_v58 = vsel %vm259_vm1, %v2119_v57, -inf }
 0x938   :  { %2151 = vmax.xlane.f32.xlu2 %v2150_v58  ;;  %v2002_v63 = vpop.xlane.xlu1 %2001 }
 0x939   :  { %v2147_v24 = vpop.f32.mrf.mxu0  ;;  %v2006_v22 = vsub.f32 %v1971_v23, %v2002_v63 }
 0x93a   :  { %v2005_v60 = vpop.xlane.xlu0 %2004  ;;  %v2153_v25 = vsel %vm259_vm1, %v2147_v24, -inf }
 0x93b   :  { %v2007_v16 = vsub.f32 %v1997_v45, %v2005_v60  ;;  %2154 = vmax.xlane.f32.xlu1 %v2153_v25  ;;  %v2008_v17 = vmul.f32 1.442695, %v2006_v22 }
 0x93d   :  { %v2010_v0 = vmul.f32 1.442695, %v2007_v16 }
 0x93e   :  { %v2277_v38 = vpop.f32.mrf.mxu3 }
 0x93f   :  { %3898 = vpow2.f32 %v2010_v0  ;;  %v2308_v1 = vsel %vm259_vm1, %v2277_v38, -inf }
 0x940   :  { %2309 = vmax.xlane.f32.xlu0 %v2308_v1  ;;  %3900 = vpow2.f32 %v2008_v17 }
 0x941   :  { %v2305_v2 = vpop.f32.mrf.mxu0 }
 0x942   :  { %v2311_v3 = vsel %vm259_vm1, %v2305_v2, -inf }
 0x943   :  { %2312 = vmax.xlane.f32.xlu2 %v2311_v3 }
 0x945   :  { %v4868_v20 = vpop.eup %3898 }
 0x946   :  { %v2015_v4 = vsel %vm259_vm1, %v4868_v20, 0.0  ;;  %v4872_v5 = vpop.eup %3900 }
 0x947   :  { %2016 = vadd.xlane.f32.xlu1 %v2015_v4  ;;  %v2012_v7 = vsel %vm259_vm1, %v4872_v5, 0.0 }
 0x949   :  { %v4874_v30 = vpop.f32.mrf.mxu0 }
 0x94a   :  { %v2467_v6 = vsel %vm259_vm1, %v4874_v30, -inf }
 0x94b   :  { %2468 = vmax.xlane.f32.xlu0 %v2467_v6  ;;  %2013 = vadd.xlane.f32.xlu2 %v2012_v7  ;;  %v4880_v9 = vpop.f32.mrf.mxu3 }
 0x94c   :  { %v2464_v52 = vsel %vm259_vm1, %v4880_v9, -inf }
 0x94f   :  { %2465 = vmax.xlane.f32.xlu1 %v2464_v52 }
 0x951   :  { %v4884_v47 = vpop.f32.mrf.mxu0 }
 0x952   :  { %v2619_v10 = vsel %vm259_vm1, %v4884_v47, -inf }
 0x953   :  { %v4886_v46 = vpop.f32.mrf.mxu3 }
 0x954   :  { %v2616_v55 = vsel %vm259_vm1, %v4886_v46, -inf }
 0x955   :  { %2617 = vmax.xlane.f32.xlu2 %v2616_v55 }
 0x957   :  { %2620 = vmax.xlane.f32.xlu1 %v2619_v10 }
 0x959   :  { %v4892_v11 = vpop.f32.mrf.mxu0 }
 0x95a   :  { %v2769_v56 = vsel %vm259_vm1, %v4892_v11, -inf }
 0x95b   :  { %v4894_v12 = vpop.f32.mrf.mxu3 }
 0x95c   :  { %v2766_v54 = vsel %vm259_vm1, %v4894_v12, -inf }
 0x95d   :  { %2770 = vmax.xlane.f32.xlu2 %v2769_v56 }
 0x95f   :  { %3785 = vrot.lane.b32.xlu0 %v4791_v62, %s4000_s21 }
 0x961   :  { %v4900_v13 = vpop.f32.mrf.mxu0 }
 0x962   :  { %v2927_v21 = vsel %vm259_vm1, %v4900_v13, -inf }
 0x963   :  { %v4902_v14 = vpop.f32.mrf.mxu3 }
 0x964   :  { %v2924_v15 = vsel %vm259_vm1, %v4902_v14, -inf }
 0x965   :  { %2925 = vmax.xlane.f32.xlu1 %v2924_v15 }
 0x969   :  { %v4906_v49 = vpop.f32.mrf.mxu0 }
 0x96a   :  { %v3083_v19 = vsel %vm259_vm1, %v4906_v49, -inf }
 0x96b   :  { %3084 = vmax.xlane.f32.xlu2 %v3083_v19  ;;  %v4914_v35 = vpop.f32.mrf.mxu3 }
 0x96c   :  { %v3080_v23 = vsel %vm259_vm1, %v4914_v35, -inf }
 0x989   :  { %2767 = vmax.xlane.f32.xlu0 %v2766_v54 }
 0x991   :  { %2928 = vmax.xlane.f32.xlu0 %v2927_v21 }
 0x999   :  { %3081 = vmax.xlane.f32.xlu0 %v3080_v23 }
 0x9ab   :  { %v2152_v40 = vpop.xlane.xlu2 %2151 }
 0x9ac   :  { %v2156_v45 = vsub.f32 %v2119_v57, %v2152_v40 }
 0x9ae   :  { %v2158_v26 = vmul.f32 1.442695, %v2156_v45  ;;  %v2155_v27 = vpop.xlane.xlu1 %2154 }
 0x9af   :  { %v2157_v48 = vsub.f32 %v2147_v24, %v2155_v27 }
 0x9b0   :  { %3902 = vpow2.f32 %v2158_v26 }
 0x9b1   :  { %v2160_v28 = vmul.f32 1.442695, %v2157_v48 }
 0x9b3   :  { %3904 = vpow2.f32 %v2160_v28  ;;  %v2310_v8 = vpop.xlane.xlu0 %2309 }
 0x9b4   :  { %v2314_v31 = vsub.f32 %v2277_v38, %v2310_v8 }
 0x9b6   :  { %v4918_v18 = vpop.eup %3902  ;;  %v2316_v53 = vmul.f32 1.442695, %v2314_v31  ;;  %v2313_v59 = vpop.xlane.xlu2 %2312 }
 0x9b7   :  { %v2315_v34 = vsub.f32 %v2305_v2, %v2313_v59  ;;  %v2162_v36 = vsel %vm259_vm1, %v4918_v18, 0.0 }
 0x9b8   :  { %3906 = vpow2.f32 %v2316_v53  ;;  %2163 = vadd.xlane.f32.xlu1 %v2162_v36 }
 0x9b9   :  { %v4922_v50 = vpop.eup %3904  ;;  %v2318_v51 = vmul.f32 1.442695, %v2315_v34 }
 0x9ba   :  { %v2165_v37 = vsel %vm259_vm1, %v4922_v50, 0.0  ;;  %v2017_v39 = vpop.xlane.xlu1 %2016 }
 0x9bb   :  { %3908 = vpow2.f32 %v2318_v51  ;;  %2166 = vadd.xlane.f32.xlu0 %v2165_v37  ;;  %v2043_v1 = vand.u32 2147483648, %v2017_v39  ;;  %vm2037_vm14 = vweird.f32 %v2017_v39 }
 0x9bc   :  { %3910 = vrcp.f32 %v2017_v39 }
 0x9bd   :  { %v2044_v10 = vor.u32 1.1754944e-38, %v2043_v1 }
 0x9be   :  { %v4926_v43 = vpop.eup %3906  ;;  %v2469_v29 = vpop.xlane.xlu0 %2468 }
 0x9bf   :  { %v2014_v41 = vpop.xlane.xlu2 %2013  ;;  %v2471_v57 = vsub.f32 %v4874_v30, %v2469_v29  ;;  %v2320_v58 = vsel %vm259_vm1, %v4926_v43, 0.0  ;;  %v2041_v30 = vand.u32 2147483647, %v2017_v39 }
 0x9c0   :  { %3912 = vrcp.f32 %v2014_v41  ;;  %2321 = vadd.xlane.f32.xlu2 %v2320_v58  ;;  %v2029_v56 = vand.u32 2147483648, %v2014_v41  ;;  %v2027_v19 = vand.u32 2147483647, %v2014_v41  ;;  %vm2023_vm4 = vweird.f32 %v2014_v41 }
 0x9c1   :  { %v4931_v63 = vpop.eup %3908  ;;  %v2474_v24 = vmul.f32 1.442695, %v2471_v57  ;;  %vm2042_vm3 = vcmp.eq.f32.partialorder %v2041_v30, 8.507059e+37 }
 0x9c2   :  { %v3911_v22 = vpop.eup %3910  ;;  %v2323_v60 = vsel %vm259_vm1, %v4931_v63, 0.0  ;;  %v2466_v25 = vpop.xlane.xlu1 %2465  ;;  %vm2028_vm6 = vcmp.eq.f32.partialorder %v2027_v19, 8.507059e+37 }
 0x9c3   :  { %v2033_v16 = vmul.f32 %v3911_v22, %v2017_v39  ;;  %3914 = vpow2.f32 %v2474_v24  ;;  %2324 = vadd.xlane.f32.xlu1 %v2323_v60  ;;  %v2470_v17 = vsub.f32 %v4880_v9, %v2466_v25  ;;  %vm2038_vm13 = vweird.f32 %v3911_v22 }
 0x9c4   :  { %vm2039_vm15 = vmor %vm2037_vm14, %vm2038_vm13 }
 0x9c5   :  { %v2034_v38 = vsub.f32 1.0, %v2033_v16  ;;  %v2472_v2 = vmul.f32 1.442695, %v2470_v17 }
 0x9c6   :  { %v3913_v0 = vpop.eup %3912 }
 0x9c7   :  { %v2019_v3 = vmul.f32 %v3913_v0, %v2014_v41  ;;  %v2035_v4 = vmul.f32 %v3911_v22, %v2034_v38  ;;  %3916 = vpow2.f32 %v2472_v2  ;;  %vm2024_vm2 = vweird.f32 %v3913_v0 }
 0x9c8   :  { %v2618_v7 = vpop.xlane.xlu2 %2617  ;;  %vm2025_vm5 = vmor %vm2023_vm4, %vm2024_vm2 }
 0x9c9   :  { %v2020_v6 = vsub.f32 1.0, %v2019_v3  ;;  %v4936_v52 = vpop.eup %3914  ;;  %v2036_v55 = vadd.f32 %v3911_v22, %v2035_v4  ;;  %v2622_v15 = vsub.f32 %v4886_v46, %v2618_v7  ;;  %v2030_v46 = vor.u32 1.1754944e-38, %v2029_v56 }
 0x9ca   :  { %v2479_v54 = vsel %vm259_vm1, %v4936_v52, 0.0  ;;  %v2621_v21 = vpop.xlane.xlu1 %2620 }
 0x9cb   :  { %v2021_v9 = vmul.f32 %v3913_v0, %v2020_v6  ;;  %v2040_v23 = vsel %vm2039_vm15, %v3911_v22, %v2036_v55  ;;  %v2624_v40 = vmul.f32 1.442695, %v2622_v15  ;;  %2480 = vadd.xlane.f32.xlu2 %v2479_v54  ;;  %v2623_v45 = vsub.f32 %v4884_v47, %v2621_v21  ;;  %v3589_v55 = vld [vmem:[%s5288_s5 + $0x58] sm:$0xff] }
 0x9cc   :  { %v2045_v26 = vsel %vm2042_vm3, %v2044_v10, %v2040_v23  ;;  %v1803_v10 = vperm.slane %v3589_v55, 7 }
 0x9cd   :  { %v2022_v27 = vadd.f32 %v3913_v0, %v2021_v9  ;;  %v4942_v48 = vpop.eup %3916  ;;  %3918 = vpow2.f32 %v2624_v40  ;;  %v2626_v28 = vmul.f32 1.442695, %v2623_v45  ;;  %v2047_v8 = vmul.f32 %v4868_v20, %v2045_v26 }
 0x9ce   :  { %v2476_v53 = vsel %vm259_vm1, %v4942_v48, 0.0  ;;  %v4989_v56 = vadd.f32 %v4862_v61, %v1803_v10  ;;  %v4992_v15 = vadd.f32 %v4860_v44, %v1803_v10 }
 0x9cf   :  { %v2026_v31 = vsel %vm2025_vm5, %v3913_v0, %v2022_v27  ;;  %3920 = vpow2.f32 %v2626_v28  ;;  %3631 = vmatmul.msk.f32.vlgmr.msra.gmra.mxu2 %vm259_vm1, %v2047_v8  ;;  %2477 = vadd.xlane.f32.xlu0 %v2476_v53 }
 0x9d0   :  { %v2031_v59 = vsel %vm2028_vm6, %v2030_v46, %v2026_v31  ;;  %v4996_v9 = vpack.i.bf16 %v4989_v56, %v4992_v15 }
 0x9d1   :  { %v2046_v47 = vmul.f32 %v4872_v5, %v2031_v59  ;;  %v3786_v34 = vpop.permute.xlu0 %3785  ;;  %v2771_v5 = vpop.xlane.xlu2 %2770 }
 0x9d2   :  { %v3788_v36 = vunpack.i.h.bf16 %v3786_v34  ;;  %v3787_v51 = vunpack.i.l.bf16 %v3786_v34  ;;  %v2773_v58 = vsub.f32 %v4892_v11, %v2771_v5 }
 0x9d3   :  { %3630 = vmatmul.msk.f32.vlgmr.msra.gmra.mxu1 %vm259_vm1, %v2046_v47  ;;  %v4950_v37 = vpop.eup %3918 }
 0x9d4   :  { %2377 = vmatpush.msra.mxu1 %v3787_v51  ;;  %2403 = vmatpush.msra.mxu2 %v3788_v36  ;;  %v2628_v39 = vsel %vm259_vm1, %v4950_v37, 0.0  ;;  %v2776_v22 = vmul.f32 1.442695, %v2773_v58 }
 0x9d5   :  { %v4952_v20 = vpop.eup %3920 }
 0x9d6   :  { %v2631_v29 = vsel %vm259_vm1, %v4952_v20, 0.0 }
 0x9d7   :  { %2629 = vadd.xlane.f32.xlu0 %v2628_v39  ;;  %2632 = vadd.xlane.f32.xlu2 %v2631_v29 }
 0x9d8   :  { %v2926_v60 = vpop.xlane.xlu1 %2925 }
 0x9d9   :  { %v2930_v0 = vsub.f32 %v4902_v14, %v2926_v60 }
 0x9dc   :  { %3790 = vrot.lane.b32.xlu1 %v4791_v62, %s4002_s23 }
 0x9de   :  { %v5000_v54 = vpop.xlane.xlu2 %3084 }
 0x9fc   :  { %v2768_v41 = vpop.xlane.xlu0 %2767 }
 0x9fd   :  { %v2772_v57 = vsub.f32 %v4894_v12, %v2768_v41  ;;  %v2932_v12 = vmul.f32 1.442695, %v2930_v0 }
 0x9ff   :  { %v2774_v24 = vmul.f32 1.442695, %v2772_v57 }
 0xa01   :  { %3922 = vpow2.f32 %v2774_v24 }
 0xa02   :  { %3924 = vpow2.f32 %v2776_v22 }
 0xa04   :  { %v2929_v25 = vpop.xlane.xlu0 %2928 }
 0xa05   :  { %v2931_v16 = vsub.f32 %v4900_v13, %v2929_v25 }
 0xa07   :  { %v4963_v17 = vpop.eup %3922  ;;  %v2934_v38 = vmul.f32 1.442695, %v2931_v16 }
 0xa08   :  { %v2778_v62 = vsel %vm259_vm1, %v4963_v17, 0.0  ;;  %v4968_v1 = vpop.eup %3924 }
 0xa09   :  { %3926 = vpow2.f32 %v2934_v38  ;;  %2779 = vadd.xlane.f32.xlu2 %v2778_v62  ;;  %v2781_v14 = vsel %vm259_vm1, %v4968_v1, 0.0 }
 0xa0a   :  { %3928 = vpow2.f32 %v2932_v12 }
 0xa0c   :  { %v3082_v11 = vpop.xlane.xlu0 %3081 }
 0xa0d   :  { %v3086_v2 = vsub.f32 %v4914_v35, %v3082_v11 }
 0xa0f   :  { %v4971_v3 = vpop.eup %3926  ;;  %v3088_v13 = vmul.f32 1.442695, %v3086_v2 }
 0xa10   :  { %v2939_v4 = vsel %vm259_vm1, %v4971_v3, 0.0  ;;  %v4977_v30 = vpop.eup %3928 }
 0xa11   :  { %3930 = vpow2.f32 %v3088_v13  ;;  %2940 = vadd.xlane.f32.xlu0 %v2939_v4  ;;  %2782 = vadd.xlane.f32.xlu2 %v2781_v14  ;;  %v2936_v7 = vsel %vm259_vm1, %v4977_v30, 0.0 }
 0xa17   :  { %v4979_v6 = vpop.eup %3930 }
 0xa18   :  { %v3092_v35 = vsel %vm259_vm1, %v4979_v6, 0.0 }
 0xa19   :  { %3093 = vadd.xlane.f32.xlu1 %v3092_v35  ;;  %2937 = vadd.xlane.f32.xlu2 %v2936_v7 }
 0xa25   :  { %3805 = vrot.lane.b32.xlu0 %v4996_v9, %s4002_s23 }
 0xa2b   :  { %v2164_v19 = vpop.xlane.xlu1 %2163 }
 0xa2c   :  { %3932 = vrcp.f32 %v2164_v19  ;;  %v2179_v26 = vand.u32 2147483648, %v2164_v19  ;;  %v2177_v8 = vand.u32 2147483647, %v2164_v19  ;;  %vm2173_vm8 = vweird.f32 %v2164_v19 }
 0xa2e   :  { %v2167_v21 = vpop.xlane.xlu0 %2166  ;;  %v2180_v47 = vor.u32 1.1754944e-38, %v2179_v26  ;;  %vm2178_vm13 = vcmp.eq.f32.partialorder %v2177_v8, 8.507059e+37 }
 0xa2f   :  { %3934 = vrcp.f32 %v2167_v21  ;;  %v2193_v59 = vand.u32 2147483648, %v2167_v21  ;;  %v2191_v36 = vand.u32 2147483647, %v2167_v21  ;;  %vm2187_vm14 = vweird.f32 %v2167_v21 }
 0xa31   :  { %3795 = vrot.lane.b32.xlu2 %v4996_v9, %s4001_s22  ;;  %v2194_v58 = vor.u32 1.1754944e-38, %v2193_v59  ;;  %vm2192_vm2 = vcmp.eq.f32.partialorder %v2191_v36, 8.507059e+37 }
 0xa32   :  { %v3933_v61 = vpop.eup %3932 }
 0xa33   :  { %v2169_v23 = vmul.f32 %v3933_v61, %v2164_v19  ;;  %v2322_v44 = vpop.xlane.xlu2 %2321  ;;  %vm2174_vm7 = vweird.f32 %v3933_v61 }
 0xa34   :  { %3936 = vrcp.f32 %v2322_v44  ;;  %vm2175_vm9 = vmor %vm2173_vm8, %vm2174_vm7  ;;  %v2335_v38 = vand.u32 2147483647, %v2322_v44  ;;  %v2337_v62 = vand.u32 2147483648, %v2322_v44  ;;  %vm2331_vm4 = vweird.f32 %v2322_v44 }
 0xa35   :  { %v3935_v40 = vpop.eup %3934  ;;  %v2170_v45 = vsub.f32 1.0, %v2169_v23 }
 0xa36   :  { %v2183_v27 = vmul.f32 %v3935_v40, %v2167_v21  ;;  %v2325_v46 = vpop.xlane.xlu1 %2324  ;;  %vm2188_vm12 = vweird.f32 %v3935_v40  ;;  %v2338_v7 = vor.u32 1.1754944e-38, %v2337_v62  ;;  %vm2336_vm7 = vcmp.eq.f32.partialorder %v2335_v38, 8.507059e+37 }
 0xa37   :  { %v2171_v28 = vmul.f32 %v3933_v61, %v2170_v45  ;;  %3938 = vrcp.f32 %v2325_v46  ;;  %vm2189_vm15 = vmor %vm2187_vm14, %vm2188_vm12  ;;  %v2351_v13 = vand.u32 2147483648, %v2325_v46  ;;  %v2349_v14 = vand.u32 2147483647, %v2325_v46 }
 0xa38   :  { %v2184_v31 = vsub.f32 1.0, %v2183_v27  ;;  %vm2345_vm8 = vweird.f32 %v2325_v46 }
 0xa39   :  { %v2172_v53 = vadd.f32 %v3933_v61, %v2171_v28  ;;  %vm2350_vm12 = vcmp.eq.f32.partialorder %v2349_v14, 8.507059e+37 }
 0xa3a   :  { %v2185_v34 = vmul.f32 %v3935_v40, %v2184_v31  ;;  %v3937_v51 = vpop.eup %3936 }
 0xa3b   :  { %v2176_v39 = vsel %vm2175_vm9, %v3933_v61, %v2172_v53  ;;  %v2327_v41 = vmul.f32 %v3937_v51, %v2322_v44  ;;  %vm2332_vm3 = vweird.f32 %v3937_v51 }
 0xa3c   :  { %v2181_v29 = vsel %vm2178_vm13, %v2180_v47, %v2176_v39  ;;  %v2186_v5 = vadd.f32 %v3935_v40, %v2185_v34  ;;  %vm2333_vm6 = vmor %vm2331_vm4, %vm2332_vm3 }
 0xa3d   :  { %v3939_v57 = vpop.eup %3938  ;;  %v2196_v24 = vmul.f32 %v4918_v18, %v2181_v29  ;;  %v2328_v60 = vsub.f32 1.0, %v2327_v41 }
 0xa3e   :  { %v2190_v22 = vsel %vm2189_vm15, %v3935_v40, %v2186_v5  ;;  %v2341_v25 = vmul.f32 %v3939_v57, %v2325_v46  ;;  %v2481_v16 = vpop.xlane.xlu2 %2480  ;;  %vm2346_vm5 = vweird.f32 %v3939_v57  ;;  %v3087_v40 = vsub.f32 %v4906_v49, %v5000_v54 }
 0xa3f   :  { %v2195_v0 = vsel %vm2192_vm2, %v2194_v58, %v2190_v22  ;;  %3940 = vrcp.f32 %v2481_v16  ;;  %3636 = vmatmul.msk.f32.vlgmr.msrb.gmra.mxu1 %vm259_vm1, %v2196_v24  ;;  %v2329_v12 = vmul.f32 %v3937_v51, %v2328_v60  ;;  %vm2347_vm9 = vmor %vm2345_vm8, %vm2346_vm5  ;;  %v2505_v46 = vand.u32 2147483647, %v2481_v16 }
 0xa40   :  { %v2342_v11 = vsub.f32 1.0, %v2341_v25  ;;  %v2197_v2 = vmul.f32 %v4922_v50, %v2195_v0  ;;  %v2352_v50 = vor.u32 1.1754944e-38, %v2351_v13  ;;  %v2507_v8 = vand.u32 2147483648, %v2481_v16 }
 0xa41   :  { %v2330_v4 = vadd.f32 %v3937_v51, %v2329_v12  ;;  %vm2501_vm14 = vweird.f32 %v2481_v16  ;;  %vm2506_vm2 = vcmp.eq.f32.partialorder %v2505_v46, 8.507059e+37 }
 0xa42   :  { %v2343_v18 = vmul.f32 %v3939_v57, %v2342_v11  ;;  %3637 = vmatmul.msk.f32.vlgmr.msrb.gmra.mxu2 %vm259_vm1, %v2197_v2  ;;  %v2478_v35 = vpop.xlane.xlu0 %2477 }
 0xa43   :  { %3942 = vrcp.f32 %v2478_v35  ;;  %v2334_v55 = vsel %vm2333_vm6, %v3937_v51, %v2330_v4  ;;  %v2493_v34 = vand.u32 2147483648, %v2478_v35  ;;  %v2491_v39 = vand.u32 2147483647, %v2478_v35 }
 0xa44   :  { %v2344_v10 = vadd.f32 %v3939_v57, %v2343_v18  ;;  %v2339_v21 = vsel %vm2336_vm7, %v2338_v7, %v2334_v55  ;;  %vm2487_vm4 = vweird.f32 %v2478_v35 }
 0xa45   :  { %v3941_v19 = vpop.eup %3940  ;;  %v2354_v44 = vmul.f32 %v4926_v43, %v2339_v21  ;;  %v3090_v43 = vmul.f32 1.442695, %v3087_v40  ;;  %v2494_v60 = vor.u32 1.1754944e-38, %v2493_v34  ;;  %vm2492_vm6 = vcmp.eq.f32.partialorder %v2491_v39, 8.507059e+37 }
 0xa46   :  { %v2348_v61 = vsel %vm2347_vm9, %v3939_v57, %v2344_v10  ;;  %v2497_v23 = vmul.f32 %v3941_v19, %v2481_v16  ;;  %vm2502_vm13 = vweird.f32 %v3941_v19 }
 0xa47   :  { %v2353_v45 = vsel %vm2350_vm12, %v2352_v50, %v2348_v61  ;;  %3642 = vmatmul.msk.f32.vlgmr.msra.gmra.mxu1 %vm259_vm1, %v2354_v44  ;;  %vm2503_vm15 = vmor %vm2501_vm14, %vm2502_vm13 }
 0xa48   :  { %v2498_v26 = vsub.f32 1.0, %v2497_v23  ;;  %v2355_v27 = vmul.f32 %v4931_v63, %v2353_v45  ;;  %v2508_v63 = vor.u32 1.1754944e-38, %v2507_v8 }
 0xa49   :  { %v3943_v28 = vpop.eup %3942 }
 0xa4a   :  { %v2499_v31 = vmul.f32 %v3941_v19, %v2498_v26  ;;  %v2483_v53 = vmul.f32 %v3943_v28, %v2478_v35  ;;  %3643 = vmatmul.msk.f32.vlgmr.msra.gmra.mxu2 %vm259_vm1, %v2355_v27  ;;  %v2630_v59 = vpop.xlane.xlu0 %2629  ;;  %v5014_v47 = vpop.xlane.xlu2 %2632  ;;  %vm2488_vm3 = vweird.f32 %v3943_v28 }
 0xa4b   :  { %3944 = vrcp.f32 %v2630_v59  ;;  %vm2489_vm5 = vmor %vm2487_vm4, %vm2488_vm3  ;;  %v2645_v2 = vand.u32 2147483648, %v2630_v59  ;;  %v2643_v18 = vand.u32 2147483647, %v2630_v59  ;;  %v2659_v14 = vand.u32 2147483648, %v5014_v47 }
 0xa4c   :  { %v2500_v49 = vadd.f32 %v3941_v19, %v2499_v31  ;;  %v2484_v54 = vsub.f32 1.0, %v2483_v53  ;;  %3946 = vrcp.f32 %v5014_v47  ;;  %vm2639_vm9 = vweird.f32 %v2630_v59 }
 0xa4d   :  { %3948 = vpow2.f32 %v3090_v43  ;;  %vm2653_vm13 = vweird.f32 %v5014_v47  ;;  %vm2644_vm14 = vcmp.eq.f32.partialorder %v2643_v18, 8.507059e+37 }
 0xa4e   :  { %v2504_v36 = vsel %vm2503_vm15, %v3941_v19, %v2500_v49  ;;  %v2485_v51 = vmul.f32 %v3943_v28, %v2484_v54  ;;  %v3791_v29 = vpop.permute.xlu1 %3790  ;;  %v2660_v19 = vor.u32 1.1754944e-38, %v2659_v14 }
 0xa4f   :  { %v2509_v5 = vsel %vm2506_vm2, %v2508_v63, %v2504_v36  ;;  %v3793_v41 = vunpack.i.h.bf16 %v3791_v29  ;;  %v3792_v58 = vunpack.i.l.bf16 %v3791_v29 }
 0xa50   :  { %v2486_v57 = vadd.f32 %v3943_v28, %v2485_v51  ;;  %v2511_v24 = vmul.f32 %v4936_v52, %v2509_v5 }
 0xa51   :  { %v3945_v22 = vpop.eup %3944  ;;  %2559 = vmatpush.msrb.mxu2 %v3793_v41  ;;  %2533 = vmatpush.msrb.mxu1 %v3792_v58 }
 0xa52   :  { %v3947_v25 = vpop.eup %3946  ;;  %v2490_v16 = vsel %vm2489_vm5, %v3943_v28, %v2486_v57  ;;  %v2635_v0 = vmul.f32 %v3945_v22, %v2630_v59  ;;  %3649 = vmatmul.msk.f32.vlgmr.msrb.gmra.mxu2 %vm259_vm1, %v2511_v24  ;;  %vm2640_vm7 = vweird.f32 %v3945_v22 }
 0xa53   :  { %v2495_v38 = vsel %vm2492_vm6, %v2494_v60, %v2490_v16  ;;  %v2649_v62 = vmul.f32 %v3947_v25, %v5014_v47  ;;  %2682 = vmatpush.msra.mxu1 %v4992_v15  ;;  %2705 = vmatpush.msra.mxu2 %v4989_v56  ;;  %v5023_v11 = vpop.eup %3948  ;;  %vm2654_vm8 = vweird.f32 %v3947_v25  ;;  %v2657_v15 = vand.u32 2147483647, %v5014_v47  ;;  %vm2641_vm12 = vmor %vm2639_vm9, %vm2640_vm7  ;;  %v5044_v60 = vpop.f32.mrf.mxu1 }
 0xa54   :  { %v2636_v12 = vsub.f32 1.0, %v2635_v0  ;;  %v2510_v52 = vmul.f32 %v4942_v48, %v2495_v38  ;;  %v2646_v56 = vor.u32 1.1754944e-38, %v2645_v2  ;;  %v3095_v55 = vsel %vm259_vm1, %v5023_v11, 0.0  ;;  %vm2655_vm15 = vmor %vm2653_vm13, %vm2654_vm8  ;;  %v5046_v16 = vpop.f32.mrf.mxu2 }
 0xa55   :  { %v2650_v13 = vsub.f32 1.0, %v2649_v62  ;;  %vm2658_vm2 = vcmp.eq.f32.partialorder %v2657_v15, 8.507059e+37 }
 0xa56   :  { %v2637_v4 = vmul.f32 %v3945_v22, %v2636_v12  ;;  %3648 = vmatmul.msk.f32.vlgmr.msrb.gmra.mxu1 %vm259_vm1, %v2510_v52 }
 0xa57   :  { %v2651_v35 = vmul.f32 %v3947_v25, %v2650_v13 }
 0xa58   :  { %v2638_v7 = vadd.f32 %v3945_v22, %v2637_v4 }
 0xa59   :  { %v2652_v48 = vadd.f32 %v3947_v25, %v2651_v35 }
 0xa5a   :  { %v2642_v10 = vsel %vm2641_vm12, %v3945_v22, %v2638_v7  ;;  %3096 = vadd.xlane.f32.xlu2 %v3095_v55 }
 0xa5b   :  { %v2647_v21 = vsel %vm2644_vm14, %v2646_v56, %v2642_v10  ;;  %v2656_v50 = vsel %vm2655_vm15, %v3947_v25, %v2652_v48 }
 0xa5c   :  { %v2661_v61 = vsel %vm2658_vm2, %v2660_v19, %v2656_v50  ;;  %v2662_v23 = vmul.f32 %v4950_v37, %v2647_v21 }
 0xa5d   :  { %v2663_v44 = vmul.f32 %v4952_v20, %v2661_v61 }
 0xa5e   :  { %3654 = vmatmul.msk.f32.vlgmr.msra.gmra.mxu1 %vm259_vm1, %v2662_v23 }
 0xa5f   :  { %3655 = vmatmul.msk.f32.vlgmr.msra.gmra.mxu2 %vm259_vm1, %v2663_v44 }
 0xa72   :  { %3800 = vrot.lane.b32.xlu2 %v4996_v9, %s4000_s21 }
 0xa7c   :  { %v2780_v40 = vpop.xlane.xlu2 %2779 }
 0xa7d   :  { %3950 = vrcp.f32 %v2780_v40  ;;  %v2795_v20 = vand.u32 2147483648, %v2780_v40  ;;  %vm2789_vm4 = vweird.f32 %v2780_v40  ;;  %v2793_v59 = vand.u32 2147483647, %v2780_v40 }
 0xa7f   :  { %v2796_v49 = vor.u32 1.1754944e-38, %v2795_v20  ;;  %vm2794_vm7 = vcmp.eq.f32.partialorder %v2793_v59, 8.507059e+37 }
 0xa83   :  { %v3951_v45 = vpop.eup %3950 }
 0xa84   :  { %v2785_v26 = vmul.f32 %v3951_v45, %v2780_v40  ;;  %v2783_v27 = vpop.xlane.xlu2 %2782  ;;  %vm2790_vm3 = vweird.f32 %v3951_v45  ;;  %v2941_v22 = vpop.xlane.xlu0 %2940 }
 0xa85   :  { %3952 = vrcp.f32 %v2783_v27  ;;  %vm2791_vm5 = vmor %vm2789_vm4, %vm2790_vm3  ;;  %v2809_v43 = vand.u32 2147483648, %v2783_v27  ;;  %v2807_v63 = vand.u32 2147483647, %v2783_v27  ;;  %vm2803_vm8 = vweird.f32 %v2783_v27 }
 0xa86   :  { %v2786_v28 = vsub.f32 1.0, %v2785_v26  ;;  %3954 = vrcp.f32 %v2941_v22  ;;  %vm2961_vm15 = vweird.f32 %v2941_v22  ;;  %v2967_v19 = vand.u32 2147483648, %v2941_v22 }
 0xa87   :  { %v2810_v51 = vor.u32 1.1754944e-38, %v2809_v43  ;;  %vm2808_vm12 = vcmp.eq.f32.partialorder %v2807_v63, 8.507059e+37  ;;  %v2965_v61 = vand.u32 2147483647, %v2941_v22 }
 0xa88   :  { %v2787_v46 = vmul.f32 %v3951_v45, %v2786_v28 }
 0xa8a   :  { %v2788_v31 = vadd.f32 %v3951_v45, %v2787_v46 }
 0xa8b   :  { %v3953_v8 = vpop.eup %3952 }
 0xa8c   :  { %v5037_v37 = vpop.xlane.xlu2 %2937  ;;  %v2799_v53 = vmul.f32 %v3953_v8, %v2783_v27  ;;  %v2792_v9 = vsel %vm2791_vm5, %v3951_v45, %v2788_v31  ;;  %vm2804_vm6 = vweird.f32 %v3953_v8  ;;  %v3955_v25 = vpop.eup %3954  ;;  %v2968_v27 = vor.u32 1.1754944e-38, %v2967_v19 }
 0xa8d   :  { %v2797_v34 = vsel %vm2794_vm7, %v2796_v49, %v2792_v9  ;;  %vm2805_vm9 = vmor %vm2803_vm8, %vm2804_vm6  ;;  %3956 = vrcp.f32 %v5037_v37  ;;  %v5048_v0 = vpop.xlane.xlu1 %3093  ;;  %v2957_v38 = vmul.f32 %v3955_v25, %v2941_v22  ;;  %vm2962_vm13 = vweird.f32 %v3955_v25 }
 0xa8e   :  { %v2800_v47 = vsub.f32 1.0, %v2799_v53  ;;  %v2812_v58 = vmul.f32 %v4963_v17, %v2797_v34  ;;  %3958 = vrcp.f32 %v5048_v0  ;;  %v2953_v21 = vand.u32 2147483648, %v5037_v37  ;;  %vm5058_vm2 = vmor %vm2961_vm15, %vm2962_vm13 }
 0xa8f   :  { %v2958_v12 = vsub.f32 1.0, %v2957_v38  ;;  %vm2947_vm3 = vweird.f32 %v5037_v37  ;;  %v2951_v23 = vand.u32 2147483647, %v5037_v37  ;;  %vm2966_vm5 = vcmp.eq.f32.partialorder %v2965_v61, 8.507059e+37 }
 0xa90   :  { %v2801_v54 = vmul.f32 %v3953_v8, %v2800_v47  ;;  %v2954_v28 = vor.u32 1.1754944e-38, %v2953_v21  ;;  %vm3103_vm8 = vweird.f32 %v5048_v0  ;;  %v3109_v9 = vand.u32 2147483648, %v5048_v0 }
 0xa91   :  { %v2959_v18 = vmul.f32 %v3955_v25, %v2958_v12  ;;  %vm2952_vm6 = vcmp.eq.f32.partialorder %v2951_v23, 8.507059e+37  ;;  %v3107_v63 = vand.u32 2147483647, %v5048_v0  ;;  %v3687_v12 = vld [vmem:[%s5285_s2 + $0x168] sm:$0xff] }
 0xa92   :  { %v2802_v36 = vadd.f32 %v3953_v8, %v2801_v54 }
 0xa93   :  { %v3957_v17 = vpop.eup %3956  ;;  %v2960_v7 = vadd.f32 %v3955_v25, %v2959_v18  ;;  %vm3108_vm13 = vcmp.eq.f32.partialorder %v3107_v63, 8.507059e+37  ;;  %v3681_v18 = vld [vmem:[%s5285_s2 + $0x138] sm:$0xff] }
 0xa94   :  { %v3796_v39 = vpop.permute.xlu2 %3795  ;;  %v2806_v29 = vsel %vm2805_vm9, %v3953_v8, %v2802_v36  ;;  %v5052_v13 = vpop.eup %3958  ;;  %vm2948_vm14 = vweird.f32 %v3957_v17  ;;  %v3697_v63 = vld [vmem:[%s5285_s2 + $0x1b8] sm:$0xff] }
 0xa95   :  { %v3798_v5 = vunpack.i.h.bf16 %v3796_v39  ;;  %v3797_v41 = vunpack.i.l.bf16 %v3796_v39  ;;  %v2811_v57 = vsel %vm2808_vm12, %v2810_v51, %v2806_v29  ;;  %v3099_v35 = vmul.f32 %v5052_v13, %v5048_v0  ;;  %vm2949_vm4 = vmor %vm2947_vm3, %vm2948_vm14  ;;  %v3694_v51 = vld [vmem:[%s5285_s2 + $0x1a0] sm:$0xff] }
 0xa96   :  { %v2813_v24 = vmul.f32 %v4968_v1, %v2811_v57  ;;  %v2943_v1 = vmul.f32 %v3957_v17, %v5037_v37  ;;  %v2964_v40 = vsel %vm5058_vm2, %v3955_v25, %v2960_v7  ;;  %vm3104_vm7 = vweird.f32 %v5052_v13  ;;  %v3678_v7 = vld [vmem:[%s5285_s2 + $0x120] sm:$0xff] }
 0xa97   :  { %2836 = vmatpush.msrb.mxu1 %v3797_v41  ;;  %2863 = vmatpush.msrb.mxu2 %v3798_v5  ;;  %v3100_v48 = vsub.f32 1.0, %v3099_v35  ;;  %v2969_v31 = vsel %vm2966_vm5, %v2968_v27, %v2964_v40  ;;  %v3806_v53 = vpop.permute.xlu0 %3805  ;;  %vm5076_vm9 = vmor %vm3103_vm8, %vm3104_vm7  ;;  %v3680_v35 = vld [vmem:[%s5285_s2 + $0x130] sm:$0xff] }
 0xa98   :  { %3660 = vmatmul.msk.f32.vlgmr.msrb.gmra.mxu1 %vm259_vm1, %v2812_v58  ;;  %3661 = vmatmul.msk.f32.vlgmr.msrb.gmra.mxu2 %vm259_vm1, %v2813_v24  ;;  %v2944_v52 = vsub.f32 1.0, %v2943_v1  ;;  %v2971_v54 = vmul.f32 %v4971_v3, %v2969_v31  ;;  %v3808_v39 = vunpack.i.h.bf16 %v3806_v53  ;;  %v3807_v29 = vunpack.i.l.bf16 %v3806_v53  ;;  %v3689_v1 = vld [vmem:[%s5285_s2 + $0x178] sm:$0xff]  ;;  %v3702_v31 = vld [vmem:[%s5285_s2 + $0x1e0] sm:$0xff]  ;;  %v3700_v53 = vld [vmem:[%s5285_s2 + $0x1d0] sm:$0xff] }
 0xa99   :  { %v3101_v26 = vmul.f32 %v5052_v13, %v3100_v48  ;;  %3274 = vmatpush.msra.mxu3 %v3689_v1  ;;  %v3676_v48 = vld [vmem:[%s5285_s2 + $0x110] sm:$0xff] }
 0xa9a   :  { %v2945_v14 = vmul.f32 %v3957_v17, %v2944_v52  ;;  %v3685_v52 = vld [vmem:[%s5285_s2 + $0x158] sm:$0xff] }
 0xa9b   :  { %v3102_v37 = vadd.f32 %v5052_v13, %v3101_v26 }
 0xa9c   :  { %v2946_v56 = vadd.f32 %v3957_v17, %v2945_v14 }
 0xa9d   :  { %v3106_v41 = vsel %vm5076_vm9, %v5052_v13, %v3102_v37  ;;  %v3683_v13 = vld [vmem:[%s5285_s2 + $0x148] sm:$0xff]  ;;  %v3701_v37 = vld [vmem:[%s5285_s2 + $0x1d8] sm:$0xff] }
 0xa9e   :  { %v2950_v45 = vsel %vm2949_vm4, %v3957_v17, %v2946_v56  ;;  %v3677_v56 = vld [vmem:[%s5285_s2 + $0x118] sm:$0xff] }
 0xa9f   :  { %v2955_v20 = vsel %vm2952_vm6, %v2954_v28, %v2950_v45  ;;  %v3705_v28 = vld [vmem:[%s5285_s2 + $0x1f8] sm:$0xff] }
 0xaa0   :  { %v2970_v36 = vmul.f32 %v4977_v30, %v2955_v20  ;;  %v3110_v30 = vor.u32 1.1754944e-38, %v3109_v9  ;;  %3297 = vmatpush.msra.mxu0 %v3705_v28  ;;  %v3698_v9 = vld [vmem:[%s5285_s2 + $0x1c0] sm:$0xff] }
 0xaa2   :  { %v3111_v24 = vsel %vm3108_vm13, %v3110_v30, %v3106_v41  ;;  %v3690_v41 = vld [vmem:[%s5285_s2 + $0x180] sm:$0xff] }
 0xaa3   :  { %v3126_v17 = vmul.f32 %v4979_v6, %v3111_v24  ;;  %v3686_v6 = vld [vmem:[%s5285_s2 + $0x160] sm:$0xff] }
 0xabc   :  { %v2222_v62 = vpop.f32.mrf.mxu1 }
 0xac4   :  { %v2379_v15 = vpop.f32.mrf.mxu1 }
 0xac5   :  { %v2249_v2 = vpop.f32.mrf.mxu2 }
 0xac6   :  { %v3809_v4 = vpack.i.bf16 %v2249_v2, %v2222_v62  ;;  %v3688_v62 = vld [vmem:[%s5285_s2 + $0x170] sm:$0xff] }
 0xac7   :  { %3275 = vmatpush.msra.mxu3 %v3688_v62  ;;  %v3684_v2 = vld [vmem:[%s5285_s2 + $0x150] sm:$0xff] }
 0xac8   :  { %3810 = vrot.lane.b32.xlu2 %v3809_v4, %s4002_s23  ;;  %v3682_v4 = vld [vmem:[%s5285_s2 + $0x140] sm:$0xff] }
 0xac9   :  { %3276 = vmatpush.msra.mxu3 %v3687_v12 }
 0xacb   :  { %3277 = vmatpush.msra.mxu3 %v3686_v6 }
 0xacd   :  { %v3097_v55 = vpop.xlane.xlu2 %3096  ;;  %v2405_v10 = vpop.f32.mrf.mxu2  ;;  %3278 = vmatpush.msra.mxu3 %v3685_v52 }
 0xace   :  { %3960 = vrcp.f32 %v3097_v55  ;;  %v3814_v44 = vpack.i.bf16 %v2405_v10, %v2379_v15  ;;  %v3123_v5 = vand.u32 2147483648, %v3097_v55  ;;  %v3121_v3 = vand.u32 2147483647, %v3097_v55  ;;  %v3679_v15 = vld [vmem:[%s5285_s2 + $0x128] sm:$0xff]  ;;  %v3674_v10 = vld [vmem:[%s5285_s2 + $0x100] sm:$0xff] }
 0xacf   :  { %vm3117_vm14 = vweird.f32 %v3097_v55  ;;  %3279 = vmatpush.msra.mxu3 %v3684_v2 }
 0xad0   :  { %3815 = vrot.lane.b32.xlu1 %v3814_v44, %s4000_s21  ;;  %v3124_v22 = vor.u32 1.1754944e-38, %v3123_v5  ;;  %vm3122_vm2 = vcmp.eq.f32.partialorder %v3121_v3, 8.507059e+37  ;;  %v3691_v5 = vld [vmem:[%s5285_s2 + $0x188] sm:$0xff] }
 0xad1   :  { %3280 = vmatpush.msra.mxu3 %v3683_v13 }
 0xad3   :  { %v2535_v46 = vpop.f32.mrf.mxu1  ;;  %3281 = vmatpush.msra.mxu3 %v3682_v4 }
 0xad4   :  { %v3961_v8 = vpop.eup %3960  ;;  %3198 = vrot.lane.b32.xlu2 %v2535_v46, %s4001_s22  ;;  %v3704_v46 = vld [vmem:[%s5285_s2 + $0x1f0] sm:$0xff] }
 0xad5   :  { %v3113_v59 = vmul.f32 %v3961_v8, %v3097_v55  ;;  %v3801_v47 = vpop.permute.xlu2 %3800  ;;  %vm3118_vm12 = vweird.f32 %v3961_v8  ;;  %3282 = vmatpush.msra.mxu3 %v3681_v18  ;;  %v3675_v55 = vld [vmem:[%s5285_s2 + $0x108] sm:$0xff]  ;;  %v2561_v61 = vpop.f32.mrf.mxu2  ;;  %3298 = vmatpush.msra.mxu0 %v3704_v46 }
 0xad6   :  { %v3803_v43 = vunpack.i.h.bf16 %v3801_v47  ;;  %v3802_v49 = vunpack.i.l.bf16 %v3801_v47  ;;  %vm3119_vm15 = vmor %vm3117_vm14, %vm3118_vm12 }
 0xad7   :  { %v3114_v34 = vsub.f32 1.0, %v3113_v59  ;;  %3283 = vmatpush.msra.mxu3 %v3680_v35  ;;  %v3699_v59 = vld [vmem:[%s5285_s2 + $0x1c8] sm:$0xff] }
 0xad8   :  { %2993 = vmatpush.msra.mxu1 %v3802_v49  ;;  %3019 = vmatpush.msra.mxu2 %v3803_v43 }
 0xad9   :  { %v3115_v57 = vmul.f32 %v3961_v8, %v3114_v34  ;;  %3666 = vmatmul.msk.f32.vlgmr.msra.gmra.mxu1 %vm259_vm1, %v2970_v36  ;;  %3667 = vmatmul.msk.f32.vlgmr.msra.gmra.mxu2 %vm259_vm1, %v2971_v54  ;;  %v3696_v34 = vld [vmem:[%s5285_s2 + $0x1b0] sm:$0xff]  ;;  %v3695_v36 = vld [vmem:[%s5285_s2 + $0x1a8] sm:$0xff] }
 0xada   :  { %3149 = vmatpush.msrb.mxu1 %v3807_v29  ;;  %3175 = vmatpush.msrb.mxu2 %v3808_v39  ;;  %v3693_v39 = vld [vmem:[%s5285_s2 + $0x198] sm:$0xff]  ;;  %v3692_v29 = vld [vmem:[%s5285_s2 + $0x190] sm:$0xff] }
 0xadb   :  { %v3116_v58 = vadd.f32 %v3961_v8, %v3115_v57  ;;  %3284 = vmatpush.msra.mxu3 %v3679_v15 }
 0xadd   :  { %v3120_v25 = vsel %vm3119_vm15, %v3961_v8, %v3116_v58  ;;  %3285 = vmatpush.msra.mxu3 %v3678_v7 }
 0xade   :  { %v3125_v0 = vsel %vm3122_vm2, %v3124_v22, %v3120_v25 }
 0xadf   :  { %v3127_v38 = vmul.f32 %v5023_v11, %v3125_v0  ;;  %v5101_v11 = vpop.f32.mrf.mxu1  ;;  %3286 = vmatpush.msra.mxu3 %v3677_v56 }
 0xae1   :  { %3672 = vmatmul.msk.f32.vlgmr.msrb.gmra.mxu1 %vm259_vm1, %v3126_v17  ;;  %3673 = vmatmul.msk.f32.vlgmr.msrb.gmra.mxu2 %vm259_vm1, %v3127_v38 }
 0xae2   :  { %3287 = vmatpush.msra.mxu3 %v3676_v48  ;;  %v2707_v27 = vpop.f32.mrf.mxu2 }
 0xae4   :  { %3288 = vmatpush.msra.mxu3 %v3675_v55 }
 0xae6   :  { %3289 = vmatpush.msra.mxu3 %v3674_v10 }
 0xb15   :  { %v2838_v14 = vpop.f32.mrf.mxu1 }
 0xb16   :  { %3206 = vrot.lane.b32.xlu2 %v2838_v14, %s4002_s23 }
 0xb1b   :  { %v2865_v8 = vpop.f32.mrf.mxu2 }
 0xb22   :  { %v3811_v19 = vpop.permute.xlu2 %3810 }
 0xb23   :  { %v3812_v21 = vunpack.i.l.bf16 %v3811_v19  ;;  %v3813_v3 = vunpack.i.h.bf16 %v3811_v19 }
 0xb25   :  { %v3228_v44 = vsel %vm62_vm0, %v5044_v60, %v3812_v21  ;;  %v3703_v60 = vld [vmem:[%s5285_s2 + $0x1e8] sm:$0xff]  ;;  %v3229_v22 = vsel %vm62_vm0, %v5046_v16, %v3813_v3  ;;  %s3508_s2 = sshll.u32 %s5289_s6, 4  ;;  %s3509_s2 = int_to_ptr.hbm [resolvable:$true] %s3508_s2 }
 0xb26   :  { %3299 = vmatpush.msra.mxu0 %v3703_v60 }
 0xb28   :  { %3300 = vmatpush.msra.mxu0 %v3702_v31  ;;  %v3707_v31 = vld [vmem:[%s5286_s3 + $0x28] sm:$0xff] }
 0xb2a   :  { %3301 = vmatpush.msra.mxu0 %v3701_v37 }
 0xb2c   :  { %3302 = vmatpush.msra.mxu0 %v3700_v53 }
 0xb2e   :  { %v3199_v40 = vpop.permute.xlu2 %3198  ;;  %3303 = vmatpush.msra.mxu0 %v3699_v59 }
 0xb30   :  { %3304 = vmatpush.msra.mxu0 %v3698_v9  ;;  %v3718_v9 = vld [vmem:[%s5287_s4 + $0x70] sm:$0xff] }
 0xb32   :  { %3305 = vmatpush.msra.mxu0 %v3697_v63  ;;  %v3716_v63 = vld [vmem:[%s5287_s4 + $0x60] sm:$0xff] }
 0xb34   :  { %3306 = vmatpush.msra.mxu0 %v3696_v34 }
 0xb36   :  { %3307 = vmatpush.msra.mxu0 %v3695_v36 }
 0xb38   :  { %3308 = vmatpush.msra.mxu0 %v3694_v51 }
 0xb3a   :  { %3309 = vmatpush.msra.mxu0 %v3693_v39  ;;  %v3715_v39 = vld [vmem:[%s5287_s4 + $0x58] sm:$0xff] }
 0xb3c   :  { %3310 = vmatpush.msra.mxu0 %v3692_v29 }
 0xb3e   :  { %3311 = vmatpush.msra.mxu0 %v3691_v5 }
 0xb40   :  { %3312 = vmatpush.msra.mxu0 %v3690_v41 }
 0xb42   :  { %v3816_v50 = vpop.permute.xlu1 %3815 }
 0xb43   :  { %v3817_v23 = vunpack.i.l.bf16 %v3816_v50  ;;  %v3818_v30 = vunpack.i.h.bf16 %v3816_v50 }
 0xb45   :  { %v3230_v45 = vsel %vm1490_vm10, %v3228_v44, %v3817_v23  ;;  %v3231_v25 = vsel %vm1490_vm10, %v3229_v22, %v3818_v30 }
 0xb46   :  { %v3232_v26 = vsel %vm1493_vm11, %v3230_v45, %v3199_v40 }
 0xb47   :  { %3290 = vmatmul.f32.vlgmr.msra.gmra.mxu3 %v3232_v26 }
 0xb56   :  { %v2995_v20 = vpop.f32.mrf.mxu1 }
 0xb57   :  { %3214 = vrot.lane.b32.xlu0 %v2995_v20, %s4000_s21  ;;  %v3706_v20 = vld [vmem:[%s5286_s3 + $0x20] sm:$0xff] }
 0xb5c   :  { %v3021_v47 = vpop.f32.mrf.mxu2 }
 0xb5d   :  { %3216 = vrot.lane.b32.xlu1 %v3021_v47, %s4000_s21  ;;  %v3719_v47 = vld [vmem:[%s5287_s4 + $0x78] sm:$0xff] }
 0xb5e   :  { %v3151_v43 = vpop.f32.mrf.mxu1  ;;  %3433 = vmatpush.msra.mxu2 %v3719_v47 }
 0xb5f   :  { %v3819_v49 = vpack.i.bf16 %v3151_v43, %v2561_v61  ;;  %3208 = vrot.lane.b32.xlu0 %v2865_v8, %s4002_s23  ;;  %v3708_v8 = vld [vmem:[%s5286_s3 + $0x30] sm:$0xff]  ;;  %v3717_v43 = vld [vmem:[%s5287_s4 + $0x68] sm:$0xff] }
 0xb60   :  { %3434 = vmatpush.msra.mxu2 %v3718_v9 }
 0xb61   :  { %3820 = vrot.lane.b32.xlu2 %v3819_v49, %s4001_s22 }
 0xb62   :  { %3435 = vmatpush.msra.mxu2 %v3717_v43 }
 0xb64   :  { %v3177_v54 = vpop.f32.mrf.mxu2  ;;  %3436 = vmatpush.msra.mxu2 %v3716_v63 }
 0xb66   :  { %3437 = vmatpush.msra.mxu2 %v3715_v39 }
 0xb69   :  { %3224 = vrot.lane.b32.xlu2 %v3177_v54, %s4001_s22 }
 0xb70   :  { %v3207_v57 = vpop.permute.xlu2 %3206 }
 0xb71   :  { %v3234_v17 = vsel %vm62_vm0, %v5101_v11, %v3207_v57  ;;  %v5211_v11 = vld [vmem:[%s5288_s5 + $0x30] sm:$0xff]  ;;  %s4006_s5 = smov 8  }
 0xb72   :  { %v3273_v18 = vperm.slane %v5211_v11, 0  ;;  %v3366_v30 = vperm.slane %v5211_v11, 1  ;;  %v3369_v22 = vperm.slane %v5211_v11, 2 }
 0xbbb   :  { %v3821_v58 = vpop.permute.xlu2 %3820 }
 0xbbc   :  { %v3822_v24 = vunpack.i.l.bf16 %v3821_v58  ;;  %v3823_v38 = vunpack.i.h.bf16 %v3821_v58 }
 0xbbe   :  { %v3233_v0 = vsel %vm1493_vm11, %v3231_v25, %v3822_v24 }
 0xbbf   :  { %3293 = vmatmul.f32.gmra.mxu3 %v3233_v0 }
 0xbc3   :  { %v3225_v16 = vpop.permute.xlu2 %3224 }
 0xbc9   :  { %v3215_v1 = vpop.permute.xlu0 %3214 }
 0xbca   :  { %v3236_v62 = vsel %vm1490_vm10, %v3234_v17, %v3215_v1  ;;  %v3291_v14 = vpop.f32.mrf.mxu3 }
 0xbcb   :  { %v3238_v12 = vsel %vm1493_vm11, %v3236_v62, %v3823_v38  ;;  %v3292_v35 = vadd.f32 %v3291_v14, %v3273_v18  ;;  %v3377_v14 = vperm.slane %v5211_v11, 3 }
 0xbcc   :  { %3313 = vmatmul.f32.vlgmr.msra.gmra.mxu0 %v3238_v12 }
 0xbcf   :  { %v3217_v52 = vpop.permute.xlu1 %3216 }
 0xbd1   :  { %v3209_v6 = vpop.permute.xlu0 %3208 }
 0xbd2   :  { %v3235_v2 = vsel %vm62_vm0, %v2707_v27, %v3209_v6 }
 0xbd3   :  { %v3237_v13 = vsel %vm1490_vm10, %v3235_v2, %v3217_v52 }
 0xbd4   :  { %v3239_v4 = vsel %vm1493_vm11, %v3237_v13, %v3225_v16  ;;  %v3714_v13 = vld [vmem:[%s5287_s4 + $0x50] sm:$0xff] }
 0xbd5   :  { %3316 = vmatmul.f32.gmra.mxu0 %v3239_v4  ;;  %3438 = vmatpush.msra.mxu2 %v3714_v13  ;;  %v3713_v4 = vld [vmem:[%s5287_s4 + $0x48] sm:$0xff] }
 0xbd7   :  { %3439 = vmatpush.msra.mxu2 %v3713_v4 }
 0xc42   :  { %v3294_v48 = vpop.f32.mrf.mxu3 }
 0xc43   :  { %v3295_v10 = vadd.f32 %v3294_v48, %v3273_v18  ;;  %v3712_v18 = vld [vmem:[%s5287_s4 + $0x40] sm:$0xff]  ;;  %s4004_s4 = smov [#allocation2]  }
 0xc44   :  { %3440 = vmatpush.msra.mxu2 %v3712_v18  ;;  %s3506_s7 = sshll.u32 %s4004_s4, 4  ;;  %s3507_s7 = int_to_ptr.vmem [resolvable:$true] %s3506_s7 }
 0xc49   :  { %v3314_v15 = vpop.f32.mrf.mxu0 }
 0xc4a   :  { %v3315_v7 = vadd.f32 %v3314_v15, %v3292_v35 }
 0xc4c   :  { %v3320_v56 = vadd.f32 %v3315_v7, %v4754_v33 }
 0xc4e   :  { %v3322_v55 = vsel %vm62_vm0, %v3320_v56, 0.0 }
 0xc4f   :  { %3323 = vadd.xlane.f32.xlu0 %v3322_v55 }
 0xc52   :  { %v3317_v19 = vpop.f32.mrf.mxu0 }
 0xc53   :  { %v3318_v21 = vadd.f32 %v3317_v19, %v3295_v10  ;;  %v3418_v10 = vperm.slane %v5211_v11, 4 }
 0xc55   :  { %v3321_v50 = vadd.f32 %v3318_v21, %v4765_v32  ;;  %v3709_v32 = vld [vmem:[%s5286_s3 + $0x38] sm:$0xff] }
 0xc56   :  { %3396 = vmatpush.msra.mxu1 %v3709_v32 }
 0xc57   :  { %v3325_v61 = vsel %vm62_vm0, %v3321_v50, 0.0 }
 0xc58   :  { %3326 = vadd.xlane.f32.xlu1 %v3325_v61  ;;  %3397 = vmatpush.msra.mxu1 %v3708_v8 }
 0xc5a   :  { %3398 = vmatpush.msra.mxu1 %v3707_v31 }
 0xc5c   :  { %3399 = vmatpush.msra.mxu1 %v3706_v20 }
 0xcc2   :  { %v3324_v23 = vpop.xlane.xlu0 %3323 }
 0xcc3   :  { %v3328_v44 = vmul.f32 %v3324_v23, %v4611_v42 }
 0xcc5   :  { %v3330_v40 = vsub.f32 %v3320_v56, %v3328_v44 }
 0xcc7   :  { %v3332_v45 = vmul.f32 %v3330_v40, %v3330_v40 }
 0xcc9   :  { %v3334_v26 = vsel %vm62_vm0, %v3332_v45, 0.0 }
 0xcca   :  { %3335 = vadd.xlane.f32.xlu2 %v3334_v26 }
 0xccb   :  { %v3327_v33 = vpop.xlane.xlu1 %3326 }
 0xccc   :  { %v3329_v27 = vmul.f32 %v3327_v33, %v4611_v42 }
 0xcce   :  { %v3331_v28 = vsub.f32 %v3321_v50, %v3329_v27 }
 0xcd0   :  { %v3333_v46 = vmul.f32 %v3331_v28, %v3331_v28 }
 0xcd2   :  { %v3337_v60 = vsel %vm62_vm0, %v3333_v46, 0.0 }
 0xcd3   :  { %3338 = vadd.xlane.f32.xlu0 %v3337_v60 }
 0xd3d   :  { %v3336_v37 = vpop.xlane.xlu2 %3335 }
 0xd3e   :  { %v3340_v53 = vmul.f32 %v3336_v37, %v4611_v42 }
 0xd40   :  { %v3342_v59 = vadd.f32 1e-05, %v3340_v53 }
 0xd42   :  { %3962 = vrsqrt.f32 %v3342_v59  ;;  %vm3350_vm11 = vweird.f32 %v3342_v59 }
 0xd46   :  { %v3339_v49 = vpop.xlane.xlu0 %3338 }
 0xd47   :  { %v3341_v54 = vmul.f32 %v3339_v49, %v4611_v42 }
 0xd48   :  { %v3963_v34 = vpop.eup %3962 }
 0xd49   :  { %v3345_v36 = vmul.f32 %v3963_v34, %v3342_v59  ;;  %v3343_v51 = vadd.f32 1e-05, %v3341_v54  ;;  %vm3351_vm1 = vweird.f32 %v3963_v34 }
 0xd4a   :  { %vm3352_vm3 = vmor %vm3350_vm11, %vm3351_vm1 }
 0xd4b   :  { %v3346_v29 = vmul.f32 %v3963_v34, %v3345_v36  ;;  %3964 = vrsqrt.f32 %v3343_v51  ;;  %vm3360_vm5 = vweird.f32 %v3343_v51 }
 0xd4d   :  { %v3347_v5 = vmul.f32 0.5, %v3346_v29  ;;  %v3494_v29 = vperm.slane %v5211_v11, 5 }
 0xd4f   :  { %v3348_v41 = vsub.f32 1.5, %v3347_v5 }
 0xd51   :  { %v3965_v57 = vpop.eup %3964  ;;  %v3349_v3 = vmul.f32 %v3963_v34, %v3348_v41 }
 0xd52   :  { %v3355_v58 = vmul.f32 %v3965_v57, %v3343_v51  ;;  %vm3361_vm4 = vweird.f32 %v3965_v57 }
 0xd53   :  { %v3353_v24 = vsel %vm3352_vm3, %v3963_v34, %v3349_v3  ;;  %vm3362_vm6 = vmor %vm3360_vm5, %vm3361_vm4 }
 0xd54   :  { %v3364_v25 = vmul.f32 %v3353_v24, %v3330_v40  ;;  %v3356_v0 = vmul.f32 %v3965_v57, %v3355_v58 }
 0xd56   :  { %v3367_v17 = vmul.f32 %v3366_v30, %v3364_v25  ;;  %v3357_v38 = vmul.f32 0.5, %v3356_v0 }
 0xd58   :  { %v3370_v1 = vadd.f32 %v3369_v22, %v3367_v17  ;;  %v3358_v62 = vsub.f32 1.5, %v3357_v38 }
 0xd5a   :  { %v3359_v12 = vmul.f32 %v3965_v57, %v3358_v62  ;;  %3710 = vmatmul.msk.f32.vlgmr.msra.gmra.mxu1 %vm62_vm0, %v3370_v1 }
 0xd5c   :  { %v3363_v6 = vsel %vm3362_vm6, %v3965_v57, %v3359_v12 }
 0xd5d   :  { %v3365_v52 = vmul.f32 %v3363_v6, %v3331_v28 }
 0xd5f   :  { %v3368_v2 = vmul.f32 %v3366_v30, %v3365_v52 }
 0xd61   :  { %v3371_v16 = vadd.f32 %v3369_v22, %v3368_v2 }
 0xd63   :  { %3711 = vmatmul.msk.f32.gmra.mxu1 %vm62_vm0, %v3371_v16 }
 0xdd7   :  { %v3401_v35 = vpop.f32.mrf.mxu1 }
 0xdd8   :  { %v3402_v15 = vadd.f32 %v3401_v35, %v3377_v14 }
 0xdda   :  { %v3407_v7 = vmax.f32 %v3402_v15, 0.0 }
 0xddc   :  { %3720 = vmatmul.msk.f32.vlgmr.msra.gmra.mxu2 %vm1490_vm10, %v3407_v7 }
 0xde0   :  { %v3404_v56 = vpop.f32.mrf.mxu1 }
 0xde1   :  { %v3405_v48 = vadd.f32 %v3404_v56, %v3377_v14 }
 0xde3   :  { %v3408_v55 = vmax.f32 %v3405_v48, 0.0 }
 0xde5   :  { %3721 = vmatmul.msk.f32.gmra.mxu2 %vm1490_vm10, %v3408_v55 }
 0xe5f   :  { %v3442_v19 = vpop.f32.mrf.mxu2 }
 0xe60   :  { %v3443_v21 = vadd.f32 %v3442_v19, %v3418_v10 }
 0xe62   :  { %v3448_v50 = vadd.f32 %v3443_v21, %v3370_v1 }
 0xe64   :  { %v3450_v61 = vsel %vm62_vm0, %v3448_v50, 0.0 }
 0xe65   :  { %3451 = vadd.xlane.f32.xlu1 %v3450_v61 }
 0xe68   :  { %v3445_v23 = vpop.f32.mrf.mxu2 }
 0xe69   :  { %v3446_v44 = vadd.f32 %v3445_v23, %v3418_v10 }
 0xe6b   :  { %v3449_v40 = vadd.f32 %v3446_v44, %v3371_v16 }
 0xe6d   :  { %v3453_v45 = vsel %vm62_vm0, %v3449_v40, 0.0 }
 0xe6e   :  { %3454 = vadd.xlane.f32.xlu2 %v3453_v45 }
 0xed8   :  { %v3452_v26 = vpop.xlane.xlu1 %3451 }
 0xed9   :  { %v3456_v33 = vmul.f32 %v3452_v26, %v4611_v42 }
 0xedb   :  { %v3458_v27 = vsub.f32 %v3448_v50, %v3456_v33 }
 0xedd   :  { %v3460_v28 = vmul.f32 %v3458_v27, %v3458_v27 }
 0xedf   :  { %v3462_v46 = vsel %vm62_vm0, %v3460_v28, 0.0 }
 0xee0   :  { %3463 = vadd.xlane.f32.xlu0 %v3462_v46 }
 0xee1   :  { %v3455_v60 = vpop.xlane.xlu2 %3454 }
 0xee2   :  { %v3457_v32 = vmul.f32 %v3455_v60, %v4611_v42 }
 0xee4   :  { %v3459_v8 = vsub.f32 %v3449_v40, %v3457_v32 }
 0xee6   :  { %v3461_v31 = vmul.f32 %v3459_v8, %v3459_v8 }
 0xee8   :  { %v3465_v20 = vsel %vm62_vm0, %v3461_v31, 0.0 }
 0xee9   :  { %3466 = vadd.xlane.f32.xlu1 %v3465_v20 }
 0xf53   :  { %v3464_v37 = vpop.xlane.xlu0 %3463 }
 0xf54   :  { %v3468_v53 = vmul.f32 %v3464_v37, %v4611_v42 }
 0xf56   :  { %v3470_v59 = vadd.f32 1e-05, %v3468_v53 }
 0xf58   :  { %3966 = vrsqrt.f32 %v3470_v59  ;;  %vm3478_vm7 = vweird.f32 %v3470_v59 }
 0xf5c   :  { %v3467_v47 = vpop.xlane.xlu1 %3466 }
 0xf5d   :  { %v3469_v9 = vmul.f32 %v3467_v47, %v4611_v42  ;;  %v3497_v42 = vperm.slane %v5211_v11, 6 }
 0xf5e   :  { %v3967_v43 = vpop.eup %3966 }
 0xf5f   :  { %v3473_v49 = vmul.f32 %v3967_v43, %v3470_v59  ;;  %v3471_v54 = vadd.f32 1e-05, %v3469_v9  ;;  %vm3479_vm10 = vweird.f32 %v3967_v43 }
 0xf60   :  { %vm3480_vm8 = vmor %vm3478_vm7, %vm3479_vm10 }
 0xf61   :  { %v3474_v63 = vmul.f32 %v3967_v43, %v3473_v49  ;;  %3968 = vrsqrt.f32 %v3471_v54  ;;  %vm3488_vm12 = vweird.f32 %v3471_v54 }
 0xf63   :  { %v3475_v34 = vmul.f32 0.5, %v3474_v63 }
 0xf65   :  { %v3476_v36 = vsub.f32 1.5, %v3475_v34 }
 0xf67   :  { %v3969_v51 = vpop.eup %3968  ;;  %v3477_v39 = vmul.f32 %v3967_v43, %v3476_v36 }
 0xf68   :  { %v3483_v5 = vmul.f32 %v3969_v51, %v3471_v54  ;;  %vm3489_vm9 = vweird.f32 %v3969_v51 }
 0xf69   :  { %v3481_v41 = vsel %vm3480_vm8, %v3967_v43, %v3477_v39  ;;  %vm3490_vm13 = vmor %vm3488_vm12, %vm3489_vm9 }
 0xf6a   :  { %v3492_v57 = vmul.f32 %v3481_v41, %v3458_v27  ;;  %v3484_v3 = vmul.f32 %v3969_v51, %v3483_v5 }
 0xf6c   :  { %v3495_v30 = vmul.f32 %v3494_v29, %v3492_v57  ;;  %v3485_v58 = vmul.f32 0.5, %v3484_v3 }
 0xf6e   :  { %v3486_v24 = vsub.f32 1.5, %v3485_v58  ;;  %v3498_v22 = vadd.f32 %v3497_v42, %v3495_v30 }
 0xf70   :  { %v3487_v25 = vmul.f32 %v3969_v51, %v3486_v24  ;;  %3500 = vst.msk [vmem:[#allocation2] sm:$0xff] %vm62_vm0, %v3498_v22 }
 0xf72   :  { %v3491_v0 = vsel %vm3490_vm13, %v3969_v51, %v3487_v25 }
 0xf73   :  { %v3493_v17 = vmul.f32 %v3491_v0, %v3459_v8 }
 0xf75   :  { %v3496_v38 = vmul.f32 %v3494_v29, %v3493_v17 }
 0xf77   :  { %v3499_v11 = vadd.f32 %v3497_v42, %v3496_v38 }
 0xf79   :  { %3501 = vst.msk [vmem:[#allocation2 + $0x8] sm:$0xff] %vm62_vm0, %v3499_v11 }
 0xf7a   :  { %3514 = dma.vmem_to_hbm [thread:$0]  %s3507_s7, 256, %s3509_s2, [#allocation3], %s4005_s10, %s4005_s10, %s4006_s5  }
 0xf7b   :  { %3998 = dma.done.wait [#allocation3], 256  }
 0xf7c   :  { %3999 = vsyncadd [#allocation3], 4294967040 }
 0xf7d   :  { %3519 = vsyncpa [#allocation3], 1 }

</bundles_post_ra>
